<compile_context>
chip_gen: v7x
topology: tpu7x:2x2x1
jax: 0.10.0
libtpu: 0.0.40
codegen_flags: <defaults>
</compile_context>

<pallas_src>
import numpy as np

import jax
import jax.numpy as jnp
from jax import lax
from jax.experimental import pallas as pl
from jax.experimental.pallas import tpu as pltpu

NEG_SLOPE = 0.01  # nn.LeakyReLU default negative_slope


# ----------------------------------------------------------------------------
# In-kernel helpers
# ----------------------------------------------------------------------------
def _leaky_relu(x):
    return jnp.where(x >= 0, x, NEG_SLOPE * x)


def _conv_same(xb, w, b):
    """'same' 1-D conv as k accumulating MXU matmuls over S-shifted views.

    xb: (n, s, cin) bf16; w: (k, cin, cout) bf16; b: (1, cout) f32
    -> (n, s, cout) f32 (no im2col lane concat, no k*cin patch temp)."""
    n, s, cin = xb.shape
    k, _, cout = w.shape
    pad = k // 2
    if pad:
        z = jnp.zeros((n, pad, cin), xb.dtype)
        xp = jnp.concatenate([z, xb, z], axis=1)        # (n, s+2p, cin)
    else:
        xp = xb
    out = None
    for j in range(k):
        xj = xp[:, j:j + s, :].reshape(n * s, cin)
        d = jnp.dot(xj, w[j], preferred_element_type=jnp.float32)
        out = d if out is None else out + d
    return (out + b).reshape(n, s, cout)


def _inception_into(x_val, ws1_ref, bs1_ref, ws2_ref, bs2_ref, out_ref, *, pool):
    """One Inception block, written straight into out_ref (no trailing concat).

    Stage 1 (merged k=3 conv over x):        [b1 | h2 | h3 | b4]   (4*cos lanes)
    Stage 2 (merged k=5 conv over [h2|h3]):  [b2 | b3]             (2*cos lanes)
    Final channel layout (PyTorch order):    [b1 | b2 | b3 | b4].
    The outer LeakyReLU on b1/b4 and the inner LeakyReLU on h2/h3 are the same
    elementwise op on the stage-1 result; b2/b3 get the outer LeakyReLU on stage 2.
    """
    n, s, _ = x_val.shape
    c = ws1_ref.shape[-1]
    cos = c // 4
    xb = x_val.astype(jnp.bfloat16)

    s1 = _leaky_relu(_conv_same(xb, ws1_ref[...], bs1_ref[...]))       # (n,s,4cos) f32
    mid = s1[:, :, cos:3 * cos].astype(jnp.bfloat16)                   # [h2 | h3]
    s2 = _leaky_relu(_conv_same(mid, ws2_ref[...], bs2_ref[...]))      # (n,s,2cos) f32

    if pool:
        # Fused F.max_pool1d over the full sequence dim: emit only (n, 4*cos).
        # (Middle lanes of the stage-1 pool are overwritten below; pooling is cheap.)
        out_ref[...] = jnp.max(s1, axis=1).astype(out_ref.dtype)
        out_ref[:, cos:3 * cos] = jnp.max(s2, axis=1).astype(out_ref.dtype)
    else:
        out_ref[...] = s1.astype(out_ref.dtype)
        out_ref[:, :, cos:3 * cos] = s2.astype(out_ref.dtype)


# ----------------------------------------------------------------------------
# Fused CNN kernel: Inception1 -> Inception2 -> global max-pool, one pallas_call
# ----------------------------------------------------------------------------
def _cnn_kernel(x_ref,
                w1s1, b1s1, w1s2, b1s2,
                w2s1, b2s1, w2s2, b2s2,
                o_ref, h_ref):
    # Block 1 output stays in VMEM scratch (bf16) - no HBM round-trip.
    _inception_into(x_ref[...], w1s1, b1s1, w1s2, b1s2, h_ref, pool=False)
    # Block 2 fused with the max-pool epilogue: emits (tile_n, 4*cos).
    _inception_into(h_ref[...], w2s1, b2s1, w2s2, b2s2, o_ref, pool=True)


def cnn_maxpool(emb, p1, p2, *, tile_n=64):
    """emb: (N, S, E) f32 -> pooled sentence features (N, C) f32."""
    n, s, cin = emb.shape
    c = int(p1["ws1"].shape[-1])

    tile_n = min(tile_n, n)
    n_pad = ((n + tile_n - 1) // tile_n) * tile_n
    if n_pad != n:
        emb = jnp.concatenate(
            [emb, jnp.zeros((n_pad - n, s, cin), emb.dtype)], axis=0)

    wargs = [p1["ws1"], p1["bs1"], p1["ws2"], p1["bs2"],
             p2["ws1"], p2["bs1"], p2["ws2"], p2["bs2"]]
    wspecs = [pl.BlockSpec(a.shape, lambda i, nd=a.ndim: (0,) * nd) for a in wargs]

    out = pl.pallas_call(
        _cnn_kernel,
        out_shape=jax.ShapeDtypeStruct((n_pad, c), jnp.float32),
        grid=(n_pad // tile_n,),
        in_specs=[pl.BlockSpec((tile_n, s, cin), lambda i: (i, 0, 0))] + wspecs,
        out_specs=pl.BlockSpec((tile_n, c), lambda i: (i, 0)),
        scratch_shapes=[pltpu.VMEM((tile_n, s, c), jnp.bfloat16)],   # inter-block act
        compiler_params=pltpu.CompilerParams(
            dimension_semantics=("parallel",),
            vmem_limit_bytes=48 * 1024 * 1024),   # <=48MiB: safe on v7x, >32MiB default
    )(emb, *wargs)
    return out[:n]


# ----------------------------------------------------------------------------
# Fused 2-layer bidirectional LSTM (packed-sequence / length-mask semantics)
#   - per layer: Wih (Din, 8H) = [fwd | rev] gates, Whh (2H, 8H) block-diagonal,
#     bias (1, 8H); gate order i, f, g, o per direction
#   - input projection hoisted (one matmul per layer); one fused gate matmul per
#     recurrence step covers both directions (K = 2H = 128)
#   - layer 1 consumes layer 0's output directly from VMEM scratch
# ----------------------------------------------------------------------------
def _bilstm2_kernel(len_ref, x_ref,
                    wih0_ref, whh0_ref, b0_ref,
                    wih1_ref, whh1_ref, b1_ref,
                    y_ref, xw, yf, yr):
    T, Bt, Din = x_ref.shape
    H = yf.shape[-1]
    G = 4 * H
    lengths = len_ref[...]                      # (Bt, 1) int32 essay lengths

    def recurrence(whh_ref, unroll):
        whh = whh_ref[...]                      # (2H, 8H) bf16 block-diag [Wf 0; 0 Wr]

        def lstm_cell(g, c_prev):
            i_g = jax.nn.sigmoid(g[:, 0:H])
            f_g = jax.nn.sigmoid(g[:, H:2 * H])
            g_g = jnp.tanh(g[:, 2 * H:3 * H])
            o_g = jax.nn.sigmoid(g[:, 3 * H:4 * H])
            c_new = f_g * c_prev + i_g * g_g
            return o_g * jnp.tanh(c_new), c_new

        def step(i, carry):
            h, c = carry                        # (Bt, 2H): [h_fwd | h_rev]
            tf = i
            tr = T - 1 - i
            # Single fused MXU matmul per step: both directions x all 4 gates.
            g = jnp.dot(h.astype(jnp.bfloat16), whh,
                        preferred_element_type=jnp.float32)          # (Bt, 8H)
            g_f = g[:, :G] + xw[tf][:, :G]
            g_r = g[:, G:] + xw[tr][:, G:]
            h_f, c_f = lstm_cell(g_f, c[:, :H])
            h_r, c_r = lstm_cell(g_r, c[:, H:])
            # pack_padded_sequence semantics: padded steps emit 0 and carry state.
            m_f = lengths > tf
            m_r = lengths > tr
            yf[tf] = jnp.where(m_f, h_f, 0.0)
            yr[tr] = jnp.where(m_r, h_r, 0.0)
            h_new = jnp.concatenate([jnp.where(m_f, h_f, h[:, :H]),
                                     jnp.where(m_r, h_r, h[:, H:])], axis=-1)
            c_new = jnp.concatenate([jnp.where(m_f, c_f, c[:, :H]),
                                     jnp.where(m_r, c_r, c[:, H:])], axis=-1)
            return h_new, c_new

        z = jnp.zeros((Bt, 2 * H), jnp.float32)
        lax.fori_loop(0, T, step, (z, z), unroll=unroll)

    unroll = min(4, T)

    # ---- layer 0: hoisted input projection (one wide matmul, fwd+rev fused) ----
    x2d = x_ref[...].reshape(T * Bt, Din).astype(jnp.bfloat16)
    xw[...] = (jnp.dot(x2d, wih0_ref[...], preferred_element_type=jnp.float32)
               + b0_ref[...]).reshape(T, Bt, 8 * H)
    recurrence(whh0_ref, unroll)

    # ---- layer 1: consumes layer-0 output straight from VMEM (no HBM round-trip).
    # The (2H)-wide input matmul is split into two K=H dots so no lane concat of
    # the direction halves is ever materialized; xw / yf / yr scratches are reused.
    yf2d = yf[...].reshape(T * Bt, H).astype(jnp.bfloat16)
    yr2d = yr[...].reshape(T * Bt, H).astype(jnp.bfloat16)
    xw[...] = (jnp.dot(yf2d, wih1_ref[0:H, :], preferred_element_type=jnp.float32)
               + jnp.dot(yr2d, wih1_ref[H:2 * H, :], preferred_element_type=jnp.float32)
               + b1_ref[...]).reshape(T, Bt, 8 * H)
    recurrence(whh1_ref, unroll)

    # ---- epilogue: write direction halves straight into the output lanes ----
    y_ref[:, :, 0:H] = yf[...]
    y_ref[:, :, H:2 * H] = yr[...]


def bilstm2(x_tbd, len_b1, lp, *, tile_b=16):
    """x: (T, B, Din) f32, lengths: (B, 1) int32 -> (T, B, 2H) f32."""
    T, B, Din = x_tbd.shape
    H = int(lp["l0"]["whh"].shape[0]) // 2

    tile_b = min(tile_b, B)
    if B % tile_b != 0 or tile_b % 8 != 0:
        tile_b = B          # keep the sublane block dim legal without padding

    wargs = [lp["l0"]["wih"], lp["l0"]["whh"], lp["l0"]["b"],
             lp["l1"]["wih"], lp["l1"]["whh"], lp["l1"]["b"]]
    wspecs = [pl.BlockSpec(a.shape, lambda i, nd=a.ndim: (0,) * nd) for a in wargs]

    return pl.pallas_call(
        _bilstm2_kernel,
        out_shape=jax.ShapeDtypeStruct((T, B, 2 * H), jnp.float32),
        grid=(B // tile_b,),
        in_specs=[pl.BlockSpec((tile_b, 1), lambda i: (i, 0)),
                  pl.BlockSpec((T, tile_b, Din), lambda i: (0, i, 0))] + wspecs,
        out_specs=pl.BlockSpec((T, tile_b, 2 * H), lambda i: (0, i, 0)),
        scratch_shapes=[
            pltpu.VMEM((T, tile_b, 8 * H), jnp.float32),   # xW, reused by both layers
            pltpu.VMEM((T, tile_b, H), jnp.float32),       # fwd outputs (both layers)
            pltpu.VMEM((T, tile_b, H), jnp.float32),       # rev outputs (both layers)
        ],
        compiler_params=pltpu.CompilerParams(
            dimension_semantics=("parallel",),
            vmem_limit_bytes=48 * 1024 * 1024),
    )(len_b1, x_tbd, *wargs)


# ----------------------------------------------------------------------------
# Full EssayNet forward
# ----------------------------------------------------------------------------
def essaynet_forward(params, sens, lengths, topk):
    # nn.Embedding lookup (plain JAX glue).
    # TODO(synk): could be folded into the CNN kernel via scalar-prefetch row gather.
    emb = jnp.take(params["embedding"], sens, axis=0)            # (N, S, E)

    # Fused Inception1 + Inception2 + global max-pool (single Pallas kernel).
    pooled = cnn_maxpool(emb, params["inc1"], params["inc2"])    # (N, C) f32

    # pad_sequence over essays as a single gather (lengths is a static list,
    # sorted descending as pack_padded_sequence requires).
    N, C = pooled.shape
    B, T = len(lengths), max(lengths)
    offsets = np.cumsum([0] + list(lengths))[:-1]
    gidx = np.full((B, T), N, dtype=np.int32)                    # N -> zero row
    for b, l in enumerate(lengths):
        gidx[b, :l] = offsets[b] + np.arange(l, dtype=np.int32)
    pooled_pad = jnp.concatenate([pooled, jnp.zeros((1, C), pooled.dtype)], axis=0)
    essays = jnp.take(pooled_pad, jnp.asarray(gidx), axis=0)     # (B, T, C)
    len_arr = jnp.asarray(lengths, jnp.int32).reshape(B, 1)

    # Fused 2-layer bidirectional LSTM (Pallas, time-major, batch-tiled grid).
    x = jnp.transpose(essays, (1, 0, 2))                         # (T, B, C)
    y = bilstm2(x, len_arr, params["lstm"])                      # (T, B, 2H)

    # transpose(1, 2) + kmax pooling (top-k values kept in time order) — glue.
    # TODO(synk): topk/sorted-gather have no clean Mosaic lowering; plain JAX.
    y = jnp.transpose(y, (1, 2, 0))                              # (B, 2H, T)
    _, idxs = lax.top_k(y, topk)
    idxs = jnp.sort(idxs, axis=-1)
    ykm = jnp.take_along_axis(y, idxs, axis=-1)                  # (B, 2H, topk)
    return ykm.reshape(B, -1)


# ----------------------------------------------------------------------------
# Deterministic parameter construction (synthetic, no checkpoint)
# ----------------------------------------------------------------------------
def _glorot(key, shape, fan_in, fan_out):
    std = (2.0 / (fan_in + fan_out)) ** 0.5
    return std * jax.random.normal(key, shape, jnp.float32)


def init_inception_params(key, cin, co):
    """Per-branch conv weights merged into two wide MXU-friendly stage weights."""
    cos = co // 4
    ks = jax.random.split(key, 10)
    w1 = _glorot(ks[0], (1, cin, cos), cin, cos)            # branch1: k=1
    w2a = _glorot(ks[1], (1, cin, cos), cin, cos)           # branch2 first: k=1
    w2b = _glorot(ks[2], (3, cos, cos), 3 * cos, cos)       # branch2 second: k=3
    w3a = _glorot(ks[3], (3, cin, cos), 3 * cin, cos)       # branch3 first: k=3
    w3b = _glorot(ks[4], (5, cos, cos), 5 * cos, cos)       # branch3 second: k=5
    w4 = _glorot(ks[5], (3, cin, cos), 3 * cin, cos)        # branch4: k=3
    b1 = 0.01 * jax.random.normal(ks[6], (cos,), jnp.float32)
    b2b = 0.01 * jax.random.normal(ks[7], (cos,), jnp.float32)
    b3b = 0.01 * jax.random.normal(ks[8], (cos,), jnp.float32)
    b4 = 0.01 * jax.random.normal(ks[9], (cos,), jnp.float32)
    zb = jnp.zeros((cos,), jnp.float32)                     # branch2/3 first-conv biases

    # Stage 1: one k=3 conv producing [b1 | h2 | h3 | b4] (k=1 convs at center tap).
    ws1 = jnp.zeros((3, cin, 4 * cos), jnp.float32)
    ws1 = ws1.at[1, :, 0:cos].set(w1[0])
    ws1 = ws1.at[1, :, cos:2 * cos].set(w2a[0])
    ws1 = ws1.at[:, :, 2 * cos:3 * cos].set(w3a)
    ws1 = ws1.at[:, :, 3 * cos:4 * cos].set(w4)
    bs1 = jnp.concatenate([b1, zb, zb, b4]).reshape(1, 4 * cos)

    # Stage 2: one k=5 conv over [h2 | h3] producing [b2 | b3] (k=3 at taps 1..3).
    ws2 = jnp.zeros((5, 2 * cos, 2 * cos), jnp.float32)
    ws2 = ws2.at[1:4, 0:cos, 0:cos].set(w2b)
    ws2 = ws2.at[:, cos:2 * cos, cos:2 * cos].set(w3b)
    bs2 = jnp.concatenate([b2b, b3b]).reshape(1, 2 * cos)

    return {"ws1": ws1.astype(jnp.bfloat16), "bs1": bs1,
            "ws2": ws2.astype(jnp.bfloat16), "bs2": bs2}


def init_bilstm_layer_params(key, din, h):
    """Fused bidirectional layer weights (gate order i, f, g, o per direction).

    wih: (din, 8h) = [fwd gates | rev gates]; b: (1, 8h) = b_ih + b_hh fused;
    whh: (2h, 8h) block-diagonal [Whh_f 0; 0 Whh_r]."""
    kf, kr = jax.random.split(key)

    def one_dir(k):
        k1, k2, k3 = jax.random.split(k, 3)
        wih = 0.1 * jax.random.normal(k1, (din, 4 * h), jnp.float32)
        whh = 0.1 * jax.random.normal(k2, (h, 4 * h), jnp.float32)
        b = 0.1 * jax.random.normal(k3, (1, 4 * h), jnp.float32)
        return wih, whh, b

    wih_f, whh_f, b_f = one_dir(kf)
    wih_r, whh_r, b_r = one_dir(kr)
    wih = jnp.concatenate([wih_f, wih_r], axis=-1).astype(jnp.bfloat16)
    b = jnp.concatenate([b_f, b_r], axis=-1)
    whh = jnp.zeros((2 * h, 8 * h), jnp.float32)
    whh = whh.at[:h, :4 * h].set(whh_f).at[h:, 4 * h:].set(whh_r)
    return {"wih": wih, "whh": whh.astype(jnp.bfloat16), "b": b}


def init_params(key, vocab, emb_dim, inc_dim, hidden):
    ks = jax.random.split(key, 5)
    return {
        "embedding": jax.random.normal(ks[0], (vocab, emb_dim), jnp.float32),
        "inc1": init_inception_params(ks[1], emb_dim, inc_dim),
        "inc2": init_inception_params(ks[2], inc_dim, inc_dim),
        "lstm": {
            "l0": init_bilstm_layer_params(ks[3], inc_dim, hidden),
            "l1": init_bilstm_layer_params(ks[4], 2 * hidden, hidden),
        },
    }


if __name__ == "__main__":
    key = jax.random.PRNGKey(0)
    # Lane-aligned small dims: inception output = 128 channels, 2H = 128.
    vocab, emb_dim, inc_dim, hidden, topk = 50, 32, 128, 64, 2
    seq_len = 16
    lengths = [3, 3, 2]                 # sentences per essay (sorted descending)
    n_sent = sum(lengths)               # 8 sentences

    pkey, dkey = jax.random.split(key)
    params = init_params(pkey, vocab, emb_dim, inc_dim, hidden)
    sens = jax.random.randint(dkey, (n_sent, seq_len), 0, vocab, dtype=jnp.int32)

    out = essaynet_forward(params, sens, lengths, topk)
    out = jax.block_until_ready(out)
    assert out.shape == (len(lengths), 2 * hidden * topk), out.shape
    assert bool(jnp.all(jnp.isfinite(out)))
    print("KERNEL_OK")
</pallas_src>

<mosaic_0001>
module attributes {stable_mosaic.version = 11 : i64} {
  func.func @_cnn_kernel(%arg0: i32, %arg1: memref<8x16x32xf32, #tpu.memory_space<vmem>>, %arg2: memref<3x32x128xbf16, #tpu.memory_space<vmem>>, %arg3: memref<1x128xf32, #tpu.memory_space<vmem>>, %arg4: memref<5x64x64xbf16, #tpu.memory_space<vmem>>, %arg5: memref<1x64xf32, #tpu.memory_space<vmem>>, %arg6: memref<3x128x128xbf16, #tpu.memory_space<vmem>>, %arg7: memref<1x128xf32, #tpu.memory_space<vmem>>, %arg8: memref<5x64x64xbf16, #tpu.memory_space<vmem>>, %arg9: memref<1x64xf32, #tpu.memory_space<vmem>>, %arg10: memref<8x128xf32, #tpu.memory_space<vmem>>, %arg11: memref<8x16x128xbf16, #tpu.memory_space<vmem>>) attributes {dimension_semantics = [#tpu.dimension_semantics<parallel>], iteration_bounds = array<i64: 1>, scalar_prefetch = 0 : i64, scratch_operands = 1 : i64, tpu.core_type = #tpu.core_type<tc>, window_params = [{transform_indices = @transform_0, window_bounds = array<i64: 8, 16, 32>}, {pipeline_mode = #tpu.pipeline_mode<synchronous>, transform_indices = @transform_1, window_bounds = array<i64: 3, 32, 128>}, {pipeline_mode = #tpu.pipeline_mode<synchronous>, transform_indices = @transform_2, window_bounds = array<i64: 1, 128>}, {pipeline_mode = #tpu.pipeline_mode<synchronous>, transform_indices = @transform_3, window_bounds = array<i64: 5, 64, 64>}, {pipeline_mode = #tpu.pipeline_mode<synchronous>, transform_indices = @transform_4, window_bounds = array<i64: 1, 64>}, {pipeline_mode = #tpu.pipeline_mode<synchronous>, transform_indices = @transform_5, window_bounds = array<i64: 3, 128, 128>}, {pipeline_mode = #tpu.pipeline_mode<synchronous>, transform_indices = @transform_6, window_bounds = array<i64: 1, 128>}, {pipeline_mode = #tpu.pipeline_mode<synchronous>, transform_indices = @transform_7, window_bounds = array<i64: 5, 64, 64>}, {pipeline_mode = #tpu.pipeline_mode<synchronous>, transform_indices = @transform_8, window_bounds = array<i64: 1, 64>}, {transform_indices = @transform_9, window_bounds = array<i64: 8, 128>}]} {
    %c0 = arith.constant 0 : index
    %c0_0 = arith.constant 0 : index
    %c0_1 = arith.constant 0 : index
    %0 = vector.load %arg1[%c0, %c0_0, %c0_1] : memref<8x16x32xf32, #tpu.memory_space<vmem>>, vector<8x16x32xf32>
    %1 = arith.truncf %0 : vector<8x16x32xf32> to vector<8x16x32xbf16>
    %c0_2 = arith.constant 0 : index
    %c0_3 = arith.constant 0 : index
    %c0_4 = arith.constant 0 : index
    %2 = vector.load %arg2[%c0_2, %c0_3, %c0_4] : memref<3x32x128xbf16, #tpu.memory_space<vmem>>, vector<3x32x128xbf16>
    %c0_5 = arith.constant 0 : index
    %c0_6 = arith.constant 0 : index
    %3 = vector.load %arg3[%c0_5, %c0_6] : memref<1x128xf32, #tpu.memory_space<vmem>>, vector<1x128xf32>
    %cst = arith.constant 0.000000e+00 : bf16
    %4 = vector.broadcast %cst : bf16 to vector<8x1x32xbf16>
    %5 = tpu.concatenate %4, %1, %4 in 1 : vector<8x1x32xbf16>, vector<8x16x32xbf16>, vector<8x1x32xbf16> -> vector<8x18x32xbf16>
    %6 = vector.extract_strided_slice %5 {offsets = [0, 0, 0], sizes = [8, 16, 32], strides = [1, 1, 1]} : vector<8x18x32xbf16> to vector<8x16x32xbf16>
    %7 = vector.shape_cast %6 : vector<8x16x32xbf16> to vector<128x32xbf16>
    %8 = vector.extract_strided_slice %2 {offsets = [0, 0, 0], sizes = [1, 32, 128], strides = [1, 1, 1]} : vector<3x32x128xbf16> to vector<1x32x128xbf16>
    %9 = vector.shape_cast %8 : vector<1x32x128xbf16> to vector<32x128xbf16>
    %cst_7 = arith.constant dense<0.000000e+00> : vector<128x128xf32>
    %10 = tpu.matmul %7, %9, %cst_7 {dimension_numbers = #tpu.dot_dimension_numbers<[1], [0], [0], [1], [0, 0, 1, 1], [], []>} : vector<128x32xbf16>, vector<32x128xbf16>, vector<128x128xf32> -> vector<128x128xf32>
    %11 = vector.extract_strided_slice %5 {offsets = [0, 1, 0], sizes = [8, 16, 32], strides = [1, 1, 1]} : vector<8x18x32xbf16> to vector<8x16x32xbf16>
    %12 = vector.shape_cast %11 : vector<8x16x32xbf16> to vector<128x32xbf16>
    %13 = vector.extract_strided_slice %2 {offsets = [1, 0, 0], sizes = [1, 32, 128], strides = [1, 1, 1]} : vector<3x32x128xbf16> to vector<1x32x128xbf16>
    %14 = vector.shape_cast %13 : vector<1x32x128xbf16> to vector<32x128xbf16>
    %cst_8 = arith.constant dense<0.000000e+00> : vector<128x128xf32>
    %15 = tpu.matmul %12, %14, %cst_8 {dimension_numbers = #tpu.dot_dimension_numbers<[1], [0], [0], [1], [0, 0, 1, 1], [], []>} : vector<128x32xbf16>, vector<32x128xbf16>, vector<128x128xf32> -> vector<128x128xf32>
    %16 = arith.addf %10, %15 : vector<128x128xf32>
    %17 = vector.extract_strided_slice %5 {offsets = [0, 2, 0], sizes = [8, 16, 32], strides = [1, 1, 1]} : vector<8x18x32xbf16> to vector<8x16x32xbf16>
    %18 = vector.shape_cast %17 : vector<8x16x32xbf16> to vector<128x32xbf16>
    %19 = vector.extract_strided_slice %2 {offsets = [2, 0, 0], sizes = [1, 32, 128], strides = [1, 1, 1]} : vector<3x32x128xbf16> to vector<1x32x128xbf16>
    %20 = vector.shape_cast %19 : vector<1x32x128xbf16> to vector<32x128xbf16>
    %cst_9 = arith.constant dense<0.000000e+00> : vector<128x128xf32>
    %21 = tpu.matmul %18, %20, %cst_9 {dimension_numbers = #tpu.dot_dimension_numbers<[1], [0], [0], [1], [0, 0, 1, 1], [], []>} : vector<128x32xbf16>, vector<32x128xbf16>, vector<128x128xf32> -> vector<128x128xf32>
    %22 = arith.addf %16, %21 : vector<128x128xf32>
    %23 = vector.broadcast %3 : vector<1x128xf32> to vector<128x128xf32>
    %24 = arith.addf %22, %23 : vector<128x128xf32>
    %25 = vector.shape_cast %24 : vector<128x128xf32> to vector<8x16x128xf32>
    %cst_10 = arith.constant 0.000000e+00 : f32
    %26 = vector.broadcast %cst_10 : f32 to vector<8x16x128xf32>
    %27 = arith.cmpf oge, %25, %26 : vector<8x16x128xf32>
    %cst_11 = arith.constant 0.00999999977 : f32
    %28 = vector.broadcast %cst_11 : f32 to vector<8x16x128xf32>
    %29 = arith.mulf %28, %25 : vector<8x16x128xf32>
    %30 = arith.select %27, %25, %29 : vector<8x16x128xi1>, vector<8x16x128xf32>
    %31 = vector.extract_strided_slice %30 {offsets = [0, 0, 32], sizes = [8, 16, 64], strides = [1, 1, 1]} : vector<8x16x128xf32> to vector<8x16x64xf32>
    %32 = arith.truncf %31 : vector<8x16x64xf32> to vector<8x16x64xbf16>
    %c0_12 = arith.constant 0 : index
    %c0_13 = arith.constant 0 : index
    %c0_14 = arith.constant 0 : index
    %33 = vector.load %arg4[%c0_12, %c0_13, %c0_14] : memref<5x64x64xbf16, #tpu.memory_space<vmem>>, vector<5x64x64xbf16>
    %c0_15 = arith.constant 0 : index
    %c0_16 = arith.constant 0 : index
    %34 = vector.load %arg5[%c0_15, %c0_16] : memref<1x64xf32, #tpu.memory_space<vmem>>, vector<1x64xf32>
    %cst_17 = arith.constant 0.000000e+00 : bf16
    %35 = vector.broadcast %cst_17 : bf16 to vector<8x2x64xbf16>
    %36 = tpu.concatenate %35, %32, %35 in 1 : vector<8x2x64xbf16>, vector<8x16x64xbf16>, vector<8x2x64xbf16> -> vector<8x20x64xbf16>
    %37 = vector.extract_strided_slice %36 {offsets = [0, 0, 0], sizes = [8, 16, 64], strides = [1, 1, 1]} : vector<8x20x64xbf16> to vector<8x16x64xbf16>
    %38 = vector.shape_cast %37 : vector<8x16x64xbf16> to vector<128x64xbf16>
    %39 = vector.extract_strided_slice %33 {offsets = [0, 0, 0], sizes = [1, 64, 64], strides = [1, 1, 1]} : vector<5x64x64xbf16> to vector<1x64x64xbf16>
    %40 = vector.shape_cast %39 : vector<1x64x64xbf16> to vector<64x64xbf16>
    %cst_18 = arith.constant dense<0.000000e+00> : vector<128x64xf32>
    %41 = tpu.matmul %38, %40, %cst_18 {dimension_numbers = #tpu.dot_dimension_numbers<[1], [0], [0], [1], [0, 0, 1, 1], [], []>} : vector<128x64xbf16>, vector<64x64xbf16>, vector<128x64xf32> -> vector<128x64xf32>
    %42 = vector.extract_strided_slice %36 {offsets = [0, 1, 0], sizes = [8, 16, 64], strides = [1, 1, 1]} : vector<8x20x64xbf16> to vector<8x16x64xbf16>
    %43 = vector.shape_cast %42 : vector<8x16x64xbf16> to vector<128x64xbf16>
    %44 = vector.extract_strided_slice %33 {offsets = [1, 0, 0], sizes = [1, 64, 64], strides = [1, 1, 1]} : vector<5x64x64xbf16> to vector<1x64x64xbf16>
    %45 = vector.shape_cast %44 : vector<1x64x64xbf16> to vector<64x64xbf16>
    %cst_19 = arith.constant dense<0.000000e+00> : vector<128x64xf32>
    %46 = tpu.matmul %43, %45, %cst_19 {dimension_numbers = #tpu.dot_dimension_numbers<[1], [0], [0], [1], [0, 0, 1, 1], [], []>} : vector<128x64xbf16>, vector<64x64xbf16>, vector<128x64xf32> -> vector<128x64xf32>
    %47 = arith.addf %41, %46 : vector<128x64xf32>
    %48 = vector.extract_strided_slice %36 {offsets = [0, 2, 0], sizes = [8, 16, 64], strides = [1, 1, 1]} : vector<8x20x64xbf16> to vector<8x16x64xbf16>
    %49 = vector.shape_cast %48 : vector<8x16x64xbf16> to vector<128x64xbf16>
    %50 = vector.extract_strided_slice %33 {offsets = [2, 0, 0], sizes = [1, 64, 64], strides = [1, 1, 1]} : vector<5x64x64xbf16> to vector<1x64x64xbf16>
    %51 = vector.shape_cast %50 : vector<1x64x64xbf16> to vector<64x64xbf16>
    %cst_20 = arith.constant dense<0.000000e+00> : vector<128x64xf32>
    %52 = tpu.matmul %49, %51, %cst_20 {dimension_numbers = #tpu.dot_dimension_numbers<[1], [0], [0], [1], [0, 0, 1, 1], [], []>} : vector<128x64xbf16>, vector<64x64xbf16>, vector<128x64xf32> -> vector<128x64xf32>
    %53 = arith.addf %47, %52 : vector<128x64xf32>
    %54 = vector.extract_strided_slice %36 {offsets = [0, 3, 0], sizes = [8, 16, 64], strides = [1, 1, 1]} : vector<8x20x64xbf16> to vector<8x16x64xbf16>
    %55 = vector.shape_cast %54 : vector<8x16x64xbf16> to vector<128x64xbf16>
    %56 = vector.extract_strided_slice %33 {offsets = [3, 0, 0], sizes = [1, 64, 64], strides = [1, 1, 1]} : vector<5x64x64xbf16> to vector<1x64x64xbf16>
    %57 = vector.shape_cast %56 : vector<1x64x64xbf16> to vector<64x64xbf16>
    %cst_21 = arith.constant dense<0.000000e+00> : vector<128x64xf32>
    %58 = tpu.matmul %55, %57, %cst_21 {dimension_numbers = #tpu.dot_dimension_numbers<[1], [0], [0], [1], [0, 0, 1, 1], [], []>} : vector<128x64xbf16>, vector<64x64xbf16>, vector<128x64xf32> -> vector<128x64xf32>
    %59 = arith.addf %53, %58 : vector<128x64xf32>
    %60 = vector.extract_strided_slice %36 {offsets = [0, 4, 0], sizes = [8, 16, 64], strides = [1, 1, 1]} : vector<8x20x64xbf16> to vector<8x16x64xbf16>
    %61 = vector.shape_cast %60 : vector<8x16x64xbf16> to vector<128x64xbf16>
    %62 = vector.extract_strided_slice %33 {offsets = [4, 0, 0], sizes = [1, 64, 64], strides = [1, 1, 1]} : vector<5x64x64xbf16> to vector<1x64x64xbf16>
    %63 = vector.shape_cast %62 : vector<1x64x64xbf16> to vector<64x64xbf16>
    %cst_22 = arith.constant dense<0.000000e+00> : vector<128x64xf32>
    %64 = tpu.matmul %61, %63, %cst_22 {dimension_numbers = #tpu.dot_dimension_numbers<[1], [0], [0], [1], [0, 0, 1, 1], [], []>} : vector<128x64xbf16>, vector<64x64xbf16>, vector<128x64xf32> -> vector<128x64xf32>
    %65 = arith.addf %59, %64 : vector<128x64xf32>
    %66 = vector.broadcast %34 : vector<1x64xf32> to vector<128x64xf32>
    %67 = arith.addf %65, %66 : vector<128x64xf32>
    %68 = vector.shape_cast %67 : vector<128x64xf32> to vector<8x16x64xf32>
    %cst_23 = arith.constant 0.000000e+00 : f32
    %69 = vector.broadcast %cst_23 : f32 to vector<8x16x64xf32>
    %70 = arith.cmpf oge, %68, %69 : vector<8x16x64xf32>
    %cst_24 = arith.constant 0.00999999977 : f32
    %71 = vector.broadcast %cst_24 : f32 to vector<8x16x64xf32>
    %72 = arith.mulf %71, %68 : vector<8x16x64xf32>
    %73 = arith.select %70, %68, %72 : vector<8x16x64xi1>, vector<8x16x64xf32>
    %74 = arith.truncf %30 : vector<8x16x128xf32> to vector<8x16x128xbf16>
    %c0_25 = arith.constant 0 : index
    %c0_26 = arith.constant 0 : index
    %c0_27 = arith.constant 0 : index
    %75 = vector.load %arg11[%c0_25, %c0_26, %c0_27] : memref<8x16x128xbf16, #tpu.memory_space<vmem>>, vector<8x16x128xbf16>
    tpu.vector_store %arg11[%c0_25, %c0_26, %c0_27], %74 {strides = array<i32>} : memref<8x16x128xbf16, #tpu.memory_space<vmem>>, vector<8x16x128xbf16>,
    %76 = arith.truncf %73 : vector<8x16x64xf32> to vector<8x16x64xbf16>
    %c0_28 = arith.constant 0 : index
    %c0_29 = arith.constant 0 : index
    %c32 = arith.constant 32 : index
    %77 = vector.load %arg11[%c0_28, %c0_29, %c32] : memref<8x16x128xbf16, #tpu.memory_space<vmem>>, vector<8x16x64xbf16>
    tpu.vector_store %arg11[%c0_28, %c0_29, %c32], %76 {strides = array<i32>} : memref<8x16x128xbf16, #tpu.memory_space<vmem>>, vector<8x16x64xbf16>,
    %c0_30 = arith.constant 0 : index
    %c0_31 = arith.constant 0 : index
    %c0_32 = arith.constant 0 : index
    %78 = vector.load %arg11[%c0_30, %c0_31, %c0_32] : memref<8x16x128xbf16, #tpu.memory_space<vmem>>, vector<8x16x128xbf16>
    %c0_33 = arith.constant 0 : index
    %c0_34 = arith.constant 0 : index
    %c0_35 = arith.constant 0 : index
    %79 = vector.load %arg6[%c0_33, %c0_34, %c0_35] : memref<3x128x128xbf16, #tpu.memory_space<vmem>>, vector<3x128x128xbf16>
    %c0_36 = arith.constant 0 : index
    %c0_37 = arith.constant 0 : index
    %80 = vector.load %arg7[%c0_36, %c0_37] : memref<1x128xf32, #tpu.memory_space<vmem>>, vector<1x128xf32>
    %cst_38 = arith.constant 0.000000e+00 : bf16
    %81 = vector.broadcast %cst_38 : bf16 to vector<8x1x128xbf16>
    %82 = tpu.concatenate %81, %78, %81 in 1 : vector<8x1x128xbf16>, vector<8x16x128xbf16>, vector<8x1x128xbf16> -> vector<8x18x128xbf16>
    %83 = vector.extract_strided_slice %82 {offsets = [0, 0, 0], sizes = [8, 16, 128], strides = [1, 1, 1]} : vector<8x18x128xbf16> to vector<8x16x128xbf16>
    %84 = vector.shape_cast %83 : vector<8x16x128xbf16> to vector<128x128xbf16>
    %85 = vector.extract_strided_slice %79 {offsets = [0, 0, 0], sizes = [1, 128, 128], strides = [1, 1, 1]} : vector<3x128x128xbf16> to vector<1x128x128xbf16>
    %86 = vector.shape_cast %85 : vector<1x128x128xbf16> to vector<128x128xbf16>
    %cst_39 = arith.constant dense<0.000000e+00> : vector<128x128xf32>
    %87 = tpu.matmul %84, %86, %cst_39 {dimension_numbers = #tpu.dot_dimension_numbers<[1], [0], [0], [1], [0, 0, 1, 1], [], []>} : vector<128x128xbf16>, vector<128x128xbf16>, vector<128x128xf32> -> vector<128x128xf32>
    %88 = vector.extract_strided_slice %82 {offsets = [0, 1, 0], sizes = [8, 16, 128], strides = [1, 1, 1]} : vector<8x18x128xbf16> to vector<8x16x128xbf16>
    %89 = vector.shape_cast %88 : vector<8x16x128xbf16> to vector<128x128xbf16>
    %90 = vector.extract_strided_slice %79 {offsets = [1, 0, 0], sizes = [1, 128, 128], strides = [1, 1, 1]} : vector<3x128x128xbf16> to vector<1x128x128xbf16>
    %91 = vector.shape_cast %90 : vector<1x128x128xbf16> to vector<128x128xbf16>
    %cst_40 = arith.constant dense<0.000000e+00> : vector<128x128xf32>
    %92 = tpu.matmul %89, %91, %cst_40 {dimension_numbers = #tpu.dot_dimension_numbers<[1], [0], [0], [1], [0, 0, 1, 1], [], []>} : vector<128x128xbf16>, vector<128x128xbf16>, vector<128x128xf32> -> vector<128x128xf32>
    %93 = arith.addf %87, %92 : vector<128x128xf32>
    %94 = vector.extract_strided_slice %82 {offsets = [0, 2, 0], sizes = [8, 16, 128], strides = [1, 1, 1]} : vector<8x18x128xbf16> to vector<8x16x128xbf16>
    %95 = vector.shape_cast %94 : vector<8x16x128xbf16> to vector<128x128xbf16>
    %96 = vector.extract_strided_slice %79 {offsets = [2, 0, 0], sizes = [1, 128, 128], strides = [1, 1, 1]} : vector<3x128x128xbf16> to vector<1x128x128xbf16>
    %97 = vector.shape_cast %96 : vector<1x128x128xbf16> to vector<128x128xbf16>
    %cst_41 = arith.constant dense<0.000000e+00> : vector<128x128xf32>
    %98 = tpu.matmul %95, %97, %cst_41 {dimension_numbers = #tpu.dot_dimension_numbers<[1], [0], [0], [1], [0, 0, 1, 1], [], []>} : vector<128x128xbf16>, vector<128x128xbf16>, vector<128x128xf32> -> vector<128x128xf32>
    %99 = arith.addf %93, %98 : vector<128x128xf32>
    %100 = vector.broadcast %80 : vector<1x128xf32> to vector<128x128xf32>
    %101 = arith.addf %99, %100 : vector<128x128xf32>
    %102 = vector.shape_cast %101 : vector<128x128xf32> to vector<8x16x128xf32>
    %cst_42 = arith.constant 0.000000e+00 : f32
    %103 = vector.broadcast %cst_42 : f32 to vector<8x16x128xf32>
    %104 = arith.cmpf oge, %102, %103 : vector<8x16x128xf32>
    %cst_43 = arith.constant 0.00999999977 : f32
    %105 = vector.broadcast %cst_43 : f32 to vector<8x16x128xf32>
    %106 = arith.mulf %105, %102 : vector<8x16x128xf32>
    %107 = arith.select %104, %102, %106 : vector<8x16x128xi1>, vector<8x16x128xf32>
    %108 = vector.extract_strided_slice %107 {offsets = [0, 0, 32], sizes = [8, 16, 64], strides = [1, 1, 1]} : vector<8x16x128xf32> to vector<8x16x64xf32>
    %109 = arith.truncf %108 : vector<8x16x64xf32> to vector<8x16x64xbf16>
    %c0_44 = arith.constant 0 : index
    %c0_45 = arith.constant 0 : index
    %c0_46 = arith.constant 0 : index
    %110 = vector.load %arg8[%c0_44, %c0_45, %c0_46] : memref<5x64x64xbf16, #tpu.memory_space<vmem>>, vector<5x64x64xbf16>
    %c0_47 = arith.constant 0 : index
    %c0_48 = arith.constant 0 : index
    %111 = vector.load %arg9[%c0_47, %c0_48] : memref<1x64xf32, #tpu.memory_space<vmem>>, vector<1x64xf32>
    %cst_49 = arith.constant 0.000000e+00 : bf16
    %112 = vector.broadcast %cst_49 : bf16 to vector<8x2x64xbf16>
    %113 = tpu.concatenate %112, %109, %112 in 1 : vector<8x2x64xbf16>, vector<8x16x64xbf16>, vector<8x2x64xbf16> -> vector<8x20x64xbf16>
    %114 = vector.extract_strided_slice %113 {offsets = [0, 0, 0], sizes = [8, 16, 64], strides = [1, 1, 1]} : vector<8x20x64xbf16> to vector<8x16x64xbf16>
    %115 = vector.shape_cast %114 : vector<8x16x64xbf16> to vector<128x64xbf16>
    %116 = vector.extract_strided_slice %110 {offsets = [0, 0, 0], sizes = [1, 64, 64], strides = [1, 1, 1]} : vector<5x64x64xbf16> to vector<1x64x64xbf16>
    %117 = vector.shape_cast %116 : vector<1x64x64xbf16> to vector<64x64xbf16>
    %cst_50 = arith.constant dense<0.000000e+00> : vector<128x64xf32>
    %118 = tpu.matmul %115, %117, %cst_50 {dimension_numbers = #tpu.dot_dimension_numbers<[1], [0], [0], [1], [0, 0, 1, 1], [], []>} : vector<128x64xbf16>, vector<64x64xbf16>, vector<128x64xf32> -> vector<128x64xf32>
    %119 = vector.extract_strided_slice %113 {offsets = [0, 1, 0], sizes = [8, 16, 64], strides = [1, 1, 1]} : vector<8x20x64xbf16> to vector<8x16x64xbf16>
    %120 = vector.shape_cast %119 : vector<8x16x64xbf16> to vector<128x64xbf16>
    %121 = vector.extract_strided_slice %110 {offsets = [1, 0, 0], sizes = [1, 64, 64], strides = [1, 1, 1]} : vector<5x64x64xbf16> to vector<1x64x64xbf16>
    %122 = vector.shape_cast %121 : vector<1x64x64xbf16> to vector<64x64xbf16>
    %cst_51 = arith.constant dense<0.000000e+00> : vector<128x64xf32>
    %123 = tpu.matmul %120, %122, %cst_51 {dimension_numbers = #tpu.dot_dimension_numbers<[1], [0], [0], [1], [0, 0, 1, 1], [], []>} : vector<128x64xbf16>, vector<64x64xbf16>, vector<128x64xf32> -> vector<128x64xf32>
    %124 = arith.addf %118, %123 : vector<128x64xf32>
    %125 = vector.extract_strided_slice %113 {offsets = [0, 2, 0], sizes = [8, 16, 64], strides = [1, 1, 1]} : vector<8x20x64xbf16> to vector<8x16x64xbf16>
    %126 = vector.shape_cast %125 : vector<8x16x64xbf16> to vector<128x64xbf16>
    %127 = vector.extract_strided_slice %110 {offsets = [2, 0, 0], sizes = [1, 64, 64], strides = [1, 1, 1]} : vector<5x64x64xbf16> to vector<1x64x64xbf16>
    %128 = vector.shape_cast %127 : vector<1x64x64xbf16> to vector<64x64xbf16>
    %cst_52 = arith.constant dense<0.000000e+00> : vector<128x64xf32>
    %129 = tpu.matmul %126, %128, %cst_52 {dimension_numbers = #tpu.dot_dimension_numbers<[1], [0], [0], [1], [0, 0, 1, 1], [], []>} : vector<128x64xbf16>, vector<64x64xbf16>, vector<128x64xf32> -> vector<128x64xf32>
    %130 = arith.addf %124, %129 : vector<128x64xf32>
    %131 = vector.extract_strided_slice %113 {offsets = [0, 3, 0], sizes = [8, 16, 64], strides = [1, 1, 1]} : vector<8x20x64xbf16> to vector<8x16x64xbf16>
    %132 = vector.shape_cast %131 : vector<8x16x64xbf16> to vector<128x64xbf16>
    %133 = vector.extract_strided_slice %110 {offsets = [3, 0, 0], sizes = [1, 64, 64], strides = [1, 1, 1]} : vector<5x64x64xbf16> to vector<1x64x64xbf16>
    %134 = vector.shape_cast %133 : vector<1x64x64xbf16> to vector<64x64xbf16>
    %cst_53 = arith.constant dense<0.000000e+00> : vector<128x64xf32>
    %135 = tpu.matmul %132, %134, %cst_53 {dimension_numbers = #tpu.dot_dimension_numbers<[1], [0], [0], [1], [0, 0, 1, 1], [], []>} : vector<128x64xbf16>, vector<64x64xbf16>, vector<128x64xf32> -> vector<128x64xf32>
    %136 = arith.addf %130, %135 : vector<128x64xf32>
    %137 = vector.extract_strided_slice %113 {offsets = [0, 4, 0], sizes = [8, 16, 64], strides = [1, 1, 1]} : vector<8x20x64xbf16> to vector<8x16x64xbf16>
    %138 = vector.shape_cast %137 : vector<8x16x64xbf16> to vector<128x64xbf16>
    %139 = vector.extract_strided_slice %110 {offsets = [4, 0, 0], sizes = [1, 64, 64], strides = [1, 1, 1]} : vector<5x64x64xbf16> to vector<1x64x64xbf16>
    %140 = vector.shape_cast %139 : vector<1x64x64xbf16> to vector<64x64xbf16>
    %cst_54 = arith.constant dense<0.000000e+00> : vector<128x64xf32>
    %141 = tpu.matmul %138, %140, %cst_54 {dimension_numbers = #tpu.dot_dimension_numbers<[1], [0], [0], [1], [0, 0, 1, 1], [], []>} : vector<128x64xbf16>, vector<64x64xbf16>, vector<128x64xf32> -> vector<128x64xf32>
    %142 = arith.addf %136, %141 : vector<128x64xf32>
    %143 = vector.broadcast %111 : vector<1x64xf32> to vector<128x64xf32>
    %144 = arith.addf %142, %143 : vector<128x64xf32>
    %145 = vector.shape_cast %144 : vector<128x64xf32> to vector<8x16x64xf32>
    %cst_55 = arith.constant 0.000000e+00 : f32
    %146 = vector.broadcast %cst_55 : f32 to vector<8x16x64xf32>
    %147 = arith.cmpf oge, %145, %146 : vector<8x16x64xf32>
    %cst_56 = arith.constant 0.00999999977 : f32
    %148 = vector.broadcast %cst_56 : f32 to vector<8x16x64xf32>
    %149 = arith.mulf %148, %145 : vector<8x16x64xf32>
    %150 = arith.select %147, %145, %149 : vector<8x16x64xi1>, vector<8x16x64xf32>
    %cst_57 = arith.constant dense<0xFF800000> : vector<8x128xf32>
    %151 = vector.multi_reduction <maximumf>, %107, %cst_57 [1] : vector<8x16x128xf32> to vector<8x128xf32>
    %c0_58 = arith.constant 0 : index
    %c0_59 = arith.constant 0 : index
    %152 = vector.load %arg10[%c0_58, %c0_59] : memref<8x128xf32, #tpu.memory_space<vmem>>, vector<8x128xf32>
    tpu.vector_store %arg10[%c0_58, %c0_59], %151 {strides = array<i32>} : memref<8x128xf32, #tpu.memory_space<vmem>>, vector<8x128xf32>,
    %cst_60 = arith.constant dense<0xFF800000> : vector<8x64xf32>
    %153 = vector.multi_reduction <maximumf>, %150, %cst_60 [1] : vector<8x16x64xf32> to vector<8x64xf32>
    %c0_61 = arith.constant 0 : index
    %c32_62 = arith.constant 32 : index
    %154 = vector.load %arg10[%c0_61, %c32_62] : memref<8x128xf32, #tpu.memory_space<vmem>>, vector<8x64xf32>
    tpu.vector_store %arg10[%c0_61, %c32_62], %153 {strides = array<i32>} : memref<8x128xf32, #tpu.memory_space<vmem>>, vector<8x64xf32>,
    return
  }
  func.func @transform_0(%arg0: i32) -> (i32, i32, i32) {
    %c0_i32 = arith.constant 0 : i32
    %c0_i32_0 = arith.constant 0 : i32
    %c0_i32_1 = arith.constant 0 : i32
    return %arg0, %c0_i32, %c0_i32_0 : i32, i32, i32
  }
  func.func @transform_1(%arg0: i32) -> (i32, i32, i32) {
    %c0_i32 = arith.constant 0 : i32
    %c0_i32_0 = arith.constant 0 : i32
    %c0_i32_1 = arith.constant 0 : i32
    %c0_i32_2 = arith.constant 0 : i32
    return %c0_i32, %c0_i32_0, %c0_i32_1 : i32, i32, i32
  }
  func.func @transform_2(%arg0: i32) -> (i32, i32) {
    %c0_i32 = arith.constant 0 : i32
    %c0_i32_0 = arith.constant 0 : i32
    %c0_i32_1 = arith.constant 0 : i32
    return %c0_i32, %c0_i32_0 : i32, i32
  }
  func.func @transform_3(%arg0: i32) -> (i32, i32, i32) {
    %c0_i32 = arith.constant 0 : i32
    %c0_i32_0 = arith.constant 0 : i32
    %c0_i32_1 = arith.constant 0 : i32
    %c0_i32_2 = arith.constant 0 : i32
    return %c0_i32, %c0_i32_0, %c0_i32_1 : i32, i32, i32
  }
  func.func @transform_4(%arg0: i32) -> (i32, i32) {
    %c0_i32 = arith.constant 0 : i32
    %c0_i32_0 = arith.constant 0 : i32
    %c0_i32_1 = arith.constant 0 : i32
    return %c0_i32, %c0_i32_0 : i32, i32
  }
  func.func @transform_5(%arg0: i32) -> (i32, i32, i32) {
    %c0_i32 = arith.constant 0 : i32
    %c0_i32_0 = arith.constant 0 : i32
    %c0_i32_1 = arith.constant 0 : i32
    %c0_i32_2 = arith.constant 0 : i32
    return %c0_i32, %c0_i32_0, %c0_i32_1 : i32, i32, i32
  }
  func.func @transform_6(%arg0: i32) -> (i32, i32) {
    %c0_i32 = arith.constant 0 : i32
    %c0_i32_0 = arith.constant 0 : i32
    %c0_i32_1 = arith.constant 0 : i32
    return %c0_i32, %c0_i32_0 : i32, i32
  }
  func.func @transform_7(%arg0: i32) -> (i32, i32, i32) {
    %c0_i32 = arith.constant 0 : i32
    %c0_i32_0 = arith.constant 0 : i32
    %c0_i32_1 = arith.constant 0 : i32
    %c0_i32_2 = arith.constant 0 : i32
    return %c0_i32, %c0_i32_0, %c0_i32_1 : i32, i32, i32
  }
  func.func @transform_8(%arg0: i32) -> (i32, i32) {
    %c0_i32 = arith.constant 0 : i32
    %c0_i32_0 = arith.constant 0 : i32
    %c0_i32_1 = arith.constant 0 : i32
    return %c0_i32, %c0_i32_0 : i32, i32
  }
  func.func @transform_9(%arg0: i32) -> (i32, i32) {
    %c0_i32 = arith.constant 0 : i32
    %c0_i32_0 = arith.constant 0 : i32
    return %arg0, %c0_i32 : i32, i32
  }
}

</mosaic_0001>

<bundles_post_ra>
// kernel: tpu_custom_call.1
= control target key start
LH: loop header
LB: loop body
LE: loop exit
PB: predicated region body
PF: predicated region fallthrough
CT: control target
= control target key end

     0   :  { %14 = vsyncpa [#allocation4], 0  ;;  %s6667_s0 = inlined_call_operand.hbm [shape: f32[8,16,32], index: 0, kind: input, shape index: {}]   ;;  %s6668_s1 = inlined_call_operand.hbm [shape: bf16[3,32,128], index: 1, kind: input, shape index: {}]   ;;  %s6669_s2 = inlined_call_operand.vmem [shape: f32[1,128], index: 2, kind: input, shape index: {}]   ;;  %s6670_s3 = inlined_call_operand.hbm [shape: bf16[5,64,64], index: 3, kind: input, shape index: {}]   ;;  %s6671_s4 = inlined_call_operand.vmem [shape: f32[1,64], index: 4, kind: input, shape index: {}]   ;;  %s6672_s5 = inlined_call_operand.hbm [shape: bf16[3,128,128], index: 5, kind: input, shape index: {}]   ;;  %s6673_s6 = inlined_call_operand.vmem [shape: f32[1,128], index: 6, kind: input, shape index: {}]   ;;  %s6674_s7 = inlined_call_operand.hbm [shape: bf16[5,64,64], index: 7, kind: input, shape index: {}]   ;;  %s6675_s8 = inlined_call_operand.vmem [shape: f32[1,64], index: 8, kind: input, shape index: {}]   ;;  %s6676_s9 = inlined_call_operand.hbm [shape: f32[8,128], index: 9, kind: output, shape index: {}]  }
   0x1   :  { %15 = vsyncpa [#allocation7], 0 }
   0x2   :  { %16 = vsyncpa [#allocation10], 0 }
   0x3   :  { %17 = vsyncpa [#allocation5], 0  ;;  %s5412_s30 = smov [#allocation6]   ;;  %s5272_s13 = scalar_lea.hbm %s6668_s1, 768 }
   0x4   :  { %s35_s10 = sshll.u32 %s5412_s30, 4  ;;  %p5273_p0 = scmp.ne.s32.totalorder %s6668_s1, %s5272_s13  ;;  %s36_s10 = int_to_ptr.vmem [resolvable:$true] %s35_s10 }
   0x5   :  { %p5276_p1 = scmp.lt.u32.totalorder %s5272_s13, %s6668_s1 }
   0x7   :  { %p5278_p2 = pnand %p5276_p1, %p5273_p0 }
   0x9   :  { %5281 = shalt.err (!%p5278_p2)
}
   0xa   :  { %s5282_s18 = scalar_lea.vmem %s36_s10, 768  ;;  %p5287_p4 = scmp.lt.s32.totalorder %s36_s10, %s36_s10 }
   0xb   :  { %p5283_p3 = scmp.ne.s32.totalorder %s36_s10, %s5282_s18  ;;  %p5288_p5 = scmp.lt.s32.totalorder %s5282_s18, %s5282_s18 }
   0xd   :  { %p5289_p6 = por %p5288_p5, %p5287_p4 }
   0xf   :  { %p5290_p7 = pnand %p5289_p6, %p5283_p3 }
  0x11   :  { %5293 = shalt.err (!%p5290_p7)
}
  0x12   :  { %s5413_s19 = smov 64   ;;  %s5414_s20 = smov 4  }
  0x13   :  { %41 = dma.hbm_to_vmem [thread:$0]  %s6668_s1, 768, %s36_s10, [#allocation7], %s5413_s19, %s5413_s19, %s5414_s20  }
  0x14   :  { %s5415_s23 = smov [#allocation9]   ;;  %s5416_s25 = smov [#allocation3]  }
  0x15   :  { %s63_s24 = sshll.u32 %s5415_s23, 4  ;;  %s23_s26 = sshll.u32 %s5416_s25, 4  ;;  %s64_s24 = int_to_ptr.vmem [resolvable:$true] %s63_s24  ;;  %s24_s26 = int_to_ptr.vmem [resolvable:$true] %s23_s26 }
  0x16   :  { %s5294_s29 = scalar_lea.hbm %s6672_s5, 3072 }
  0x17   :  { %p5295_p8 = scmp.ne.s32.totalorder %s6672_s5, %s5294_s29  ;;  %p5298_p9 = scmp.lt.u32.totalorder %s5294_s29, %s6672_s5 }
  0x19   :  { %p5300_p10 = pnand %p5298_p9, %p5295_p8 }
  0x1b   :  { %5303 = shalt.err (!%p5300_p10)
}
  0x1c   :  { %s5304_s1 = scalar_lea.vmem %s64_s24, 3072  ;;  %p5309_p12 = scmp.lt.s32.totalorder %s64_s24, %s64_s24 }
  0x1d   :  { %p5305_p11 = scmp.ne.s32.totalorder %s64_s24, %s5304_s1  ;;  %p5310_p13 = scmp.lt.s32.totalorder %s5304_s1, %s5304_s1 }
  0x1f   :  { %p5311_p0 = por %p5310_p13, %p5309_p12 }
  0x21   :  { %p5312_p1 = pnand %p5311_p0, %p5305_p11 }
  0x23   :  { %5315 = shalt.err (!%p5312_p1)
}
  0x24   :  { %69 = dma.hbm_to_vmem [thread:$0]  %s6672_s5, 3072, %s64_s24, [#allocation10], %s5413_s19, %s5413_s19, %s5414_s20  }
  0x25   :  { %s5316_s17 = scalar_lea.hbm %s6667_s0, 2048 }
  0x26   :  { %p5317_p2 = scmp.ne.s32.totalorder %s6667_s0, %s5316_s17  ;;  %p5320_p3 = scmp.lt.u32.totalorder %s5316_s17, %s6667_s0 }
  0x28   :  { %p5322_p4 = pnand %p5320_p3, %p5317_p2 }
  0x2a   :  { %5325 = shalt.err (!%p5322_p4)
}
  0x2b   :  { %s5326_s25 = scalar_lea.vmem %s24_s26, 2048  ;;  %p5331_p6 = scmp.lt.s32.totalorder %s24_s26, %s24_s26 }
  0x2c   :  { %p5327_p5 = scmp.ne.s32.totalorder %s24_s26, %s5326_s25  ;;  %p5332_p7 = scmp.lt.s32.totalorder %s5326_s25, %s5326_s25 }
  0x2e   :  { %p5333_p8 = por %p5332_p7, %p5331_p6 }
  0x30   :  { %p5334_p9 = pnand %p5333_p8, %p5327_p5 }
  0x32   :  { %5337 = shalt.err (!%p5334_p9)
}
  0x33   :  { %s5417_s5 = smov 128   ;;  %s5418_s24 = smov 8  }
  0x34   :  { %29 = dma.hbm_to_vmem [thread:$0]  %s6667_s0, 2048, %s24_s26, [#allocation4], %s5417_s5, %s5417_s5, %s5418_s24  }
  0x35   :  { %s5419_s29 = smov [#allocation8]   ;;  %s5420_s11 = smov [#allocation11]  }
  0x36   :  { %s49_s30 = sshll.u32 %s5419_s29, 4  ;;  %s77_s12 = sshll.u32 %s5420_s11, 4  ;;  %s50_s30 = int_to_ptr.vmem [resolvable:$true] %s49_s30  ;;  %s78_s12 = int_to_ptr.vmem [resolvable:$true] %s77_s12 }
  0x37   :  { %s5338_s10 = scalar_lea.hbm %s6670_s3, 2560 }
  0x38   :  { %p5339_p10 = scmp.ne.s32.totalorder %s6670_s3, %s5338_s10  ;;  %p5342_p11 = scmp.lt.u32.totalorder %s5338_s10, %s6670_s3 }
  0x3a   :  { %p5344_p12 = pnand %p5342_p11, %p5339_p10 }
  0x3c   :  { %5347 = shalt.err (!%p5344_p12)
}
  0x3d   :  { %s5348_s0 = scalar_lea.vmem %s50_s30, 2560  ;;  %p5353_p0 = scmp.lt.s32.totalorder %s50_s30, %s50_s30 }
  0x3e   :  { %p5349_p13 = scmp.ne.s32.totalorder %s50_s30, %s5348_s0  ;;  %p5354_p1 = scmp.lt.s32.totalorder %s5348_s0, %s5348_s0 }
  0x40   :  { %p5355_p2 = por %p5354_p1, %p5353_p0 }
  0x42   :  { %p5356_p3 = pnand %p5355_p2, %p5349_p13 }
  0x44   :  { %5359 = shalt.err (!%p5356_p3)
}
  0x45   :  { %55 = dma.hbm_to_vmem [thread:$0]  %s6670_s3, 2560, %s50_s30, [#allocation7], %s5413_s19, %s5413_s19, %s5414_s20  }
  0x46   :  { %s5360_s23 = scalar_lea.hbm %s6674_s7, 2560 }
  0x47   :  { %p5361_p4 = scmp.ne.s32.totalorder %s6674_s7, %s5360_s23  ;;  %p5364_p5 = scmp.lt.u32.totalorder %s5360_s23, %s6674_s7 }
  0x49   :  { %p5366_p6 = pnand %p5364_p5, %p5361_p4 }
  0x4b   :  { %5369 = shalt.err (!%p5366_p6)
}
  0x4c   :  { %s5370_s28 = scalar_lea.vmem %s78_s12, 2560  ;;  %p5375_p8 = scmp.lt.s32.totalorder %s78_s12, %s78_s12 }
  0x4d   :  { %p5371_p7 = scmp.ne.s32.totalorder %s78_s12, %s5370_s28  ;;  %p5376_p9 = scmp.lt.s32.totalorder %s5370_s28, %s5370_s28 }
  0x4f   :  { %p5377_p10 = por %p5376_p9, %p5375_p8 }
  0x51   :  { %p5378_p11 = pnand %p5377_p10, %p5371_p7 }
  0x53   :  { %5381 = shalt.err (!%p5378_p11)
}
  0x54   :  { %83 = dma.hbm_to_vmem [thread:$0]  %s6674_s7, 2560, %s78_s12, [#allocation10], %s5413_s19, %s5413_s19, %s5414_s20  }
  0x55   :  { %5404 = dma.done.wait [#allocation4], 2048  }
  0x56   :  { %5405 = vsyncadd [#allocation4], 4294965248 }
  0x57   :  { %5406 = dma.done.wait [#allocation7], 3328  }
  0x58   :  { %5407 = vsyncadd [#allocation7], 4294963968 }
  0x59   :  { %5408 = dma.done.wait [#allocation10], 5632  }
  0x5a   :  { %5409 = vsyncadd [#allocation10], 4294961664  ;;  %v5202_v0 = vld [vmem:[#allocation6 + $0x10] sm:$0xff]   ;;  %v5203_v1 = vld [vmem:[#allocation6 + $0x18] sm:$0xff]   ;;  %vm211_vm0 = vcmask 1040384   ;;  %vm339_vm4 = vcmask 261120  }
  0x5b   :  { %4602 = vmatprep.subr.bf16.mxu0 %v5202_v0  ;;  %v102_v2 = vld [vmem:[#allocation3] sm:$0xff]  ;;  %v103_v3 = vld [vmem:[#allocation3 + $0x8] sm:$0xff]  ;;  %v104_v6 = vld [vmem:[#allocation3 + $0x10] sm:$0xff]  ;;  %vm212_vm1 = vsmask.f32 256  ;;  %vm602_vm5 = vcmask 1046528  }
  0x5c   :  { %4603 = vmatpush3.bf16.msra.mxu0 %v5202_v0  ;;  %v118_v4 = vpack.c.bf16 %v103_v3, %v102_v2  ;;  %v5546_v5 = vld [vmem:[#allocation6] sm:$0xff]   ;;  %v105_v7 = vld [vmem:[#allocation3 + $0x18] sm:$0xff]  ;;  %v107_v9 = vld [vmem:[#allocation3 + $0x28] sm:$0xff]  ;;  %vm230_vm3 = vsmask.f32 7424 }
  0x5d   :  { %4604 = vmatprep.subr.bf16.mxu0 %v5203_v1  ;;  %v106_v8 = vld [vmem:[#allocation3 + $0x20] sm:$0xff]  ;;  %v119_v12 = vpack.c.bf16 %v105_v7, %v104_v6  ;;  %v108_v14 = vld [vmem:[#allocation3 + $0x30] sm:$0xff]  ;;  %v109_v15 = vld [vmem:[#allocation3 + $0x38] sm:$0xff] }
  0x5e   :  { %v140_v10 = vshrl.u32 %v118_v4, 16  ;;  %v143_v11 = vshll.u32 %v118_v4, 16  ;;  %v120_v13 = vpack.c.bf16 %v107_v9, %v106_v8  ;;  %v110_v16 = vld [vmem:[#allocation3 + $0x40] sm:$0xff]  ;;  %v121_v17 = vpack.c.bf16 %v109_v15, %v108_v14  ;;  %v111_v18 = vld [vmem:[#allocation3 + $0x48] sm:$0xff]  ;;  %vm5550_vm2 = vmand %vm211_vm0, %vm212_vm1 }
  0x5f   :  { %v147_v20 = vshrl.u32 %v119_v12, 16  ;;  %v150_v21 = vshll.u32 %v119_v12, 16  ;;  %v122_v26 = vpack.c.bf16 %v111_v18, %v110_v16  ;;  %v112_v54 = vld [vmem:[#allocation3 + $0x50] sm:$0xff]  ;;  %v113_v55 = vld [vmem:[#allocation3 + $0x58] sm:$0xff]  ;;  %v114_v60 = vld [vmem:[#allocation3 + $0x60] sm:$0xff] }
  0x60   :  { %4605 = vmatpush3.bf16.msra.mxu0 %v5203_v1  ;;  %v142_v19 = vrot.slane %v140_v10, 7  ;;  %v154_v22 = vshrl.u32 %v120_v13, 16  ;;  %v157_v24 = vshll.u32 %v120_v13, 16  ;;  %v161_v25 = vshrl.u32 %v121_v17, 16  ;;  %v115_v61 = vld [vmem:[#allocation3 + $0x68] sm:$0xff]  ;;  %v116_v62 = vld [vmem:[#allocation3 + $0x70] sm:$0xff] }
  0x61   :  { %4622 = vmatprep.subr.bf16.mxu0 %v5546_v5  ;;  %v149_v29 = vrot.slane %v147_v20, 7  ;;  %v164_v33 = vshll.u32 %v121_v17, 16  ;;  %v168_v41 = vshrl.u32 %v122_v26, 16  ;;  %v117_v63 = vld [vmem:[#allocation3 + $0x78] sm:$0xff]  ;;  %v171_v10 = vshll.u32 %v122_v26, 16  ;;  %v5205_v12 = vld [vmem:[#allocation6 + $0x8] sm:$0xff]  }
  0x62   :  { %v145_v27 = vor.u32 %v143_v11, %v142_v19  ;;  %v5557_v28 = vsel %vm5550_vm2, %v142_v19, 0  ;;  %v156_v30 = vrot.slane %v154_v22, 7  ;;  %v163_v32 = vrot.slane %v161_v25, 7  ;;  %v5611_v26 = vld [vmem:[#allocation6 + $0x20] sm:$0xff]  }
  0x63   :  { %v239_v31 = vshll.u32 %v5557_v28, 16  ;;  %v152_v35 = vor.u32 %v150_v21, %v149_v29  ;;  %v5566_v36 = vsel %vm5550_vm2, %v149_v29, 0  ;;  %v170_v59 = vrot.slane %v168_v41, 7 }
  0x64   :  { %v5562_v34 = vsel %vm5550_vm2, 0, %v145_v27  ;;  %v159_v37 = vor.u32 %v157_v24, %v156_v30  ;;  %v251_v40 = vshll.u32 %v5566_v36, 16  ;;  %v5581_v45 = vsel %vm5550_vm2, %v156_v30, 0 }
  0x65   :  { %v232_v38 = vshrl.u32 %v5562_v34, 16  ;;  %v234_v39 = vshll.u32 %v5562_v34, 16  ;;  %v241_v42 = vrot.slane %v239_v31, 1  ;;  %v5573_v43 = vsel %vm5550_vm2, 0, %v152_v35 }
  0x66   :  { %v5577_v44 = vsel %vm5550_vm2, 0, %v159_v37  ;;  %v244_v47 = vshrl.u32 %v5573_v43, 16  ;;  %v246_v48 = vshll.u32 %v5573_v43, 16  ;;  %v253_v49 = vrot.slane %v251_v40, 1 }
  0x67   :  { %v236_v46 = vrot.slane %v234_v39, 1  ;;  %v256_v50 = vshrl.u32 %v5577_v44, 16  ;;  %v258_v51 = vshll.u32 %v5577_v44, 16  ;;  %v263_v52 = vshll.u32 %v5581_v45, 16 }
  0x68   :  { %v166_v53 = vor.u32 %v164_v33, %v163_v32  ;;  %v248_v57 = vrot.slane %v246_v48, 1  ;;  %v5590_v58 = vsel %vm5550_vm2, %v163_v32, 0  ;;  %v5603_v11 = vsel %vm5550_vm2, %v170_v59, 0 }
  0x69   :  { %v237_v56 = vor.u32 %v236_v46, %v232_v38  ;;  %v260_v0 = vrot.slane %v258_v51, 1  ;;  %v265_v1 = vrot.slane %v263_v52, 1  ;;  %v275_v3 = vshll.u32 %v5590_v58, 16 }
  0x6a   :  { %v5594_v2 = vsel %vm5550_vm2, 0, %v166_v53  ;;  %v249_v6 = vor.u32 %v248_v57, %v244_v47  ;;  %v287_v15 = vshll.u32 %v5603_v11, 16  ;;  %v123_v16 = vpack.c.bf16 %v113_v55, %v112_v54 }
  0x6b   :  { %v242_v4 = vsel %vm230_vm3, %v237_v56, %v241_v42  ;;  %v268_v7 = vshrl.u32 %v5594_v2, 16  ;;  %v270_v8 = vshll.u32 %v5594_v2, 16  ;;  %v261_v9 = vor.u32 %v260_v0, %v256_v50 }
  0x6c   :  { %4606 = vmatprep.mubr.msk.bf16.mxu0 %vm339_vm4, %v242_v4  ;;  %v254_v13 = vsel %vm230_vm3, %v249_v6, %v253_v49  ;;  %v173_v18 = vor.u32 %v171_v10, %v170_v59  ;;  %v124_v19 = vpack.c.bf16 %v115_v61, %v114_v60  ;;  %v125_v20 = vpack.c.bf16 %v117_v63, %v116_v62 }
  0x6d   :  { %v272_v14 = vrot.slane %v270_v8, 1  ;;  %4607 = vmatmul.mubr.msk.bf16.vlgmr.msra.gmra.mrb[0].mxu0 %vm339_vm4, %v254_v13  ;;  %v266_v17 = vsel %vm230_vm3, %v261_v9, %v265_v1  ;;  %v277_v22 = vrot.slane %v275_v3, 1  ;;  %v175_v24 = vshrl.u32 %v123_v16, 16 }
  0x6e   :  { %4623 = vmatpush3.bf16.msra.mxu0 %v5546_v5  ;;  %4610 = vmatprep.mubr.msk.bf16.mxu0 %vm339_vm4, %v266_v17  ;;  %v178_v25 = vshll.u32 %v123_v16, 16  ;;  %v5615_v27 = vsel %vm5550_vm2, 0, %v173_v18  ;;  %v182_v29 = vshrl.u32 %v124_v19, 16  ;;  %v185_v30 = vshll.u32 %v124_v19, 16 }
  0x6f   :  { %v273_v21 = vor.u32 %v272_v14, %v268_v7  ;;  %4624 = vmatprep.subr.bf16.mxu0 %v5205_v12  ;;  %v189_v31 = vshrl.u32 %v125_v20, 16  ;;  %v607_v32 = vrot.slane %v5566_v36, 1  ;;  %v280_v5 = vshrl.u32 %v5615_v27, 16 }
  0x70   :  { %v282_v33 = vshll.u32 %v5615_v27, 16  ;;  %v177_v35 = vrot.slane %v175_v24, 7  ;;  %v289_v37 = vrot.slane %v287_v15, 1  ;;  %v184_v38 = vrot.slane %v182_v29, 7 }
  0x71   :  { %v191_v39 = vrot.slane %v189_v31, 7  ;;  %v192_v40 = vshll.u32 %v125_v20, 16  ;;  %v278_v41 = vsel %vm230_vm3, %v273_v21, %v277_v22  ;;  %v606_v54 = vrot.slane %v5573_v43, 1 }
  0x72   :  { %v284_v42 = vrot.slane %v282_v33, 1  ;;  %v180_v46 = vor.u32 %v178_v25, %v177_v35  ;;  %v227_v47 = vsel %vm5550_vm2, %v177_v35, 0  ;;  %4625 = vmatpush3.bf16.msra.mxu0 %v5205_v12  ;;  %v187_v49 = vor.u32 %v185_v30, %v184_v38 }
  0x73   :  { %v299_v48 = vshll.u32 %v227_v47, 16  ;;  %v228_v36 = vsel %vm5550_vm2, %v184_v38, 0  ;;  %v194_v50 = vor.u32 %v192_v40, %v191_v39  ;;  %4642 = vmatprep.subr.bf16.mxu0 %v5611_v26  ;;  %v229_v59 = vsel %vm5550_vm2, %v191_v39, 0  ;;  %v5207_v39 = vld [vmem:[#allocation6 + $0x28] sm:$0xff]  }
  0x74   :  { %v285_v51 = vor.u32 %v284_v42, %v280_v5  ;;  %v219_v52 = vsel %vm5550_vm2, 0, %v180_v46  ;;  %v311_v53 = vshll.u32 %v228_v36, 16  ;;  %v220_v57 = vsel %vm5550_vm2, 0, %v187_v49 }
  0x75   :  { %4611 = vmatmul.mubr.msk.bf16.gmra.mrb[4].mxu0 %vm339_vm4, %v278_v41  ;;  %v292_v55 = vshrl.u32 %v219_v52, 16  ;;  %v294_v56 = vshll.u32 %v219_v52, 16  ;;  %v304_v61 = vshrl.u32 %v220_v57, 16  ;;  %v306_v62 = vshll.u32 %v220_v57, 16  ;;  %v5212_v41 = vld [vmem:[#allocation8 + $0x28] sm:$0xff]  }
  0x76   :  { %v290_v60 = vsel %vm230_vm3, %v285_v51, %v289_v37  ;;  %v301_v0 = vrot.slane %v299_v48, 1  ;;  %v313_v1 = vrot.slane %v311_v53, 1  ;;  %v221_v3 = vsel %vm5550_vm2, 0, %v194_v50  ;;  %v5214_v53 = vld [vmem:[#allocation8 + $0x30] sm:$0xff]  }
  0x77   :  { %4614 = vmatprep.mubr.msk.bf16.mxu0 %vm339_vm4, %v290_v60  ;;  %v296_v63 = vrot.slane %v294_v56, 1  ;;  %v308_v4 = vrot.slane %v306_v62, 1  ;;  %v318_v6 = vshll.u32 %v221_v3, 16  ;;  %v323_v7 = vshll.u32 %v229_v59, 16 }
  0x78   :  { %v608_v8 = vsel %vm602_vm5, %v606_v54, %v607_v32  ;;  %v316_v10 = vshrl.u32 %v221_v3, 16  ;;  %v609_v12 = vrot.slane %v5577_v44, 1  ;;  %v610_v13 = vrot.slane %v5581_v45, 1 }
  0x79   :  { %v297_v9 = vor.u32 %v296_v63, %v292_v55  ;;  %v309_v14 = vor.u32 %v308_v4, %v304_v61  ;;  %v320_v15 = vrot.slane %v318_v6, 1  ;;  %v612_v16 = vrot.slane %v5594_v2, 1 }
  0x7a   :  { %v613_v17 = vrot.slane %v5590_v58, 1  ;;  %v611_v19 = vsel %vm602_vm5, %v609_v12, %v610_v13  ;;  %v615_v20 = vrot.slane %v5615_v27, 1  ;;  %v616_v21 = vrot.slane %v5603_v11, 1 }
  0x7b   :  { %v302_v18 = vsel %vm230_vm3, %v297_v9, %v301_v0  ;;  %v314_v22 = vsel %vm230_vm3, %v309_v14, %v313_v1  ;;  %v325_v24 = vrot.slane %v323_v7, 1  ;;  %v618_v45 = vrot.slane %v219_v52, 1  ;;  %v5216_v1 = vld [vmem:[#allocation8 + $0x38] sm:$0xff]   ;;  %v5693_v9 = vld [vmem:[#allocation8 + $0x60] sm:$0xff]  }
  0x7c   :  { %v614_v25 = vsel %vm602_vm5, %v612_v16, %v613_v17  ;;  %v617_v29 = vsel %vm602_vm5, %v615_v20, %v616_v21  ;;  %v619_v30 = vrot.slane %v227_v47, 1  ;;  %v621_v58 = vrot.slane %v220_v57, 1 }
  0x7d   :  { %4615 = vmatmul.mubr.msk.bf16.gmra.mrb[8].mxu0 %vm339_vm4, %v302_v18  ;;  %v622_v31 = vrot.slane %v228_v36, 1  ;;  %v321_v32 = vor.u32 %v320_v15, %v316_v10  ;;  %v624_v5 = vrot.slane %v221_v3, 1  ;;  %v625_v33 = vrot.slane %v229_v59, 1 }
  0x7e   :  { %4618 = vmatprep.mubr.msk.bf16.mxu0 %vm339_vm4, %v314_v22  ;;  %v620_v11 = vsel %vm602_vm5, %v618_v45, %v619_v30  ;;  %v604_v40 = vrot.slane %v5557_v28, 1  ;;  %v5208_v28 = vld [vmem:[#allocation8 + $0x40] sm:$0xff]  }
  0x7f   :  { %v623_v35 = vsel %vm602_vm5, %v621_v58, %v622_v31  ;;  %v626_v37 = vsel %vm602_vm5, %v624_v5, %v625_v33  ;;  %v326_v38 = vsel %vm230_vm3, %v321_v32, %v325_v24  ;;  %4710 = vmatprep.subr.bf16.mxu1 %v5208_v28 }
  0x80   :  { %4711 = vmatpush3.bf16.msra.mxu1 %v5208_v28 }
  0x85   :  { %4619 = vmatmul.mubr.msk.bf16.gmra.mrb[12].mxu0 %vm339_vm4, %v326_v38 }
  0x86   :  { %4626 = vmatprep.mubr.msk.bf16.mxu0 %vm339_vm4, %v5562_v34 }
  0x8d   :  { %4627 = vmatmul.mubr.msk.bf16.vlgmr.msra.gmra.mrb[0].mxu0 %vm339_vm4, %v5573_v43  ;;  %v603_v43 = vrot.slane %v5562_v34, 1  ;;  %v5209_v34 = vld [vmem:[#allocation8 + $0x48] sm:$0xff]  }
  0x8e   :  { %4643 = vmatpush3.bf16.msra.mxu0 %v5611_v26  ;;  %4630 = vmatprep.mubr.msk.bf16.mxu0 %vm339_vm4, %v5577_v44  ;;  %v5210_v44 = vld [vmem:[#allocation8 + $0x20] sm:$0xff]  }
  0x8f   :  { %4644 = vmatprep.subr.bf16.mxu0 %v5207_v39  ;;  %v605_v26 = vsel %vm602_vm5, %v603_v43, %v604_v40  ;;  %4712 = vmatprep.subr.bf16.mxu1 %v5209_v34 }
  0x90   :  { %4713 = vmatpush3.bf16.msra.mxu1 %v5209_v34 }
  0x92   :  { %4645 = vmatpush3.bf16.msra.mxu0 %v5207_v39 }
  0x93   :  { %4662 = vmatprep.subr.bf16.mxu0 %v5210_v44 }
  0x95   :  { %4631 = vmatmul.mubr.msk.bf16.gmra.mrb[4].mxu0 %vm339_vm4, %v5594_v2  ;;  %v5211_v2 = vld [vmem:[#allocation8 + $0x50] sm:$0xff]  }
  0x96   :  { %4634 = vmatprep.mubr.msk.bf16.mxu0 %vm339_vm4, %v5615_v27  ;;  %4714 = vmatprep.subr.bf16.mxu1 %v5211_v2  ;;  %v5685_v27 = vld [vmem:[%s6669_s2] ss:$0 sm:$0xff]  ;;  %s5421_s2 = smov 96  }
  0x97   :  { %4715 = vmatpush3.bf16.msra.mxu1 %v5211_v2 }
  0x9d   :  { %4635 = vmatmul.mubr.msk.bf16.gmra.mrb[8].mxu0 %vm339_vm4, %v219_v52  ;;  %v5213_v52 = vld [vmem:[#allocation8 + $0x58] sm:$0xff]  }
  0x9e   :  { %4638 = vmatprep.mubr.msk.bf16.mxu0 %vm339_vm4, %v220_v57  ;;  %4716 = vmatprep.subr.bf16.mxu1 %v5213_v52 }
  0x9f   :  { %4717 = vmatpush3.bf16.msra.mxu1 %v5213_v52 }
  0xa0   :  { %4734 = vmatprep.subr.bf16.mxu1 %v5693_v9 }
  0xa5   :  { %4639 = vmatmul.mubr.msk.bf16.gmra.mrb[12].mxu0 %vm339_vm4, %v221_v3 }
  0xa6   :  { %4646 = vmatprep.mubr.msk.bf16.mxu0 %vm339_vm4, %v605_v26 }
  0xad   :  { %4647 = vmatmul.mubr.msk.bf16.vlgmr.msra.gmra.mrb[0].mxu0 %vm339_vm4, %v608_v8 }
  0xae   :  { %4650 = vmatprep.mubr.msk.bf16.mxu0 %vm339_vm4, %v611_v19  ;;  %4663 = vmatpush3.bf16.msra.mxu0 %v5210_v44 }
  0xaf   :  { %4664 = vmatprep.subr.bf16.mxu0 %v5212_v41 }
  0xb2   :  { %4665 = vmatpush3.bf16.msra.mxu0 %v5212_v41 }
  0xb3   :  { %4666 = vmatprep.subr.bf16.mxu0 %v5214_v53 }
  0xb5   :  { %4651 = vmatmul.mubr.msk.bf16.gmra.mrb[4].mxu0 %vm339_vm4, %v614_v25 }
  0xb6   :  { %4654 = vmatprep.mubr.msk.bf16.mxu0 %vm339_vm4, %v617_v29  ;;  %4667 = vmatpush3.bf16.msra.mxu0 %v5214_v53 }
  0xb7   :  { %4668 = vmatprep.subr.bf16.mxu0 %v5216_v1 }
  0xba   :  { %4669 = vmatpush3.bf16.msra.mxu0 %v5216_v1 }
  0xbd   :  { %4655 = vmatmul.mubr.msk.bf16.gmra.mrb[8].mxu0 %vm339_vm4, %v620_v11 }
  0xbe   :  { %4658 = vmatprep.mubr.msk.bf16.mxu0 %vm339_vm4, %v623_v35 }
  0xc5   :  { %4659 = vmatmul.mubr.msk.bf16.gmra.mrb[12].mxu0 %vm339_vm4, %v626_v37 }
 0x180   :  { %v4648_v42 = vpop.f32.mrb[0].mxu0 }
 0x181   :  { %v784_v46 = vadd.f32 %v4648_v42, %v5685_v27  ;;  %v697_v47 = vpop.f32.mrb[1].mxu0 }
 0x182   :  { %v782_v48 = vadd.f32 %v5685_v27, %v697_v47  ;;  %v4649_v49 = vpop.f32.mrb[2].mxu0 }
 0x183   :  { %v816_v36 = vmul.f32 0.01, %v784_v46  ;;  %v785_v50 = vadd.f32 %v4649_v49, %v5685_v27  ;;  %v700_v51 = vpop.f32.mrb[3].mxu0  ;;  %vm800_vm6 = vcmp.ge.f32.partialorder %v784_v46, 0.0 }
 0x184   :  { %v814_v54 = vmul.f32 0.01, %v782_v48  ;;  %v783_v55 = vadd.f32 %v5685_v27, %v700_v51  ;;  %vm798_vm7 = vcmp.ge.f32.partialorder %v782_v48, 0.0 }
 0x185   :  { %vm801_vm8 = vcmp.ge.f32.partialorder %v785_v50, 0.0  ;;  %v817_v56 = vmul.f32 0.01, %v785_v50  ;;  %v832_v59 = vsel %vm800_vm6, %v784_v46, %v816_v36 }
 0x186   :  { %vm799_vm9 = vcmp.ge.f32.partialorder %v783_v55, 0.0  ;;  %v815_v57 = vmul.f32 0.01, %v783_v55  ;;  %v830_v62 = vsel %vm798_vm7, %v782_v48, %v814_v54 }
 0x187   :  { %v833_v60 = vsel %vm801_vm8, %v785_v50, %v817_v56 }
 0x188   :  { %v4652_v61 = vpop.f32.mrb[4].mxu0  ;;  %v831_v63 = vsel %vm799_vm9, %v783_v55, %v815_v57  ;;  %v847_v0 = vpack.c.bf16 %v833_v60, %v832_v59 }
 0x189   :  { %v788_v3 = vadd.f32 %v4652_v61, %v5685_v27  ;;  %v713_v4 = vpop.f32.mrb[5].mxu0  ;;  %v846_v6 = vpack.c.bf16 %v831_v63, %v830_v62 }
 0x18a   :  { %v786_v7 = vadd.f32 %v5685_v27, %v713_v4  ;;  %v4653_v8 = vpop.f32.mrb[6].mxu0  ;;  %2008 = vst [vmem:[#allocation2 + $0x8] sm:$0xff] %v847_v0  ;;  %v904_v21 = vrot.slane %v847_v0, 7 }
 0x18b   :  { %v820_v10 = vmul.f32 0.01, %v788_v3  ;;  %v789_v12 = vadd.f32 %v4653_v8, %v5685_v27  ;;  %v716_v13 = vpop.f32.mrb[7].mxu0  ;;  %v903_v14 = vrot.slane %v846_v6, 7  ;;  %2007 = vst [vmem:[#allocation2] sm:$0xff] %v846_v6  ;;  %vm804_vm10 = vcmp.ge.f32.partialorder %v788_v3, 0.0 }
 0x18c   :  { %v818_v15 = vmul.f32 0.01, %v786_v7  ;;  %v787_v16 = vadd.f32 %v5685_v27, %v716_v13  ;;  %vm802_vm11 = vcmp.ge.f32.partialorder %v786_v7, 0.0 }
 0x18d   :  { %vm805_vm12 = vcmp.ge.f32.partialorder %v789_v12, 0.0  ;;  %v821_v17 = vmul.f32 0.01, %v789_v12  ;;  %911 = vrot.lane.b32.xlu0 %v903_v14, %s5421_s2  ;;  %v836_v19 = vsel %vm804_vm10, %v788_v3, %v820_v10  ;;  %v5219_v3 = vld [vmem:[#allocation8] sm:$0xff]   ;;  %vm1057_vm10 = vcmask 523264  }
 0x18e   :  { %vm803_vm13 = vcmp.ge.f32.partialorder %v787_v16, 0.0  ;;  %v819_v18 = vmul.f32 0.01, %v787_v16  ;;  %v834_v24 = vsel %vm802_vm11, %v786_v7, %v818_v15  ;;  %4686 = vmatprep.subr.bf16.mxu0 %v5219_v3  ;;  %vm1517_vm11 = vsmask.f32 6400 }
 0x18f   :  { %v837_v20 = vsel %vm805_vm12, %v789_v12, %v821_v17  ;;  %vm1751_vm12 = vcmask 1045504  }
 0x190   :  { %v4656_v22 = vpop.f32.mrb[8].mxu0  ;;  %v835_v25 = vsel %vm803_vm13, %v787_v16, %v819_v18  ;;  %v849_v45 = vpack.c.bf16 %v837_v20, %v836_v19 }
 0x191   :  { %v792_v29 = vadd.f32 %v4656_v22, %v5685_v27  ;;  %913 = vrot.lane.b32.xlu0 %v904_v21, %s5421_s2  ;;  %v729_v30 = vpop.f32.mrb[9].mxu0  ;;  %v848_v58 = vpack.c.bf16 %v835_v25, %v834_v24 }
 0x192   :  { %v790_v31 = vadd.f32 %v5685_v27, %v729_v30  ;;  %v4657_v32 = vpop.f32.mrb[10].mxu0  ;;  %2010 = vst [vmem:[#allocation2 + $0x18] sm:$0xff] %v849_v45  ;;  %v906_v28 = vrot.slane %v849_v45, 7 }
 0x193   :  { %v824_v5 = vmul.f32 0.01, %v792_v29  ;;  %v793_v33 = vadd.f32 %v4657_v32, %v5685_v27  ;;  %v732_v11 = vpop.f32.mrb[11].mxu0  ;;  %v905_v35 = vrot.slane %v848_v58, 7  ;;  %2009 = vst [vmem:[#allocation2 + $0x10] sm:$0xff] %v848_v58  ;;  %vm808_vm14 = vcmp.ge.f32.partialorder %v792_v29, 0.0 }
 0x194   :  { %v822_v37 = vmul.f32 0.01, %v790_v31  ;;  %v791_v38 = vadd.f32 %v5685_v27, %v732_v11  ;;  %vm806_vm15 = vcmp.ge.f32.partialorder %v790_v31, 0.0 }
 0x195   :  { %vm809_vm1 = vcmp.ge.f32.partialorder %v793_v33, 0.0  ;;  %v825_v39 = vmul.f32 0.01, %v793_v33  ;;  %915 = vrot.lane.b32.xlu1 %v905_v35, %s5421_s2  ;;  %v840_v43 = vsel %vm808_vm14, %v792_v29, %v824_v5 }
 0x196   :  { %vm807_vm4 = vcmp.ge.f32.partialorder %v791_v38, 0.0  ;;  %v823_v40 = vmul.f32 0.01, %v791_v38  ;;  %v838_v34 = vsel %vm806_vm15, %v790_v31, %v822_v37 }
 0x197   :  { %v841_v26 = vsel %vm809_vm1, %v793_v33, %v825_v39  ;;  %v5221_v39 = vld [vmem:[#allocation8 + $0x8] sm:$0xff]  }
 0x198   :  { %v839_v44 = vsel %vm807_vm4, %v791_v38, %v823_v40  ;;  %v4660_v2 = vpop.f32.mrb[12].mxu0  ;;  %v851_v41 = vpack.c.bf16 %v841_v26, %v840_v43  ;;  %v5217_v43 = vld [vmem:[#allocation8 + $0x68] sm:$0xff]  }
 0x199   :  { %v796_v42 = vadd.f32 %v4660_v2, %v5685_v27  ;;  %917 = vrot.lane.b32.xlu1 %v906_v28, %s5421_s2  ;;  %v745_v46 = vpop.f32.mrb[13].mxu0  ;;  %v850_v47 = vpack.c.bf16 %v839_v44, %v838_v34 }
 0x19a   :  { %v794_v48 = vadd.f32 %v5685_v27, %v745_v46  ;;  %v4661_v49 = vpop.f32.mrb[14].mxu0  ;;  %v908_v36 = vrot.slane %v851_v41, 7  ;;  %2012 = vst [vmem:[#allocation2 + $0x28] sm:$0xff] %v851_v41 }
 0x19b   :  { %v828_v50 = vmul.f32 0.01, %v796_v42  ;;  %v797_v51 = vadd.f32 %v4661_v49, %v5685_v27  ;;  %v748_v52 = vpop.f32.mrb[15].mxu0  ;;  %v907_v53 = vrot.slane %v850_v47, 7  ;;  %2011 = vst [vmem:[#allocation2 + $0x20] sm:$0xff] %v850_v47  ;;  %vm812_vm6 = vcmp.ge.f32.partialorder %v796_v42, 0.0 }
 0x19c   :  { %v826_v54 = vmul.f32 0.01, %v794_v48  ;;  %v795_v55 = vadd.f32 %v5685_v27, %v748_v52  ;;  %vm810_vm7 = vcmp.ge.f32.partialorder %v794_v48, 0.0  ;;  %v5222_v47 = vld [vmem:[#allocation8 + $0x10] sm:$0xff]  }
 0x19d   :  { %vm813_vm8 = vcmp.ge.f32.partialorder %v797_v51, 0.0  ;;  %v829_v56 = vmul.f32 0.01, %v797_v51  ;;  %921 = vrot.lane.b32.xlu1 %v908_v36, %s5421_s2  ;;  %919 = vrot.lane.b32.xlu0 %v907_v53, %s5421_s2  ;;  %v844_v59 = vsel %vm812_vm6, %v796_v42, %v828_v50  ;;  %v5218_v36 = vld [vmem:[#allocation8 + $0x70] sm:$0xff]  }
 0x19e   :  { %vm811_vm9 = vcmp.ge.f32.partialorder %v795_v55, 0.0  ;;  %v827_v57 = vmul.f32 0.01, %v795_v55  ;;  %v842_v61 = vsel %vm810_vm7, %v794_v48, %v826_v54 }
 0x19f   :  { %v845_v60 = vsel %vm813_vm8, %v797_v51, %v829_v56 }
 0x1a0   :  { %v843_v62 = vsel %vm811_vm9, %v795_v55, %v827_v57  ;;  %v853_v63 = vpack.c.bf16 %v845_v60, %v844_v59 }
 0x1a1   :  { %v852_v0 = vpack.c.bf16 %v843_v62, %v842_v61  ;;  %v5220_v62 = vld [vmem:[#allocation8 + $0x78] sm:$0xff]  }
 0x1a2   :  { %v910_v1 = vrot.slane %v853_v63, 7  ;;  %2014 = vst [vmem:[#allocation2 + $0x38] sm:$0xff] %v853_v63  ;;  %v5224_v63 = vld [vmem:[#allocation8 + $0x18] sm:$0xff]  }
 0x1a3   :  { %v909_v4 = vrot.slane %v852_v0, 7  ;;  %2013 = vst [vmem:[#allocation2 + $0x30] sm:$0xff] %v852_v0 }
 0x1a4   :  { %925 = vrot.lane.b32.xlu1 %v910_v1, %s5421_s2 }
 0x1a5   :  { %923 = vrot.lane.b32.xlu0 %v909_v4, %s5421_s2 }
 0x1ff   :  { %v912_v27 = vpop.permute.xlu0 %911 }
 0x200   :  { %v5715_v6 = vsel %vm211_vm0, 0, %v912_v27  ;;  %v5718_v7 = vsel %vm211_vm0, %v912_v27, 0 }
 0x201   :  { %v955_v8 = vshll.u32 %v5715_v6, 16  ;;  %v1332_v10 = vrot.slane %v5715_v6, 1  ;;  %v1333_v12 = vrot.slane %v5718_v7, 1  ;;  %v953_v18 = vshrl.u32 %v5715_v6, 16 }
 0x202   :  { %v959_v19 = vshll.u32 %v5718_v7, 16  ;;  %v1521_v59 = vshrl.u32 %v5718_v7, 16 }
 0x203   :  { %v914_v13 = vpop.permute.xlu0 %913  ;;  %v957_v14 = vrot.slane %v955_v8, 1  ;;  %v1334_v17 = vsel %vm602_vm5, %v1332_v10, %v1333_v12 }
 0x204   :  { %v5726_v15 = vsel %vm211_vm0, 0, %v914_v13  ;;  %v5729_v16 = vsel %vm211_vm0, %v914_v13, 0  ;;  %4718 = vmatprep.mubr.msk.bf16.mxu1 %vm1057_vm10, %v1334_v17  ;;  %v961_v30 = vrot.slane %v959_v19, 1 }
 0x205   :  { %v965_v20 = vshll.u32 %v5726_v15, 16  ;;  %v969_v21 = vshll.u32 %v5729_v16, 16  ;;  %v963_v22 = vshrl.u32 %v5726_v15, 16  ;;  %v958_v45 = vor.u32 %v957_v14, %v953_v18 }
 0x206   :  { %v1336_v32 = vrot.slane %v5729_v16, 1  ;;  %v1335_v35 = vrot.slane %v5726_v15, 1 }
 0x207   :  { %v967_v24 = vrot.slane %v965_v20, 1  ;;  %v916_v25 = vpop.permute.xlu1 %915  ;;  %v971_v31 = vrot.slane %v969_v21, 1  ;;  %v962_v11 = vsel %vm230_vm3, %v958_v45, %v961_v30 }
 0x208   :  { %v5743_v29 = vsel %vm211_vm0, 0, %v916_v25  ;;  %v5753_v5 = vsel %vm211_vm0, %v916_v25, 0  ;;  %4670 = vmatprep.mubr.msk.bf16.mxu0 %vm1057_vm10, %v962_v11  ;;  %v1337_v28 = vsel %vm602_vm5, %v1335_v35, %v1336_v32  ;;  %v5832_v35 = vrot.slane %v953_v18, 1 }
 0x209   :  { %v968_v58 = vor.u32 %v967_v24, %v963_v22  ;;  %v975_v33 = vshll.u32 %v5743_v29, 16  ;;  %v1339_v26 = vrot.slane %v5753_v5, 1  ;;  %4719 = vmatmul.mubr.msk.bf16.vlgmr.msra.gmra.mrb[0].mxu1 %vm1057_vm10, %v1337_v28  ;;  %v1338_v41 = vrot.slane %v5743_v29, 1 }
 0x20a   :  { %4735 = vmatpush3.bf16.msra.mxu1 %v5693_v9  ;;  %v979_v48 = vshll.u32 %v5753_v5, 16  ;;  %v973_v50 = vshrl.u32 %v5743_v29, 16  ;;  %v5813_v24 = vrot.slane %v1521_v59, 1 }
 0x20b   :  { %v918_v37 = vpop.permute.xlu1 %917  ;;  %v972_v38 = vsel %vm230_vm3, %v968_v58, %v971_v31  ;;  %v977_v42 = vrot.slane %v975_v33, 1  ;;  %4736 = vmatprep.subr.bf16.mxu1 %v5217_v43  ;;  %v1340_v51 = vsel %vm602_vm5, %v1338_v41, %v1339_v26  ;;  %v5818_v58 = vld [vmem:[#allocation8 + $0x80] sm:$0xff]   ;;  %v5822_v31 = vrot.slane %v959_v19, 2 }
 0x20c   :  { %v5761_v40 = vsel %vm211_vm0, 0, %v918_v37  ;;  %v5766_v34 = vsel %vm211_vm0, %v918_v37, 0  ;;  %4671 = vmatmul.mubr.msk.bf16.vlgmr.msra.gmra.mrb[16].mxu0 %vm1057_vm10, %v972_v38  ;;  %4722 = vmatprep.mubr.msk.bf16.mxu1 %vm1057_vm10, %v1340_v51  ;;  %v981_v60 = vrot.slane %v979_v48, 1 }
 0x20d   :  { %v985_v44 = vshll.u32 %v5761_v40, 16  ;;  %4687 = vmatpush3.bf16.msra.mxu0 %v5219_v3  ;;  %v1342_v2 = vrot.slane %v5766_v34, 1  ;;  %v1341_v46 = vrot.slane %v5761_v40, 1  ;;  %v989_v9 = vshll.u32 %v5766_v34, 16 }
 0x20e   :  { %4688 = vmatprep.subr.bf16.mxu0 %v5221_v39  ;;  %v978_v56 = vor.u32 %v977_v42, %v973_v50  ;;  %4737 = vmatpush3.bf16.msra.mxu1 %v5217_v43  ;;  %v983_v61 = vshrl.u32 %v5761_v40, 16  ;;  %v1530_v43 = vshrl.u32 %v5729_v16, 16 }
 0x20f   :  { %v920_v49 = vpop.permute.xlu0 %919  ;;  %v922_v52 = vpop.permute.xlu1 %921  ;;  %v987_v53 = vrot.slane %v985_v44, 1  ;;  %v1343_v57 = vsel %vm602_vm5, %v1341_v46, %v1342_v2  ;;  %4738 = vmatprep.subr.bf16.mxu1 %v5218_v36  ;;  %v991_v0 = vrot.slane %v989_v9, 1 }
 0x210   :  { %v5785_v54 = vsel %vm211_vm0, 0, %v920_v49  ;;  %v5788_v55 = vsel %vm211_vm0, %v920_v49, 0  ;;  %v5800_v1 = vsel %vm211_vm0, 0, %v922_v52  ;;  %v982_v27 = vsel %vm230_vm3, %v978_v56, %v981_v60 }
 0x211   :  { %4689 = vmatpush3.bf16.msra.mxu0 %v5221_v39  ;;  %v1345_v3 = vrot.slane %v5788_v55, 1  ;;  %v995_v4 = vshll.u32 %v5785_v54, 16  ;;  %4723 = vmatmul.mubr.msk.bf16.gmra.mrb[4].mxu1 %vm1057_vm10, %v1343_v57  ;;  %v988_v10 = vor.u32 %v987_v53, %v983_v61  ;;  %v1344_v12 = vrot.slane %v5785_v54, 1 }
 0x212   :  { %4690 = vmatprep.subr.bf16.mxu0 %v5222_v47  ;;  %v5810_v14 = vsel %vm211_vm0, %v922_v52, 0  ;;  %4674 = vmatprep.mubr.msk.bf16.mxu0 %vm1057_vm10, %v982_v27  ;;  %v999_v25 = vshll.u32 %v5788_v55, 16  ;;  %v1005_v32 = vshll.u32 %v5800_v1, 16  ;;  %v1003_v26 = vshrl.u32 %v5800_v1, 16 }
 0x213   :  { %4739 = vmatpush3.bf16.msra.mxu1 %v5218_v36  ;;  %v992_v45 = vsel %vm230_vm3, %v988_v10, %v991_v0  ;;  %v1346_v30 = vsel %vm602_vm5, %v1344_v12, %v1345_v3  ;;  %v1009_v37 = vshll.u32 %v5810_v14, 16  ;;  %v997_v39 = vrot.slane %v995_v4, 1 }
 0x214   :  { %4740 = vmatprep.subr.bf16.mxu1 %v5220_v62  ;;  %4675 = vmatmul.mubr.msk.bf16.gmra.mrb[20].mxu0 %vm1057_vm10, %v992_v45  ;;  %v1348_v28 = vrot.slane %v5810_v14, 1  ;;  %v993_v18 = vshrl.u32 %v5785_v54, 16  ;;  %v1001_v2 = vrot.slane %v999_v25, 1  ;;  %v1347_v36 = vrot.slane %v5800_v1, 1 }
 0x215   :  { %4691 = vmatpush3.bf16.msra.mxu0 %v5222_v47  ;;  %4726 = vmatprep.mubr.msk.bf16.mxu1 %vm1057_vm10, %v1346_v30  ;;  %v1007_v51 = vrot.slane %v1005_v32, 1  ;;  %v5861_v52 = vrot.slane %v963_v22, 1  ;;  %v1011_v53 = vrot.slane %v1009_v37, 1  ;;  %v5875_v22 = vrot.slane %v965_v20, 2 }
 0x216   :  { %v926_v13 = vpop.permute.xlu1 %925  ;;  %4692 = vmatprep.subr.bf16.mxu0 %v5224_v63  ;;  %v998_v49 = vor.u32 %v997_v39, %v993_v18  ;;  %v1349_v60 = vsel %vm602_vm5, %v1347_v36, %v1348_v28  ;;  %v1519_v27 = vrot.slane %v955_v8, 2  ;;  %v1533_v45 = vrot.slane %v969_v21, 2 }
 0x217   :  { %v924_v17 = vpop.permute.xlu0 %923  ;;  %v5828_v11 = vsel %vm211_vm0, 0, %v926_v13  ;;  %4741 = vmatpush3.bf16.msra.mxu1 %v5220_v62  ;;  %v1008_v62 = vor.u32 %v1007_v51, %v1003_v26  ;;  %v5878_v0 = vsel %vm211_vm0, %v926_v13, 0  ;;  %v1539_v30 = vshrl.u32 %v5753_v5, 16 }
 0x218   :  { %v5836_v38 = vsel %vm211_vm0, 0, %v924_v17  ;;  %v5839_v19 = vsel %vm211_vm0, %v924_v17, 0  ;;  %v1025_v41 = vshll.u32 %v5828_v11, 16  ;;  %4758 = vmatprep.subr.bf16.mxu1 %v5818_v58  ;;  %v1002_v59 = vsel %vm230_vm3, %v998_v49, %v1001_v2 }
 0x219   :  { %4693 = vmatpush3.bf16.msra.mxu0 %v5224_v63  ;;  %v1015_v42 = vshll.u32 %v5836_v38, 16  ;;  %v1351_v46 = vrot.slane %v5839_v19, 1  ;;  %v1019_v47 = vshll.u32 %v5839_v19, 16  ;;  %v1013_v56 = vshrl.u32 %v5836_v38, 16  ;;  %4678 = vmatprep.mubr.msk.bf16.mxu0 %vm1057_vm10, %v1002_v59 }
 0x21a   :  { %v1350_v57 = vrot.slane %v5836_v38, 1  ;;  %4727 = vmatmul.mubr.msk.bf16.gmra.mrb[8].mxu1 %vm1057_vm10, %v1349_v60  ;;  %v1012_v12 = vsel %vm230_vm3, %v1008_v62, %v1011_v53  ;;  %v1027_v13 = vrot.slane %v1025_v41, 1  ;;  %v1532_v17 = vrot.slane %v1530_v43, 1 }
 0x21b   :  { %v1017_v63 = vrot.slane %v1015_v42, 1  ;;  %v1021_v10 = vrot.slane %v1019_v47, 1  ;;  %v1023_v8 = vshrl.u32 %v5828_v11, 16  ;;  %v1029_v39 = vshll.u32 %v5878_v0, 16 }
 0x21c   :  { %v1352_v3 = vsel %vm602_vm5, %v1350_v57, %v1351_v46  ;;  %4679 = vmatmul.mubr.msk.bf16.gmra.mrb[24].mxu0 %vm1057_vm10, %v1012_v12  ;;  %v1354_v28 = vrot.slane %v5878_v0, 1  ;;  %v1353_v46 = vrot.slane %v5828_v11, 1  ;;  %v1520_v43 = vor.u32 %v1519_v27, %v5832_v35 }
 0x21d   :  { %4730 = vmatprep.mubr.msk.bf16.mxu1 %vm1057_vm10, %v1352_v3  ;;  %v1018_v20 = vor.u32 %v1017_v63, %v1013_v56  ;;  %v1525_v21 = vor.u32 %v5822_v31, %v5813_v24  ;;  %v1753_v49 = vrot.slane %v5718_v7, 2  ;;  %v1028_v36 = vor.u32 %v1027_v13, %v1023_v8 }
 0x21e   :  { %v1752_v51 = vrot.slane %v5715_v6, 2  ;;  %v1529_v53 = vor.u32 %v5875_v22, %v5861_v52  ;;  %v1534_v57 = vor.u32 %v1533_v45, %v1532_v17  ;;  %v1755_v59 = vrot.slane %v5726_v15, 2 }
 0x21f   :  { %v1022_v2 = vsel %vm230_vm3, %v1018_v20, %v1021_v10  ;;  %v1756_v60 = vrot.slane %v5729_v16, 2  ;;  %v1541_v35 = vrot.slane %v1539_v30, 1  ;;  %v1542_v24 = vrot.slane %v979_v48, 2 }
 0x220   :  { %4682 = vmatprep.mubr.msk.bf16.mxu0 %vm1057_vm10, %v1022_v2  ;;  %v1031_v7 = vrot.slane %v1029_v39, 1  ;;  %v1355_v31 = vsel %vm602_vm5, %v1353_v46, %v1354_v28  ;;  %v1548_v62 = vshrl.u32 %v5766_v34, 16  ;;  %v1526_v52 = vsel %vm1517_vm11, %v1520_v43, %v1525_v21 }
 0x221   :  { %v1536_v63 = vrot.slane %v973_v50, 1  ;;  %v1537_v16 = vrot.slane %v975_v33, 2  ;;  %v1762_v22 = vrot.slane %v5766_v34, 2  ;;  %v1768_v48 = vrot.slane %v5810_v14, 2 }
 0x222   :  { %4731 = vmatmul.mubr.msk.bf16.gmra.mrb[12].mxu1 %vm1057_vm10, %v1355_v31  ;;  %v1765_v3 = vrot.slane %v5788_v55, 2  ;;  %v1032_v27 = vsel %vm230_vm3, %v1028_v36, %v1031_v7  ;;  %v1774_v10 = vrot.slane %v5878_v0, 2  ;;  %v1771_v12 = vrot.slane %v5839_v19, 2  ;;  %v5225_v36 = vld [vmem:[#allocation8 + $0x88] sm:$0xff]  }
 0x223   :  { %4742 = vmatprep.mubr.msk.bf16.mxu1 %vm1057_vm10, %v1526_v52  ;;  %v5935_v50 = vsel %vm1751_vm12, %v1752_v51, %v1753_v49  ;;  %v5938_v33 = vsel %vm1751_vm12, %v1755_v59, %v1756_v60  ;;  %v1557_v20 = vshrl.u32 %v5788_v55, 16  ;;  %v1543_v13 = vor.u32 %v1542_v24, %v1541_v35 }
 0x224   :  { %4683 = vmatmul.mubr.msk.bf16.gmra.mrb[28].mxu0 %vm1057_vm10, %v1032_v27  ;;  %v1761_v17 = vrot.slane %v5761_v40, 2  ;;  %v1764_v45 = vrot.slane %v5785_v54, 2  ;;  %v1538_v30 = vor.u32 %v1537_v16, %v1536_v63  ;;  %v1767_v28 = vrot.slane %v5800_v1, 2  ;;  %v5227_v63 = vld [vmem:[#allocation8 + $0x98] sm:$0xff]  }
 0x225   :  { %4694 = vmatprep.mubr.msk.bf16.mxu0 %vm1057_vm10, %v5715_v6  ;;  %v1770_v2 = vrot.slane %v5836_v38, 2  ;;  %v1773_v46 = vrot.slane %v5828_v11, 2  ;;  %v1550_v43 = vrot.slane %v1548_v62, 1  ;;  %v1551_v6 = vrot.slane %v989_v9, 2 }
 0x226   :  { %v5949_v21 = vsel %vm1751_vm12, %v1761_v17, %v1762_v22  ;;  %v5952_v49 = vsel %vm1751_vm12, %v1764_v45, %v1765_v3  ;;  %v5957_v51 = vsel %vm1751_vm12, %v1767_v28, %v1768_v48  ;;  %v1559_v35 = vrot.slane %v1557_v20, 1 }
 0x227   :  { %v5960_v59 = vsel %vm1751_vm12, %v1770_v2, %v1771_v12  ;;  %v5963_v60 = vsel %vm1751_vm12, %v1773_v46, %v1774_v10  ;;  %v1535_v24 = vsel %vm1517_vm11, %v1529_v53, %v1534_v57  ;;  %v1545_v7 = vrot.slane %v983_v61, 1 }
 0x228   :  { %v1546_v34 = vrot.slane %v985_v44, 2  ;;  %v1560_v9 = vrot.slane %v999_v25, 2  ;;  %v1544_v31 = vsel %vm1517_vm11, %v1538_v30, %v1543_v13  ;;  %v1554_v62 = vrot.slane %v993_v18, 1  ;;  %v5226_v44 = vld [vmem:[#allocation8 + $0x90] sm:$0xff]  }
 0x229   :  { %v1555_v52 = vrot.slane %v995_v4, 2  ;;  %v1566_v61 = vshrl.u32 %v5810_v14, 16  ;;  %v1575_v55 = vshrl.u32 %v5839_v19, 16  ;;  %v1552_v18 = vor.u32 %v1551_v6, %v1550_v43 }
 0x22a   :  { %4743 = vmatmul.mubr.msk.bf16.vlgmr.msra.gmra.mrb[0].mxu1 %vm1057_vm10, %v1535_v24  ;;  %v1547_v25 = vor.u32 %v1546_v34, %v1545_v7  ;;  %v1561_v4 = vor.u32 %v1560_v9, %v1559_v35  ;;  %v1569_v57 = vrot.slane %v1009_v37, 2  ;;  %v1563_v22 = vrot.slane %v1003_v26, 1  ;;  %v5231_v24 = vld [vmem:[#allocation9 + $0x58] sm:$0xff]   ;;  %v5232_v7 = vld [vmem:[#allocation9 + $0x60] sm:$0xff]  }
 0x22b   :  { %4759 = vmatpush3.bf16.msra.mxu1 %v5818_v58  ;;  %4746 = vmatprep.mubr.msk.bf16.mxu1 %vm1057_vm10, %v1544_v31  ;;  %v1556_v53 = vor.u32 %v1555_v52, %v1554_v62  ;;  %v1568_v58 = vrot.slane %v1566_v61, 1  ;;  %v1577_v16 = vrot.slane %v1575_v55, 1  ;;  %v1564_v48 = vrot.slane %v1005_v32, 2 }
 0x22c   :  { %4695 = vmatmul.mubr.msk.bf16.vlgmr.msra.gmra.mrb[16].mxu0 %vm1057_vm10, %v5726_v15  ;;  %4760 = vmatprep.subr.bf16.mxu1 %v5225_v36  ;;  %v1553_v15 = vsel %vm1517_vm11, %v1547_v25, %v1552_v18  ;;  %v1578_v3 = vrot.slane %v1019_v47, 2  ;;  %v1572_v14 = vrot.slane %v1013_v56, 1  ;;  %v1573_v37 = vrot.slane %v1015_v42, 2 }
 0x22d   :  { %4698 = vmatprep.mubr.msk.bf16.mxu0 %vm1057_vm10, %v5743_v29  ;;  %v1562_v27 = vsel %vm1517_vm11, %v1556_v53, %v1561_v4  ;;  %v1584_v26 = vshrl.u32 %v5878_v0, 16  ;;  %v1565_v32 = vor.u32 %v1564_v48, %v1563_v22  ;;  %v1570_v19 = vor.u32 %v1569_v57, %v1568_v58  ;;  %v5234_v22 = vld [vmem:[#allocation9 + $0x70] sm:$0xff]  }
 0x22e   :  { %v1574_v47 = vor.u32 %v1573_v37, %v1572_v14  ;;  %v1579_v10 = vor.u32 %v1578_v3, %v1577_v16  ;;  %v1587_v42 = vrot.slane %v1029_v39, 2  ;;  %v1581_v20 = vrot.slane %v1023_v8, 1 }
 0x22f   :  { %4761 = vmatpush3.bf16.msra.mxu1 %v5225_v36  ;;  %v1586_v56 = vrot.slane %v1584_v26, 1  ;;  %v1571_v12 = vsel %vm1517_vm11, %v1565_v32, %v1570_v19  ;;  %v1758_v8 = vrot.slane %v5743_v29, 2  ;;  %v5228_v29 = vld [vmem:[#allocation9 + $0x40] sm:$0xff]  }
 0x230   :  { %4762 = vmatprep.subr.bf16.mxu1 %v5226_v44  ;;  %4782 = vmatprep.subr.bf16.mxu0 %v5228_v29 }
 0x231   :  { %v1588_v39 = vor.u32 %v1587_v42, %v1586_v56  ;;  %4783 = vmatpush3.bf16.msra.mxu0 %v5228_v29  ;;  %v5235_v29 = vld [vmem:[#allocation9 + $0x78] sm:$0xff]  }
 0x232   :  { %4747 = vmatmul.mubr.msk.bf16.gmra.mrb[4].mxu1 %vm1057_vm10, %v1553_v15  ;;  %v5233_v15 = vld [vmem:[#allocation9 + $0x68] sm:$0xff]  }
 0x233   :  { %4750 = vmatprep.mubr.msk.bf16.mxu1 %vm1057_vm10, %v1562_v27  ;;  %4763 = vmatpush3.bf16.msra.mxu1 %v5226_v44 }
 0x234   :  { %4699 = vmatmul.mubr.msk.bf16.gmra.mrb[20].mxu0 %vm1057_vm10, %v5761_v40  ;;  %4764 = vmatprep.subr.bf16.mxu1 %v5227_v63  ;;  %v1582_v40 = vrot.slane %v1025_v41, 2  ;;  %v1759_v41 = vrot.slane %v5753_v5, 2  ;;  %v5229_v5 = vld [vmem:[#allocation9 + $0x48] sm:$0xff]  }
 0x235   :  { %4702 = vmatprep.mubr.msk.bf16.mxu0 %vm1057_vm10, %v5785_v54  ;;  %v1580_v54 = vsel %vm1517_vm11, %v1574_v47, %v1579_v10  ;;  %4784 = vmatprep.subr.bf16.mxu0 %v5229_v5 }
 0x236   :  { %v1583_v0 = vor.u32 %v1582_v40, %v1581_v20  ;;  %4785 = vmatpush3.bf16.msra.mxu0 %v5229_v5 }
 0x237   :  { %4765 = vmatpush3.bf16.msra.mxu1 %v5227_v63 }
 0x238   :  { %v1589_v13 = vsel %vm1517_vm11, %v1583_v0, %v1588_v39 }
 0x23a   :  { %4751 = vmatmul.mubr.msk.bf16.gmra.mrb[8].mxu1 %vm1057_vm10, %v1571_v12 }
 0x23b   :  { %4754 = vmatprep.mubr.msk.bf16.mxu1 %vm1057_vm10, %v1580_v54 }
 0x23c   :  { %4703 = vmatmul.mubr.msk.bf16.gmra.mrb[24].mxu0 %vm1057_vm10, %v5800_v1  ;;  %v1760_v1 = vsel %vm1751_vm12, %v1758_v8, %v1759_v41 }
 0x23d   :  { %4706 = vmatprep.mubr.msk.bf16.mxu0 %vm1057_vm10, %v5836_v38 }
 0x242   :  { %4755 = vmatmul.mubr.msk.bf16.gmra.mrb[12].mxu1 %vm1057_vm10, %v1589_v13 }
 0x243   :  { %4766 = vmatprep.mubr.msk.bf16.mxu1 %vm1057_vm10, %v5935_v50 }
 0x244   :  { %4707 = vmatmul.mubr.msk.bf16.gmra.mrb[28].mxu0 %vm1057_vm10, %v5828_v11  ;;  %v5230_v11 = vld [vmem:[#allocation9 + $0x50] sm:$0xff]  }
 0x245   :  { %4786 = vmatprep.subr.bf16.mxu0 %v5230_v11 }
 0x246   :  { %4787 = vmatpush3.bf16.msra.mxu0 %v5230_v11 }
 0x247   :  { %4788 = vmatprep.subr.bf16.mxu0 %v5231_v24 }
 0x24a   :  { %4767 = vmatmul.mubr.msk.bf16.vlgmr.msra.gmra.mrb[0].mxu1 %vm1057_vm10, %v5938_v33  ;;  %4789 = vmatpush3.bf16.msra.mxu0 %v5231_v24 }
 0x24b   :  { %4770 = vmatprep.mubr.msk.bf16.mxu1 %vm1057_vm10, %v1760_v1  ;;  %4790 = vmatprep.subr.bf16.mxu0 %v5232_v7 }
 0x24e   :  { %4791 = vmatpush3.bf16.msra.mxu0 %v5232_v7 }
 0x24f   :  { %4792 = vmatprep.subr.bf16.mxu0 %v5233_v15 }
 0x252   :  { %4771 = vmatmul.mubr.msk.bf16.gmra.mrb[4].mxu1 %vm1057_vm10, %v5949_v21  ;;  %4793 = vmatpush3.bf16.msra.mxu0 %v5233_v15 }
 0x253   :  { %4774 = vmatprep.mubr.msk.bf16.mxu1 %vm1057_vm10, %v5952_v49  ;;  %4794 = vmatprep.subr.bf16.mxu0 %v5234_v22 }
 0x256   :  { %4795 = vmatpush3.bf16.msra.mxu0 %v5234_v22 }
 0x257   :  { %4796 = vmatprep.subr.bf16.mxu0 %v5235_v29 }
 0x25a   :  { %4775 = vmatmul.mubr.msk.bf16.gmra.mrb[8].mxu1 %vm1057_vm10, %v5957_v51  ;;  %4797 = vmatpush3.bf16.msra.mxu0 %v5235_v29 }
 0x25b   :  { %4778 = vmatprep.mubr.msk.bf16.mxu1 %vm1057_vm10, %v5960_v59 }
 0x262   :  { %4779 = vmatmul.mubr.msk.bf16.gmra.mrb[12].mxu1 %vm1057_vm10, %v5963_v60  ;;  %v6062_v60 = vld [vmem:[%s6671_s4] ss:$0 sm:$0xff]  ;;  %s5422_s4 = smov 32  }
 0x2ff   :  { %v4696_v38 = vpop.f32.mrb[16].mxu0 }
 0x300   :  { %v1253_v50 = vpop.f32.mrb[17].mxu0 }
 0x301   :  { %v4697_v33 = vpop.f32.mrb[18].mxu0 }
 0x302   :  { %v1256_v17 = vpop.f32.mrb[19].mxu0 }
 0x307   :  { %v4700_v45 = vpop.f32.mrb[20].mxu0 }
 0x308   :  { %v1269_v30 = vpop.f32.mrb[21].mxu0 }
 0x309   :  { %v4701_v28 = vpop.f32.mrb[22].mxu0 }
 0x30a   :  { %v1272_v2 = vpop.f32.mrb[23].mxu0 }
 0x30f   :  { %v6043_v46 = vpop.f32.mrb[24].mxu0 }
 0x310   :  { %v6045_v43 = vpop.f32.mrb[25].mxu0 }
 0x311   :  { %v6047_v21 = vpop.f32.mrb[26].mxu0 }
 0x312   :  { %v6049_v49 = vpop.f32.mrb[27].mxu0 }
 0x317   :  { %v6051_v6 = vpop.f32.mrb[28].mxu0 }
 0x318   :  { %v6053_v36 = vpop.f32.mrb[29].mxu0 }
 0x319   :  { %v6055_v51 = vpop.f32.mrb[30].mxu0 }
 0x31a   :  { %v6057_v59 = vpop.f32.mrb[31].mxu0 }
 0x31d   :  { %v4768_v35 = vpop.f32.mrb[0].mxu1 }
 0x31e   :  { %v4998_v34 = vadd.f32 %v4768_v35, %v4696_v38  ;;  %v1858_v9 = vpop.f32.mrb[1].mxu1 }
 0x31f   :  { %v4999_v31 = vadd.f32 %v1858_v9, %v1253_v50  ;;  %v4769_v62 = vpop.f32.mrb[2].mxu1 }
 0x320   :  { %v1945_v52 = vadd.f32 %v4998_v34, %v6062_v60  ;;  %v5000_v61 = vadd.f32 %v4769_v62, %v4697_v33  ;;  %v1861_v44 = vpop.f32.mrb[3].mxu1 }
 0x321   :  { %v1943_v55 = vadd.f32 %v4999_v31, %v6062_v60  ;;  %v5001_v25 = vadd.f32 %v1861_v44, %v1256_v17 }
 0x322   :  { %v1977_v18 = vmul.f32 0.01, %v1945_v52  ;;  %v1946_v53 = vadd.f32 %v5000_v61, %v6062_v60  ;;  %vm1961_vm13 = vcmp.ge.f32.partialorder %v1945_v52, 0.0 }
 0x323   :  { %v1975_v4 = vmul.f32 0.01, %v1943_v55  ;;  %v1944_v58 = vadd.f32 %v5001_v25, %v6062_v60  ;;  %vm1959_vm14 = vcmp.ge.f32.partialorder %v1943_v55, 0.0 }
 0x324   :  { %vm1962_vm15 = vcmp.ge.f32.partialorder %v1946_v53, 0.0  ;;  %v1978_v57 = vmul.f32 0.01, %v1946_v53  ;;  %v1993_v27 = vsel %vm1961_vm13, %v1945_v52, %v1977_v18  ;;  %v6085_v52 = vld [vmem:[#allocation9] sm:$0xff]  }
 0x325   :  { %vm1960_vm1 = vcmp.ge.f32.partialorder %v1944_v58, 0.0  ;;  %v1976_v63 = vmul.f32 0.01, %v1944_v58  ;;  %v4772_v16 = vpop.f32.mrb[4].mxu1  ;;  %v1991_v19 = vsel %vm1959_vm14, %v1943_v55, %v1975_v4  ;;  %4814 = vmatprep.subr.bf16.mxu0 %v6085_v52 }
 0x326   :  { %v5002_v48 = vadd.f32 %v4772_v16, %v4700_v45  ;;  %v1874_v3 = vpop.f32.mrb[5].mxu1  ;;  %v1994_v14 = vsel %vm1962_vm15, %v1946_v53, %v1978_v57 }
 0x327   :  { %v5003_v37 = vadd.f32 %v1874_v3, %v1269_v30  ;;  %v4773_v26 = vpop.f32.mrb[6].mxu1  ;;  %v2016_v32 = vpack.c.bf16 %v1994_v14, %v1993_v27  ;;  %v1992_v47 = vsel %vm1960_vm1, %v1944_v58, %v1976_v63 }
 0x328   :  { %v1949_v10 = vadd.f32 %v5002_v48, %v6062_v60  ;;  %v5004_v56 = vadd.f32 %v4773_v26, %v4701_v28  ;;  %v1877_v42 = vpop.f32.mrb[7].mxu1  ;;  %v2015_v12 = vpack.c.bf16 %v1992_v47, %v1991_v19 }
 0x329   :  { %v1947_v20 = vadd.f32 %v5003_v37, %v6062_v60  ;;  %v5005_v40 = vadd.f32 %v1877_v42, %v1272_v2  ;;  %2033 = vrot.lane.b32.xlu1 %v2016_v32, %s5422_s4 }
 0x32a   :  { %v1981_v54 = vmul.f32 0.01, %v1949_v10  ;;  %v1950_v0 = vadd.f32 %v5004_v56, %v6062_v60  ;;  %2031 = vrot.lane.b32.xlu0 %v2015_v12, %s5422_s4  ;;  %vm1965_vm4 = vcmp.ge.f32.partialorder %v1949_v10, 0.0 }
 0x32b   :  { %v1979_v39 = vmul.f32 0.01, %v1947_v20  ;;  %v1948_v13 = vadd.f32 %v5005_v40, %v6062_v60  ;;  %vm1963_vm6 = vcmp.ge.f32.partialorder %v1947_v20, 0.0 }
 0x32c   :  { %vm1966_vm7 = vcmp.ge.f32.partialorder %v1950_v0, 0.0  ;;  %v1982_v41 = vmul.f32 0.01, %v1950_v0  ;;  %v1997_v38 = vsel %vm1965_vm4, %v1949_v10, %v1981_v54 }
 0x32d   :  { %vm1964_vm8 = vcmp.ge.f32.partialorder %v1948_v13, 0.0  ;;  %v1980_v8 = vmul.f32 0.01, %v1948_v13  ;;  %v4776_v1 = vpop.f32.mrb[8].mxu1  ;;  %v1995_v30 = vsel %vm1963_vm6, %v1947_v20, %v1979_v39 }
 0x32e   :  { %v5006_v5 = vadd.f32 %v4776_v1, %v6043_v46  ;;  %v1890_v11 = vpop.f32.mrb[9].mxu1  ;;  %v1998_v50 = vsel %vm1966_vm7, %v1950_v0, %v1982_v41 }
 0x32f   :  { %v5007_v33 = vadd.f32 %v1890_v11, %v6045_v43  ;;  %v4777_v17 = vpop.f32.mrb[10].mxu1  ;;  %v2018_v45 = vpack.c.bf16 %v1998_v50, %v1997_v38  ;;  %v1996_v28 = vsel %vm1964_vm8, %v1948_v13, %v1980_v8  ;;  %vm2055_vm8 = vcmask 785664  }
 0x330   :  { %v1953_v2 = vadd.f32 %v5006_v5, %v6062_v60  ;;  %v5008_v35 = vadd.f32 %v4777_v17, %v6047_v21  ;;  %v1893_v24 = vpop.f32.mrb[11].mxu1  ;;  %v2017_v7 = vpack.c.bf16 %v1996_v28, %v1995_v30 }
 0x331   :  { %v1951_v34 = vadd.f32 %v5007_v33, %v6062_v60  ;;  %v5009_v46 = vadd.f32 %v1893_v24, %v6049_v49  ;;  %2037 = vrot.lane.b32.xlu1 %v2018_v45, %s5422_s4 }
 0x332   :  { %v1985_v9 = vmul.f32 0.01, %v1953_v2  ;;  %v1954_v43 = vadd.f32 %v5008_v35, %v6062_v60  ;;  %2035 = vrot.lane.b32.xlu0 %v2017_v7, %s5422_s4  ;;  %vm1969_vm9 = vcmp.ge.f32.partialorder %v1953_v2, 0.0 }
 0x333   :  { %v1983_v31 = vmul.f32 0.01, %v1951_v34  ;;  %v1952_v62 = vadd.f32 %v5009_v46, %v6062_v60  ;;  %vm1967_vm13 = vcmp.ge.f32.partialorder %v1951_v34, 0.0 }
 0x334   :  { %vm1970_vm14 = vcmp.ge.f32.partialorder %v1954_v43, 0.0  ;;  %v1986_v21 = vmul.f32 0.01, %v1954_v43  ;;  %v2001_v25 = vsel %vm1969_vm9, %v1953_v2, %v1985_v9 }
 0x335   :  { %vm1968_vm15 = vcmp.ge.f32.partialorder %v1952_v62, 0.0  ;;  %v1984_v61 = vmul.f32 0.01, %v1952_v62  ;;  %v4780_v44 = vpop.f32.mrb[12].mxu1  ;;  %v1999_v57 = vsel %vm1967_vm13, %v1951_v34, %v1983_v31 }
 0x336   :  { %v5010_v49 = vadd.f32 %v4780_v44, %v6051_v6  ;;  %v1906_v55 = vpop.f32.mrb[13].mxu1  ;;  %v2002_v18 = vsel %vm1970_vm14, %v1954_v43, %v1986_v21 }
 0x337   :  { %v5011_v53 = vadd.f32 %v1906_v55, %v6053_v36  ;;  %v4781_v4 = vpop.f32.mrb[14].mxu1  ;;  %v2020_v58 = vpack.c.bf16 %v2002_v18, %v2001_v25  ;;  %v2000_v63 = vsel %vm1968_vm15, %v1952_v62, %v1984_v61 }
 0x338   :  { %v1957_v16 = vadd.f32 %v5010_v49, %v6062_v60  ;;  %v5012_v15 = vadd.f32 %v4781_v4, %v6055_v51  ;;  %v1909_v22 = vpop.f32.mrb[15].mxu1  ;;  %v2019_v48 = vpack.c.bf16 %v2000_v63, %v1999_v57 }
 0x339   :  { %v1955_v3 = vadd.f32 %v5011_v53, %v6062_v60  ;;  %v5013_v27 = vadd.f32 %v1909_v22, %v6057_v59  ;;  %2041 = vrot.lane.b32.xlu1 %v2020_v58, %s5422_s4  ;;  %v5237_v22 = vld [vmem:[#allocation9 + $0x8] sm:$0xff]  }
 0x33a   :  { %v1989_v6 = vmul.f32 0.01, %v1957_v16  ;;  %v1958_v14 = vadd.f32 %v5012_v15, %v6062_v60  ;;  %2039 = vrot.lane.b32.xlu0 %v2019_v48, %s5422_s4  ;;  %vm1973_vm1 = vcmp.ge.f32.partialorder %v1957_v16, 0.0 }
 0x33b   :  { %v1987_v36 = vmul.f32 0.01, %v1955_v3  ;;  %v1956_v37 = vadd.f32 %v5013_v27, %v6062_v60  ;;  %vm1971_vm4 = vcmp.ge.f32.partialorder %v1955_v3, 0.0 }
 0x33c   :  { %vm1974_vm6 = vcmp.ge.f32.partialorder %v1958_v14, 0.0  ;;  %v1990_v51 = vmul.f32 0.01, %v1958_v14  ;;  %v2005_v32 = vsel %vm1973_vm1, %v1957_v16, %v1989_v6 }
 0x33d   :  { %vm1972_vm7 = vcmp.ge.f32.partialorder %v1956_v37, 0.0  ;;  %v1988_v26 = vmul.f32 0.01, %v1956_v37  ;;  %v2003_v59 = vsel %vm1971_vm4, %v1955_v3, %v1987_v36 }
 0x33e   :  { %v2006_v19 = vsel %vm1974_vm6, %v1958_v14, %v1990_v51 }
 0x33f   :  { %v2022_v47 = vpack.c.bf16 %v2006_v19, %v2005_v32  ;;  %v2004_v10 = vsel %vm1972_vm7, %v1956_v37, %v1988_v26  ;;  %vm4102_vm7 = vcmask 1041409  }
 0x340   :  { %v2021_v56 = vpack.c.bf16 %v2004_v10, %v2003_v59 }
 0x341   :  { %2045 = vrot.lane.b32.xlu1 %v2022_v47, %s5422_s4 }
 0x342   :  { %2043 = vrot.lane.b32.xlu0 %v2021_v56, %s5422_s4 }
 0x39b   :  { %v2034_v42 = vpop.permute.xlu1 %2033 }
 0x39c   :  { %2057 = vst.msk [vmem:[#allocation2 + $0x8] sm:$0xff] %vm2055_vm8, %v2034_v42  ;;  %v2032_v60 = vpop.permute.xlu0 %2031 }
 0x39d   :  { %2056 = vst.msk [vmem:[#allocation2] sm:$0xff] %vm2055_vm8, %v2032_v60 }
 0x3a3   :  { %v2038_v12 = vpop.permute.xlu1 %2037  ;;  %v2065_v20 = vld [vmem:[#allocation2 + $0x8] sm:$0xff] }
 0x3a4   :  { %2059 = vst.msk [vmem:[#allocation2 + $0x18] sm:$0xff] %vm2055_vm8, %v2038_v12  ;;  %v2036_v40 = vpop.permute.xlu0 %2035  ;;  %v2064_v54 = vld [vmem:[#allocation2] sm:$0xff]  ;;  %v2129_v0 = vshrl.u32 %v2065_v20, 16  ;;  %v2132_v41 = vshll.u32 %v2065_v20, 16 }
 0x3a5   :  { %2058 = vst.msk [vmem:[#allocation2 + $0x10] sm:$0xff] %vm2055_vm8, %v2036_v40  ;;  %v2122_v39 = vshrl.u32 %v2064_v54, 16  ;;  %v2125_v1 = vshll.u32 %v2064_v54, 16  ;;  %v5238_v40 = vld [vmem:[#allocation9 + $0x10] sm:$0xff]  }
 0x3a6   :  { %v2131_v13 = vrot.slane %v2129_v0, 7 }
 0x3a7   :  { %v2124_v8 = vrot.slane %v2122_v39, 7 }
 0x3a8   :  { %v2134_v29 = vor.u32 %v2132_v41, %v2131_v13  ;;  %v2202_v38 = vsel %vm5550_vm2, %v2131_v13, 0 }
 0x3a9   :  { %v2127_v5 = vor.u32 %v2125_v1, %v2124_v8  ;;  %v6106_v11 = vsel %vm5550_vm2, %v2124_v8, 0  ;;  %v2229_v24 = vshll.u32 %v2202_v38, 16  ;;  %v2623_v58 = vrot.slane %v2202_v38, 1 }
 0x3aa   :  { %v6112_v50 = vsel %vm5550_vm2, 0, %v2134_v29  ;;  %v2217_v35 = vshll.u32 %v6106_v11, 16 }
 0x3ab   :  { %v2042_v33 = vpop.permute.xlu1 %2041  ;;  %v6116_v17 = vsel %vm5550_vm2, 0, %v2127_v5  ;;  %v2224_v45 = vshll.u32 %v6112_v50, 16  ;;  %v2067_v30 = vld [vmem:[#allocation2 + $0x18] sm:$0xff]  ;;  %v2222_v9 = vshrl.u32 %v6112_v50, 16  ;;  %v2622_v44 = vrot.slane %v6112_v50, 1 }
 0x3ac   :  { %2061 = vst.msk [vmem:[#allocation2 + $0x28] sm:$0xff] %vm2055_vm8, %v2042_v33  ;;  %v2040_v28 = vpop.permute.xlu0 %2039  ;;  %v2212_v2 = vshll.u32 %v6116_v17, 16  ;;  %v2066_v7 = vld [vmem:[#allocation2 + $0x10] sm:$0xff]  ;;  %v2143_v34 = vshrl.u32 %v2067_v30, 16  ;;  %v2210_v46 = vshrl.u32 %v6116_v17, 16  ;;  %v2146_v61 = vshll.u32 %v2067_v30, 16 }
 0x3ad   :  { %2060 = vst.msk [vmem:[#allocation2 + $0x20] sm:$0xff] %vm2055_vm8, %v2040_v28  ;;  %v2226_v43 = vrot.slane %v2224_v45, 1  ;;  %v2136_v31 = vshrl.u32 %v2066_v7, 16  ;;  %v2139_v25 = vshll.u32 %v2066_v7, 16  ;;  %v2219_v53 = vrot.slane %v2217_v35, 1  ;;  %v5239_v28 = vld [vmem:[#allocation9 + $0x18] sm:$0xff]  }
 0x3ae   :  { %v2214_v62 = vrot.slane %v2212_v2, 1  ;;  %v2145_v21 = vrot.slane %v2143_v34, 7  ;;  %v2231_v57 = vrot.slane %v2229_v24, 1  ;;  %v6138_v27 = vsel %vm602_vm5, %v2622_v44, %v2623_v58 }
 0x3af   :  { %v2227_v49 = vor.u32 %v2226_v43, %v2222_v9  ;;  %v2138_v55 = vrot.slane %v2136_v31, 7 }
 0x3b0   :  { %v2215_v18 = vor.u32 %v2214_v62, %v2210_v46  ;;  %v2148_v4 = vor.u32 %v2146_v61, %v2145_v21  ;;  %v2204_v3 = vsel %vm5550_vm2, %v2145_v21, 0 }
 0x3b1   :  { %v2141_v63 = vor.u32 %v2139_v25, %v2138_v55  ;;  %v6128_v16 = vsel %vm5550_vm2, %v2138_v55, 0  ;;  %v2232_v14 = vsel %vm230_vm3, %v2227_v49, %v2231_v57  ;;  %v2253_v42 = vshll.u32 %v2204_v3, 16 }
 0x3b2   :  { %v2220_v15 = vsel %vm230_vm3, %v2215_v18, %v2219_v53  ;;  %v6133_v48 = vsel %vm5550_vm2, 0, %v2148_v4  ;;  %v2241_v19 = vshll.u32 %v6128_v16, 16  ;;  %v2629_v5 = vrot.slane %v2204_v3, 1  ;;  %v5240_v53 = vld [vmem:[#allocation9 + $0x20] sm:$0xff]  }
 0x3b3   :  { %4798 = vmatprep.mubr.bf16.mxu0 %v2220_v15  ;;  %v2046_v6 = vpop.permute.xlu1 %2045  ;;  %v6143_v36 = vsel %vm5550_vm2, 0, %v2141_v63  ;;  %v2248_v37 = vshll.u32 %v6133_v48, 16  ;;  %v2069_v51 = vld [vmem:[#allocation2 + $0x28] sm:$0xff]  ;;  %v2246_v10 = vshrl.u32 %v6133_v48, 16  ;;  %v2628_v8 = vrot.slane %v6133_v48, 1 }
 0x3b4   :  { %2063 = vst.msk [vmem:[#allocation2 + $0x38] sm:$0xff] %vm2055_vm8, %v2046_v6  ;;  %4799 = vmatmul.mubr.bf16.vlgmr.msra.gmra.mrb[32].mxu0 %v2232_v14  ;;  %v2044_v26 = vpop.permute.xlu0 %2043  ;;  %v2236_v32 = vshll.u32 %v6143_v36, 16  ;;  %v2068_v47 = vld [vmem:[#allocation2 + $0x20] sm:$0xff]  ;;  %v2157_v59 = vshrl.u32 %v2069_v51, 16  ;;  %v2234_v12 = vshrl.u32 %v6143_v36, 16  ;;  %v2160_v0 = vshll.u32 %v2069_v51, 16 }
 0x3b5   :  { %4815 = vmatpush3.bf16.msra.mxu0 %v6085_v52  ;;  %2062 = vst.msk [vmem:[#allocation2 + $0x30] sm:$0xff] %vm2055_vm8, %v2044_v26  ;;  %v2250_v56 = vrot.slane %v2248_v37, 1  ;;  %v2150_v60 = vshrl.u32 %v2068_v47, 16  ;;  %v2153_v41 = vshll.u32 %v2068_v47, 16  ;;  %v2243_v1 = vrot.slane %v2241_v19, 1 }
 0x3b6   :  { %4816 = vmatprep.subr.bf16.mxu0 %v5237_v22  ;;  %v2238_v20 = vrot.slane %v2236_v32, 1  ;;  %v2159_v54 = vrot.slane %v2157_v59, 7  ;;  %v2255_v38 = vrot.slane %v2253_v42, 1  ;;  %v6166_v24 = vsel %vm602_vm5, %v2628_v8, %v2629_v5  ;;  %v5241_v59 = vld [vmem:[#allocation9 + $0x28] sm:$0xff]  }
 0x3b7   :  { %v2251_v39 = vor.u32 %v2250_v56, %v2246_v10  ;;  %v2152_v13 = vrot.slane %v2150_v60, 7 }
 0x3b8   :  { %v2239_v52 = vor.u32 %v2238_v20, %v2234_v12  ;;  %v2162_v29 = vor.u32 %v2160_v0, %v2159_v54  ;;  %v2206_v35 = vsel %vm5550_vm2, %v2159_v54, 0 }
 0x3b9   :  { %4817 = vmatpush3.bf16.msra.mxu0 %v5237_v22  ;;  %v2155_v33 = vor.u32 %v2153_v41, %v2152_v13  ;;  %v6156_v45 = vsel %vm5550_vm2, %v2152_v13, 0  ;;  %v2256_v7 = vsel %vm230_vm3, %v2251_v39, %v2255_v38  ;;  %v2277_v49 = vshll.u32 %v2206_v35, 16 }
 0x3ba   :  { %v2244_v30 = vsel %vm230_vm3, %v2239_v52, %v2243_v1  ;;  %4818 = vmatprep.subr.bf16.mxu0 %v5238_v40  ;;  %v6161_v2 = vsel %vm5550_vm2, 0, %v2162_v29  ;;  %v2265_v31 = vshll.u32 %v6156_v45, 16  ;;  %v2635_v37 = vrot.slane %v2206_v35, 1  ;;  %v5242_v52 = vld [vmem:[#allocation9 + $0x30] sm:$0xff]  }
 0x3bb   :  { %4802 = vmatprep.mubr.bf16.mxu0 %v2244_v30  ;;  %v6171_v34 = vsel %vm5550_vm2, 0, %v2155_v33  ;;  %v2272_v46 = vshll.u32 %v6161_v2, 16  ;;  %v2071_v9 = vld [vmem:[#allocation2 + $0x38] sm:$0xff]  ;;  %v2270_v61 = vshrl.u32 %v6161_v2, 16  ;;  %v2634_v22 = vrot.slane %v6161_v2, 1 }
 0x3bc   :  { %4803 = vmatmul.mubr.bf16.gmra.mrb[36].mxu0 %v2256_v7  ;;  %v2260_v43 = vshll.u32 %v6171_v34, 16  ;;  %v2070_v62 = vld [vmem:[#allocation2 + $0x30] sm:$0xff]  ;;  %v2171_v21 = vshrl.u32 %v2071_v9, 16  ;;  %v2258_v25 = vshrl.u32 %v6171_v34, 16  ;;  %v2174_v58 = vshll.u32 %v2071_v9, 16  ;;  %v5246_v9 = vld [vmem:[#allocation9 + $0x90] sm:$0xff]  }
 0x3bd   :  { %4819 = vmatpush3.bf16.msra.mxu0 %v5238_v40  ;;  %v2274_v44 = vrot.slane %v2272_v46, 1  ;;  %v2164_v55 = vshrl.u32 %v2070_v62, 16  ;;  %v2167_v15 = vshll.u32 %v2070_v62, 16  ;;  %v2267_v6 = vrot.slane %v2265_v31, 1  ;;  %v5244_v7 = vld [vmem:[#allocation9 + $0x80] sm:$0xff]   ;;  %v5245_v46 = vld [vmem:[#allocation9 + $0x88] sm:$0xff]  }
 0x3be   :  { %4820 = vmatprep.subr.bf16.mxu0 %v5239_v28  ;;  %v2262_v18 = vrot.slane %v2260_v43, 1  ;;  %v2173_v4 = vrot.slane %v2171_v21, 7  ;;  %v2279_v51 = vrot.slane %v2277_v49, 1  ;;  %v6191_v56 = vsel %vm602_vm5, %v2634_v22, %v2635_v37  ;;  %v5247_v43 = vld [vmem:[#allocation9 + $0x98] sm:$0xff]   ;;  %v5248_v31 = vld [vmem:[#allocation9 + $0xa0] sm:$0xff]   ;;  %v5249_v62 = vld [vmem:[#allocation9 + $0xa8] sm:$0xff]  }
 0x3bf   :  { %v2275_v57 = vor.u32 %v2274_v44, %v2270_v61  ;;  %v2166_v63 = vrot.slane %v2164_v55, 7  ;;  %v2619_v21 = vrot.slane %v6116_v17, 1  ;;  %v5251_v61 = vld [vmem:[#allocation9 + $0xb8] sm:$0xff]   ;;  %v2626_v49 = vrot.slane %v6128_v16, 1 }
 0x3c0   :  { %v2263_v3 = vor.u32 %v2262_v18, %v2258_v25  ;;  %v2176_v14 = vor.u32 %v2174_v58, %v2173_v4  ;;  %v2208_v19 = vsel %vm5550_vm2, %v2173_v4, 0  ;;  %v2632_v55 = vrot.slane %v6156_v45, 1  ;;  %v5254_v45 = vld [vmem:[#allocation11 + $0x30] sm:$0xff]  }
 0x3c1   :  { %4821 = vmatpush3.bf16.msra.mxu0 %v5239_v28  ;;  %v2169_v26 = vor.u32 %v2167_v15, %v2166_v63  ;;  %v6181_v32 = vsel %vm5550_vm2, %v2166_v63, 0  ;;  %v2280_v42 = vsel %vm230_vm3, %v2275_v57, %v2279_v51  ;;  %v2301_v54 = vshll.u32 %v2208_v19, 16  ;;  %v5243_v28 = vld [vmem:[#allocation9 + $0x38] sm:$0xff]  }
 0x3c2   :  { %v2268_v47 = vsel %vm230_vm3, %v2263_v3, %v2267_v6  ;;  %4822 = vmatprep.subr.bf16.mxu0 %v5240_v53  ;;  %v6188_v10 = vsel %vm5550_vm2, 0, %v2176_v14  ;;  %v2289_v40 = vshll.u32 %v6181_v32, 16  ;;  %v2641_v41 = vrot.slane %v2208_v19, 1 }
 0x3c3   :  { %4806 = vmatprep.mubr.bf16.mxu0 %v2268_v47  ;;  %v6196_v60 = vsel %vm5550_vm2, 0, %v2169_v26  ;;  %v2296_v12 = vshll.u32 %v6188_v10, 16  ;;  %v2294_v0 = vshrl.u32 %v6188_v10, 16  ;;  %v2640_v13 = vrot.slane %v6188_v10, 1 }
 0x3c4   :  { %4807 = vmatmul.mubr.bf16.gmra.mrb[40].mxu0 %v2280_v42  ;;  %v2284_v20 = vshll.u32 %v6196_v60, 16  ;;  %v2282_v23 = vshrl.u32 %v6196_v60, 16  ;;  %v2291_v38 = vrot.slane %v2289_v40, 1  ;;  %v2303_v33 = vrot.slane %v2301_v54, 1  ;;  %v5255_v42 = vld [vmem:[#allocation11 + $0x38] sm:$0xff]  }
 0x3c5   :  { %4823 = vmatpush3.bf16.msra.mxu0 %v5240_v53  ;;  %v2298_v39 = vrot.slane %v2296_v12, 1  ;;  %v6205_v29 = vsel %vm602_vm5, %v2640_v13, %v2641_v41  ;;  %v2637_v18 = vrot.slane %v6196_v60, 1 }
 0x3c6   :  { %4824 = vmatprep.subr.bf16.mxu0 %v5241_v59  ;;  %v2286_v8 = vrot.slane %v2284_v20, 1 }
 0x3c7   :  { %v2299_v1 = vor.u32 %v2298_v39, %v2294_v0 }
 0x3c8   :  { %v2287_v5 = vor.u32 %v2286_v8, %v2282_v23 }
 0x3c9   :  { %4825 = vmatpush3.bf16.msra.mxu0 %v5241_v59  ;;  %v2304_v35 = vsel %vm230_vm3, %v2299_v1, %v2303_v33 }
 0x3ca   :  { %v2292_v30 = vsel %vm230_vm3, %v2287_v5, %v2291_v38  ;;  %4826 = vmatprep.subr.bf16.mxu0 %v5242_v52 }
 0x3cb   :  { %4810 = vmatprep.mubr.bf16.mxu0 %v2292_v30 }
 0x3cc   :  { %4811 = vmatmul.mubr.bf16.gmra.mrb[44].mxu0 %v2304_v35 }
 0x3cd   :  { %4827 = vmatpush3.bf16.msra.mxu0 %v5242_v52  ;;  %4830 = vmatprep.mubr.bf16.mxu0 %v6116_v17 }
 0x3ce   :  { %4828 = vmatprep.subr.bf16.mxu0 %v5243_v28 }
 0x3d1   :  { %4829 = vmatpush3.bf16.msra.mxu0 %v5243_v28 }
 0x3d2   :  { %4846 = vmatprep.subr.bf16.mxu0 %v5244_v7 }
 0x3d4   :  { %4831 = vmatmul.mubr.bf16.vlgmr.msra.gmra.mrb[32].mxu0 %v6112_v50  ;;  %v5250_v50 = vld [vmem:[#allocation9 + $0xb0] sm:$0xff]  }
 0x3d5   :  { %4847 = vmatpush3.bf16.msra.mxu0 %v5244_v7  ;;  %4834 = vmatprep.mubr.bf16.mxu0 %v6143_v36 }
 0x3d6   :  { %4848 = vmatprep.subr.bf16.mxu0 %v5245_v46 }
 0x3d9   :  { %4849 = vmatpush3.bf16.msra.mxu0 %v5245_v46 }
 0x3da   :  { %4850 = vmatprep.subr.bf16.mxu0 %v5246_v9 }
 0x3dc   :  { %4835 = vmatmul.mubr.bf16.gmra.mrb[36].mxu0 %v6133_v48  ;;  %v2620_v48 = vrot.slane %v6106_v11, 1  ;;  %v2631_v11 = vrot.slane %v6171_v34, 1 }
 0x3dd   :  { %4851 = vmatpush3.bf16.msra.mxu0 %v5246_v9  ;;  %4838 = vmatprep.mubr.bf16.mxu0 %v6171_v34  ;;  %v5253_v34 = vld [vmem:[#allocation11 + $0x28] sm:$0xff]  }
 0x3de   :  { %4852 = vmatprep.subr.bf16.mxu0 %v5247_v43  ;;  %v2621_v44 = vsel %vm602_vm5, %v2619_v21, %v2620_v48  ;;  %v2633_v25 = vsel %vm602_vm5, %v2631_v11, %v2632_v55 }
 0x3e1   :  { %4853 = vmatpush3.bf16.msra.mxu0 %v5247_v43 }
 0x3e2   :  { %4854 = vmatprep.subr.bf16.mxu0 %v5248_v31 }
 0x3e4   :  { %4839 = vmatmul.mubr.bf16.gmra.mrb[40].mxu0 %v6161_v2  ;;  %v2625_v2 = vrot.slane %v6143_v36, 1  ;;  %v2638_v36 = vrot.slane %v6181_v32, 1 }
 0x3e5   :  { %4855 = vmatpush3.bf16.msra.mxu0 %v5248_v31  ;;  %4842 = vmatprep.mubr.bf16.mxu0 %v6196_v60  ;;  %v6247_v31 = vld [vmem:[#allocation11] sm:$0xff]  }
 0x3e6   :  { %4856 = vmatprep.subr.bf16.mxu0 %v5249_v62  ;;  %v2627_v17 = vsel %vm602_vm5, %v2625_v2, %v2626_v49  ;;  %v2639_v16 = vsel %vm602_vm5, %v2637_v18, %v2638_v36 }
 0x3e9   :  { %4857 = vmatpush3.bf16.msra.mxu0 %v5249_v62 }
 0x3ea   :  { %4858 = vmatprep.subr.bf16.mxu0 %v5250_v50 }
 0x3ec   :  { %4843 = vmatmul.mubr.bf16.gmra.mrb[44].mxu0 %v6188_v10 }
 0x3ed   :  { %4859 = vmatpush3.bf16.msra.mxu0 %v5250_v50  ;;  %4862 = vmatprep.mubr.bf16.mxu0 %v2621_v44 }
 0x3ee   :  { %4860 = vmatprep.subr.bf16.mxu0 %v5251_v61 }
 0x3f1   :  { %4861 = vmatpush3.bf16.msra.mxu0 %v5251_v61 }
 0x3f4   :  { %4863 = vmatmul.mubr.bf16.vlgmr.msra.gmra.mrb[32].mxu0 %v6138_v27  ;;  %v5252_v27 = vld [vmem:[#allocation11 + $0x20] sm:$0xff]  }
 0x3f5   :  { %4866 = vmatprep.mubr.bf16.mxu0 %v2627_v17  ;;  %4878 = vmatprep.subr.bf16.mxu1 %v5252_v27 }
 0x3f6   :  { %4879 = vmatpush3.bf16.msra.mxu1 %v5252_v27 }
 0x3f7   :  { %4880 = vmatprep.subr.bf16.mxu1 %v5253_v34 }
 0x3fa   :  { %4881 = vmatpush3.bf16.msra.mxu1 %v5253_v34 }
 0x3fb   :  { %4882 = vmatprep.subr.bf16.mxu1 %v5254_v45 }
 0x3fc   :  { %4867 = vmatmul.mubr.bf16.gmra.mrb[36].mxu0 %v6166_v24  ;;  %v6236_v24 = vld [vmem:[%s6673_s6] ss:$0 sm:$0xff] }
 0x3fd   :  { %4870 = vmatprep.mubr.bf16.mxu0 %v2633_v25 }
 0x3fe   :  { %4883 = vmatpush3.bf16.msra.mxu1 %v5254_v45 }
 0x3ff   :  { %4884 = vmatprep.subr.bf16.mxu1 %v5255_v42 }
 0x402   :  { %4885 = vmatpush3.bf16.msra.mxu1 %v5255_v42 }
 0x403   :  { %4902 = vmatprep.subr.bf16.mxu1 %v6247_v31 }
 0x404   :  { %4871 = vmatmul.mubr.bf16.gmra.mrb[40].mxu0 %v6191_v56 }
 0x405   :  { %4874 = vmatprep.mubr.bf16.mxu0 %v2639_v16 }
 0x40c   :  { %4875 = vmatmul.mubr.bf16.gmra.mrb[44].mxu0 %v6205_v29 }
 0x4c7   :  { %v4864_v53 = vpop.f32.mrb[32].mxu0 }
 0x4c8   :  { %v2820_v4 = vadd.f32 %v4864_v53, %v6236_v24  ;;  %v2733_v58 = vpop.f32.mrb[33].mxu0 }
 0x4c9   :  { %v2818_v57 = vadd.f32 %v6236_v24, %v2733_v58  ;;  %v4865_v63 = vpop.f32.mrb[34].mxu0 }
 0x4ca   :  { %v2852_v15 = vmul.f32 0.01, %v2820_v4  ;;  %v2821_v22 = vadd.f32 %v4865_v63, %v6236_v24  ;;  %v2736_v3 = vpop.f32.mrb[35].mxu0  ;;  %vm2836_vm2 = vcmp.ge.f32.partialorder %v2820_v4, 0.0 }
 0x4cb   :  { %v2850_v6 = vmul.f32 0.01, %v2818_v57  ;;  %v2819_v14 = vadd.f32 %v6236_v24, %v2736_v3  ;;  %vm2834_vm9 = vcmp.ge.f32.partialorder %v2818_v57, 0.0 }
 0x4cc   :  { %vm2837_vm13 = vcmp.ge.f32.partialorder %v2821_v22, 0.0  ;;  %v2853_v37 = vmul.f32 0.01, %v2821_v22  ;;  %v2868_v26 = vsel %vm2836_vm2, %v2820_v4, %v2852_v15 }
 0x4cd   :  { %vm2835_vm14 = vcmp.ge.f32.partialorder %v2819_v14, 0.0  ;;  %v2851_v51 = vmul.f32 0.01, %v2819_v14  ;;  %v2866_v19 = vsel %vm2834_vm9, %v2818_v57, %v2850_v6 }
 0x4ce   :  { %v2869_v32 = vsel %vm2837_vm13, %v2821_v22, %v2853_v37  ;;  %vm4104_vm13 = vcmask 1042434  }
 0x4cf   :  { %v4045_v47 = vmax.f32 %v2868_v26, %v2869_v32  ;;  %v2867_v59 = vsel %vm2835_vm14, %v2819_v14, %v2851_v51  ;;  %v4868_v10 = vpop.f32.mrb[36].mxu0  ;;  %v2883_v56 = vpack.c.bf16 %v2869_v32, %v2868_v26 }
 0x4d0   :  { %v4038_v60 = vmax.f32 %v2866_v19, %v2867_v59  ;;  %v2824_v12 = vadd.f32 %v4868_v10, %v6236_v24  ;;  %v2749_v20 = vpop.f32.mrb[37].mxu0  ;;  %v2882_v40 = vpack.c.bf16 %v2867_v59, %v2866_v19 }
 0x4d1   :  { %v4046_v54 = vrot.slane %v4045_v47, 4  ;;  %v2822_v0 = vadd.f32 %v6236_v24, %v2749_v20  ;;  %v4869_v39 = vpop.f32.mrb[38].mxu0  ;;  %v2940_v13 = vrot.slane %v2883_v56, 7 }
 0x4d2   :  { %v4039_v41 = vrot.slane %v4038_v60, 4  ;;  %vm2840_vm15 = vcmp.ge.f32.partialorder %v2824_v12, 0.0  ;;  %v2856_v23 = vmul.f32 0.01, %v2824_v12  ;;  %v2825_v8 = vadd.f32 %v4869_v39, %v6236_v24  ;;  %v2752_v52 = vpop.f32.mrb[39].mxu0 }
 0x4d3   :  { %v4047_v1 = vmax.f32 %v4045_v47, %v4046_v54  ;;  %vm2838_vm1 = vcmp.ge.f32.partialorder %v2822_v0, 0.0  ;;  %v2854_v29 = vmul.f32 0.01, %v2822_v0  ;;  %v2823_v5 = vadd.f32 %v6236_v24, %v2752_v52  ;;  %2949 = vrot.lane.b32.xlu1 %v2940_v13, %s5421_s2 }
 0x4d4   :  { %v4040_v38 = vmax.f32 %v4038_v60, %v4039_v41  ;;  %vm2841_vm4 = vcmp.ge.f32.partialorder %v2825_v8, 0.0  ;;  %v2857_v33 = vmul.f32 0.01, %v2825_v8  ;;  %v2872_v28 = vsel %vm2840_vm15, %v2824_v12, %v2856_v23 }
 0x4d5   :  { %v4048_v30 = vrot.slane %v4047_v1, 2  ;;  %vm2839_vm6 = vcmp.ge.f32.partialorder %v2823_v5, 0.0  ;;  %v2855_v35 = vmul.f32 0.01, %v2823_v5  ;;  %v2870_v46 = vsel %vm2838_vm1, %v2822_v0, %v2854_v29 }
 0x4d6   :  { %v4041_v7 = vrot.slane %v4040_v38, 2  ;;  %v2873_v9 = vsel %vm2841_vm4, %v2825_v8, %v2857_v33  ;;  %v2939_v43 = vrot.slane %v2882_v40, 7  ;;  %vm4106_vm1 = vcmask 1043459  }
 0x4d7   :  { %v4049_v62 = vmax.f32 %v4047_v1, %v4048_v30  ;;  %v4059_v50 = vmax.f32 %v2872_v28, %v2873_v9  ;;  %v2871_v21 = vsel %vm2839_vm6, %v2823_v5, %v2855_v35  ;;  %v4872_v48 = vpop.f32.mrb[40].mxu0  ;;  %v2885_v61 = vpack.c.bf16 %v2873_v9, %v2872_v28 }
 0x4d8   :  { %v4042_v44 = vmax.f32 %v4040_v38, %v4041_v7  ;;  %v4052_v2 = vmax.f32 %v2870_v46, %v2871_v21  ;;  %2947 = vrot.lane.b32.xlu0 %v2939_v43, %s5421_s2  ;;  %v2828_v49 = vadd.f32 %v4872_v48, %v6236_v24  ;;  %v2765_v17 = vpop.f32.mrb[41].mxu0  ;;  %v2884_v11 = vpack.c.bf16 %v2871_v21, %v2870_v46 }
 0x4d9   :  { %v4050_v55 = vrot.slane %v4049_v62, 1  ;;  %v4060_v25 = vrot.slane %v4059_v50, 4  ;;  %v2826_v18 = vadd.f32 %v6236_v24, %v2765_v17  ;;  %v4873_v36 = vpop.f32.mrb[42].mxu0  ;;  %v2942_v16 = vrot.slane %v2885_v61, 7 }
 0x4da   :  { %v4043_v27 = vrot.slane %v4042_v44, 1  ;;  %v4053_v34 = vrot.slane %v4052_v2, 4  ;;  %v2768_v45 = vpop.f32.mrb[43].mxu0  ;;  %vm2844_vm2 = vcmp.ge.f32.partialorder %v2828_v49, 0.0  ;;  %v2860_v58 = vmul.f32 0.01, %v2828_v49 }
 0x4db   :  { %v4051_v53 = vmax.f32 %v4049_v62, %v4050_v55  ;;  %v4061_v4 = vmax.f32 %v4059_v50, %v4060_v25  ;;  %2953 = vrot.lane.b32.xlu1 %v2942_v16, %s5421_s2  ;;  %v2858_v15 = vmul.f32 0.01, %v2826_v18  ;;  %v2829_v22 = vadd.f32 %v4873_v36, %v6236_v24 }
 0x4dc   :  { %v4044_v57 = vmax.f32 %v4042_v44, %v4043_v27  ;;  %v4054_v63 = vmax.f32 %v4052_v2, %v4053_v34  ;;  %vm2842_vm9 = vcmp.ge.f32.partialorder %v2826_v18, 0.0  ;;  %v2827_v6 = vadd.f32 %v6236_v24, %v2768_v45 }
 0x4dd   :  { %v4062_v3 = vrot.slane %v4061_v4, 2  ;;  %v2941_v14 = vrot.slane %v2884_v11, 7  ;;  %vm2845_vm14 = vcmp.ge.f32.partialorder %v2829_v22, 0.0  ;;  %v2861_v26 = vmul.f32 0.01, %v2829_v22 }
 0x4de   :  { %v4103_v37 = vsel %vm4102_vm7, %v4051_v53, %v4044_v57  ;;  %v4055_v51 = vrot.slane %v4054_v63, 2  ;;  %v2876_v19 = vsel %vm2844_vm2, %v2828_v49, %v2860_v58  ;;  %vm2843_vm15 = vcmp.ge.f32.partialorder %v2827_v6, 0.0 }
 0x4df   :  { %v4063_v32 = vmax.f32 %v4061_v4, %v4062_v3  ;;  %v2859_v47 = vmul.f32 0.01, %v2827_v6  ;;  %2951 = vrot.lane.b32.xlu0 %v2941_v14, %s5421_s2  ;;  %v4876_v59 = vpop.f32.mrb[44].mxu0  ;;  %v2874_v56 = vsel %vm2842_vm9, %v2826_v18, %v2858_v15  ;;  %v2877_v42 = vsel %vm2845_vm14, %v2829_v22, %v2861_v26 }
 0x4e0   :  { %v4056_v10 = vmax.f32 %v4054_v63, %v4055_v51  ;;  %v2832_v60 = vadd.f32 %v4876_v59, %v6236_v24  ;;  %v2781_v12 = vpop.f32.mrb[45].mxu0  ;;  %v4073_v40 = vmax.f32 %v2876_v19, %v2877_v42  ;;  %v2887_v46 = vpack.c.bf16 %v2877_v42, %v2876_v19 }
 0x4e1   :  { %v4064_v20 = vrot.slane %v4063_v32, 1  ;;  %v2875_v54 = vsel %vm2843_vm15, %v2827_v6, %v2859_v47  ;;  %v2830_v0 = vadd.f32 %v6236_v24, %v2781_v12  ;;  %v4877_v39 = vpop.f32.mrb[46].mxu0  ;;  %vm4108_vm14 = vcmask 1044484  }
 0x4e2   :  { %v4057_v13 = vrot.slane %v4056_v10, 1  ;;  %v4066_v41 = vmax.f32 %v2874_v56, %v2875_v54  ;;  %vm2848_vm4 = vcmp.ge.f32.partialorder %v2832_v60, 0.0  ;;  %v2864_v23 = vmul.f32 0.01, %v2832_v60  ;;  %v2784_v8 = vpop.f32.mrb[47].mxu0 }
 0x4e3   :  { %v4065_v52 = vmax.f32 %v4063_v32, %v4064_v20  ;;  %v4074_v1 = vrot.slane %v4073_v40, 4  ;;  %vm2846_vm6 = vcmp.ge.f32.partialorder %v2830_v0, 0.0  ;;  %v2862_v29 = vmul.f32 0.01, %v2830_v0 }
 0x4e4   :  { %v4058_v5 = vmax.f32 %v4056_v10, %v4057_v13  ;;  %v4067_v38 = vrot.slane %v4066_v41, 4  ;;  %v2880_v33 = vsel %vm2848_vm4, %v2832_v60, %v2864_v23  ;;  %v2833_v30 = vadd.f32 %v4877_v39, %v6236_v24 }
 0x4e5   :  { %v4075_v28 = vmax.f32 %v4073_v40, %v4074_v1  ;;  %v2878_v35 = vsel %vm2846_vm6, %v2830_v0, %v2862_v29  ;;  %v2831_v7 = vadd.f32 %v6236_v24, %v2784_v8  ;;  %v2886_v62 = vpack.c.bf16 %v2875_v54, %v2874_v56 }
 0x4e6   :  { %v4068_v9 = vmax.f32 %v4066_v41, %v4067_v38  ;;  %vm2849_vm2 = vcmp.ge.f32.partialorder %v2833_v30, 0.0  ;;  %v2865_v43 = vmul.f32 0.01, %v2833_v30  ;;  %v2944_v48 = vrot.slane %v2887_v46, 7 }
 0x4e7   :  { %v4076_v50 = vrot.slane %v4075_v28, 2  ;;  %vm2847_vm9 = vcmp.ge.f32.partialorder %v2831_v7, 0.0  ;;  %v2863_v21 = vmul.f32 0.01, %v2831_v7  ;;  %v2943_v2 = vrot.slane %v2886_v62, 7 }
 0x4e8   :  { %v4069_v61 = vrot.slane %v4068_v9, 2  ;;  %v2881_v44 = vsel %vm2849_vm2, %v2833_v30, %v2865_v43  ;;  %v4105_v49 = vsel %vm4104_vm13, %v4058_v5, %v4103_v37  ;;  %2957 = vrot.lane.b32.xlu1 %v2944_v48, %s5421_s2  ;;  %vm4110_vm15 = vcmask 1045509  }
 0x4e9   :  { %v4077_v17 = vmax.f32 %v4075_v28, %v4076_v50  ;;  %v4087_v11 = vmax.f32 %v2880_v33, %v2881_v44  ;;  %v2879_v55 = vsel %vm2847_vm9, %v2831_v7, %v2863_v21  ;;  %v2889_v24 = vpack.c.bf16 %v2881_v44, %v2880_v33  ;;  %2955 = vrot.lane.b32.xlu0 %v2943_v2, %s5421_s2 }
 0x4ea   :  { %v4070_v25 = vmax.f32 %v4068_v9, %v4069_v61  ;;  %v4080_v18 = vmax.f32 %v2878_v35, %v2879_v55  ;;  %v2888_v36 = vpack.c.bf16 %v2879_v55, %v2878_v35  ;;  %v4107_v16 = vsel %vm4106_vm1, %v4065_v52, %v4105_v49 }
 0x4eb   :  { %v4078_v27 = vrot.slane %v4077_v17, 1  ;;  %v4088_v34 = vrot.slane %v4087_v11, 4  ;;  %v2946_v45 = vrot.slane %v2889_v24, 7  ;;  %vm4112_vm4 = vcmask 1046534  }
 0x4ec   :  { %v4071_v53 = vrot.slane %v4070_v25, 1  ;;  %v4081_v4 = vrot.slane %v4080_v18, 4  ;;  %v2945_v58 = vrot.slane %v2888_v36, 7  ;;  %vm4114_vm6 = vcmask 1047559  }
 0x4ed   :  { %v4089_v57 = vmax.f32 %v4087_v11, %v4088_v34  ;;  %2961 = vrot.lane.b32.xlu1 %v2946_v45, %s5421_s2  ;;  %v4079_v22 = vmax.f32 %v4077_v17, %v4078_v27 }
 0x4ee   :  { %v4072_v63 = vmax.f32 %v4070_v25, %v4071_v53  ;;  %v4082_v15 = vmax.f32 %v4080_v18, %v4081_v4  ;;  %2959 = vrot.lane.b32.xlu0 %v2945_v58, %s5421_s2 }
 0x4ef   :  { %v4090_v3 = vrot.slane %v4089_v57, 2 }
 0x4f0   :  { %v4083_v6 = vrot.slane %v4082_v15, 2  ;;  %v4109_v14 = vsel %vm4108_vm14, %v4072_v63, %v4107_v16 }
 0x4f1   :  { %v4091_v37 = vmax.f32 %v4089_v57, %v4090_v3  ;;  %v4111_v51 = vsel %vm4110_vm15, %v4079_v22, %v4109_v14 }
 0x4f2   :  { %v4084_v26 = vmax.f32 %v4082_v15, %v4083_v6 }
 0x4f3   :  { %v4092_v32 = vrot.slane %v4091_v37, 1 }
 0x4f4   :  { %v4085_v19 = vrot.slane %v4084_v26, 1 }
 0x4f5   :  { %v4093_v59 = vmax.f32 %v4091_v37, %v4092_v32 }
 0x4f6   :  { %v4086_v47 = vmax.f32 %v4084_v26, %v4085_v19  ;;  %v5257_v19 = vld [vmem:[#allocation11 + $0x8] sm:$0xff]  }
 0x4f8   :  { %v4113_v10 = vsel %vm4112_vm4, %v4086_v47, %v4111_v51 }
 0x4f9   :  { %v4115_v56 = vsel %vm4114_vm6, %v4093_v59, %v4113_v10 }
 0x4fa   :  { %4117 = vst [vmem:[#allocation12] sm:$0xff] %v4115_v56 }
 0x545   :  { %v2950_v42 = vpop.permute.xlu1 %2949 }
 0x546   :  { %v6275_v60 = vsel %vm211_vm0, 0, %v2950_v42  ;;  %v2980_v12 = vsel %vm211_vm0, %v2950_v42, 0 }
 0x547   :  { %v2997_v20 = vshrl.u32 %v6275_v60, 16  ;;  %v2999_v40 = vshll.u32 %v6275_v60, 16  ;;  %v3003_v54 = vshll.u32 %v2980_v12, 16  ;;  %v3368_v0 = vrot.slane %v6275_v60, 1 }
 0x548   :  { %v3369_v39 = vrot.slane %v2980_v12, 1  ;;  %v3562_v13 = vshrl.u32 %v2980_v12, 16  ;;  %v3786_v41 = vrot.slane %v6275_v60, 2  ;;  %v3787_v23 = vrot.slane %v2980_v12, 2 }
 0x549   :  { %v3001_v8 = vrot.slane %v2999_v40, 1  ;;  %v6282_v52 = vrot.slane %v2997_v20, 1  ;;  %v6284_v1 = vrot.slane %v2999_v40, 2  ;;  %v6288_v5 = vrot.slane %v3003_v54, 2 }
 0x54a   :  { %v6286_v29 = vrot.slane %v3562_v13, 1  ;;  %v2948_v38 = vpop.permute.xlu0 %2947  ;;  %v6291_v33 = vsel %vm602_vm5, %v3368_v0, %v3369_v39  ;;  %v6294_v30 = vsel %vm1751_vm12, %v3786_v41, %v3787_v23  ;;  %v3005_v50 = vrot.slane %v3003_v54, 1  ;;  %v5258_v41 = vld [vmem:[#allocation11 + $0x10] sm:$0xff]  }
 0x54b   :  { %6680 = vst [vmem:[#allocation17_spill] sm:$0xff] %v6294_v30  ;;  %v3002_v28 = vor.u32 %v3001_v8, %v2997_v20  ;;  %v3561_v35 = vor.u32 %v6284_v1, %v6282_v52  ;;  %v6299_v7 = vsel %vm211_vm0, 0, %v2948_v38  ;;  %v6302_v46 = vsel %vm211_vm0, %v2948_v38, 0 }
 0x54c   :  { %v3566_v9 = vor.u32 %v6288_v5, %v6286_v29  ;;  %v2989_v43 = vshll.u32 %v6299_v7, 16  ;;  %v2993_v62 = vshll.u32 %v6302_v46, 16  ;;  %v3553_v21 = vshrl.u32 %v6302_v46, 16 }
 0x54d   :  { %v2954_v48 = vpop.permute.xlu1 %2953  ;;  %v2987_v61 = vshrl.u32 %v6299_v7, 16  ;;  %v3366_v44 = vrot.slane %v6302_v46, 1  ;;  %v3784_v17 = vrot.slane %v6302_v46, 2  ;;  %v3006_v24 = vsel %vm230_vm3, %v3002_v28, %v3005_v50 }
 0x54e   :  { %v6312_v2 = vsel %vm211_vm0, 0, %v2954_v48  ;;  %v6315_v49 = vsel %vm211_vm0, %v2954_v48, 0  ;;  %v2995_v25 = vrot.slane %v2993_v62, 1  ;;  %v3556_v18 = vrot.slane %v2993_v62, 2 }
 0x54f   :  { %v3019_v11 = vshll.u32 %v6312_v2, 16  ;;  %v3023_v55 = vshll.u32 %v6315_v49, 16  ;;  %v3580_v36 = vshrl.u32 %v6315_v49, 16  ;;  %v2991_v16 = vrot.slane %v2989_v43, 1 }
 0x550   :  { %v3555_v27 = vrot.slane %v3553_v21, 1  ;;  %v3017_v34 = vshrl.u32 %v6312_v2, 16  ;;  %v3365_v4 = vrot.slane %v6299_v7, 1  ;;  %v3375_v58 = vrot.slane %v6315_v49, 1 }
 0x551   :  { %v2952_v45 = vpop.permute.xlu0 %2951  ;;  %v3021_v53 = vrot.slane %v3019_v11, 1  ;;  %v2992_v15 = vor.u32 %v2991_v16, %v2987_v61  ;;  %v6331_v22 = vrot.slane %v3580_v36, 1  ;;  %v6333_v3 = vrot.slane %v3023_v55, 2 }
 0x552   :  { %v6326_v57 = vsel %vm211_vm0, 0, %v2952_v45  ;;  %v6329_v63 = vsel %vm211_vm0, %v2952_v45, 0  ;;  %v6345_v56 = vsel %vm602_vm5, %v3365_v4, %v3366_v44  ;;  %v3374_v40 = vrot.slane %v6312_v2, 1 }
 0x553   :  { %v3009_v6 = vshll.u32 %v6326_v57, 16  ;;  %v3013_v14 = vshll.u32 %v6329_v63, 16  ;;  %v3007_v37 = vshrl.u32 %v6326_v57, 16  ;;  %v3372_v51 = vrot.slane %v6329_v63, 1 }
 0x554   :  { %v3571_v26 = vshrl.u32 %v6329_v63, 16  ;;  %v2996_v32 = vsel %vm230_vm3, %v2992_v15, %v2995_v25  ;;  %v3022_v10 = vor.u32 %v3021_v53, %v3017_v34  ;;  %v3371_v20 = vrot.slane %v6326_v57, 1  ;;  %v5259_v25 = vld [vmem:[#allocation11 + $0x18] sm:$0xff]  }
 0x555   :  { %v6341_v47 = vrot.slane %v3013_v14, 2  ;;  %4886 = vmatprep.mubr.msk.bf16.mxu1 %vm1057_vm10, %v2996_v32  ;;  %v3011_v59 = vrot.slane %v3009_v6, 1  ;;  %v3015_v42 = vrot.slane %v3013_v14, 1  ;;  %v3550_v0 = vrot.slane %v2987_v61, 1 }
 0x556   :  { %v6347_v12 = vrot.slane %v3571_v26, 1  ;;  %4887 = vmatmul.mubr.msk.bf16.vlgmr.msra.gmra.mrb[16].mxu1 %vm1057_vm10, %v3006_v24  ;;  %v3551_v39 = vrot.slane %v2989_v43, 2  ;;  %v3557_v13 = vor.u32 %v3556_v18, %v3555_v27  ;;  %v6354_v23 = vsel %vm602_vm5, %v3371_v20, %v3372_v51 }
 0x557   :  { %4903 = vmatpush3.bf16.msra.mxu1 %v6247_v31  ;;  %v3012_v54 = vor.u32 %v3011_v59, %v3007_v37  ;;  %v6357_v8 = vsel %vm602_vm5, %v3374_v40, %v3375_v58  ;;  %v6360_v52 = vsel %vm1517_vm11, %v3561_v35, %v3566_v9  ;;  %v6362_v1 = vrot.slane %v3007_v37, 1  ;;  %v6417_v59 = vld [vmem:[#allocation11 + $0x40] sm:$0xff]  }
 0x558   :  { %4904 = vmatprep.subr.bf16.mxu1 %v5257_v19  ;;  %6681 = vst [vmem:[#allocation18_spill] sm:$0xff] %v6357_v8  ;;  %6682 = vst [vmem:[#allocation19_spill] sm:$0xff] %v6360_v52  ;;  %v3552_v31 = vor.u32 %v3551_v39, %v3550_v0  ;;  %v6365_v5 = vrot.slane %v3009_v6, 2  ;;  %v6370_v28 = vrot.slane %v3017_v34, 1  ;;  %v6372_v43 = vrot.slane %v3019_v11, 2 }
 0x559   :  { %v3016_v29 = vsel %vm230_vm3, %v3012_v54, %v3015_v42  ;;  %v3783_v9 = vrot.slane %v6299_v7, 2  ;;  %v3025_v62 = vrot.slane %v3023_v55, 1 }
 0x55a   :  { %4890 = vmatprep.mubr.msk.bf16.mxu1 %vm1057_vm10, %v3016_v29  ;;  %v2958_v21 = vpop.permute.xlu1 %2957  ;;  %v6379_v48 = vsel %vm1517_vm11, %v3552_v31, %v3557_v13 }
 0x55b   :  { %4905 = vmatpush3.bf16.msra.mxu1 %v5257_v19  ;;  %6683 = vst [vmem:[#allocation20_spill] sm:$0xff] %v6379_v48  ;;  %v6384_v44 = vsel %vm211_vm0, 0, %v2958_v21  ;;  %v6387_v11 = vsel %vm211_vm0, %v2958_v21, 0  ;;  %v2956_v24 = vpop.permute.xlu0 %2955  ;;  %v6394_v18 = vsel %vm1751_vm12, %v3783_v9, %v3784_v17  ;;  %v3026_v27 = vsel %vm230_vm3, %v3022_v10, %v3025_v62 }
 0x55c   :  { %4906 = vmatprep.subr.bf16.mxu1 %v5258_v41  ;;  %6684 = vst [vmem:[#allocation21_spill] sm:$0xff] %v6394_v18  ;;  %v3043_v16 = vshll.u32 %v6387_v11, 16  ;;  %v3598_v45 = vshrl.u32 %v6387_v11, 16  ;;  %v6402_v53 = vsel %vm211_vm0, 0, %v2956_v24  ;;  %v6405_v4 = vsel %vm211_vm0, %v2956_v24, 0 }
 0x55d   :  { %v6677_v58 = vshll.u32 %v6384_v44, 16  ;;  %v3033_v26 = vshll.u32 %v6405_v4, 16  ;;  %v3589_v32 = vshrl.u32 %v6405_v4, 16  ;;  %v3027_v10 = vshrl.u32 %v6402_v53, 16 }
 0x55e   :  { %4891 = vmatmul.mubr.msk.bf16.gmra.mrb[20].mxu1 %vm1057_vm10, %v3026_v27  ;;  %v3045_v37 = vrot.slane %v3043_v16, 1  ;;  %v6413_v51 = vrot.slane %v3043_v16, 2  ;;  %v3029_v42 = vshll.u32 %v6402_v53, 16  ;;  %v6427_v54 = vrot.slane %v3598_v45, 1 }
 0x55f   :  { %v2962_v14 = vpop.permute.xlu1 %2961  ;;  %4907 = vmatpush3.bf16.msra.mxu1 %v5258_v41  ;;  %v3035_v41 = vrot.slane %v3033_v26, 1  ;;  %v6434_v29 = vrot.slane %v3589_v32, 1  ;;  %v3592_v62 = vrot.slane %v3033_v26, 2  ;;  %v3041_v61 = vrot.slane %v6677_v58, 1 }
 0x560   :  { %v2960_v19 = vpop.permute.xlu0 %2959  ;;  %4908 = vmatprep.subr.bf16.mxu1 %v5259_v25  ;;  %v6422_v20 = vsel %vm211_vm0, 0, %v2962_v14  ;;  %v6425_v40 = vsel %vm211_vm0, %v2962_v14, 0  ;;  %v3031_v35 = vrot.slane %v3029_v42, 1  ;;  %v3380_v8 = vrot.slane %v6384_v44, 1 }
 0x561   :  { %v3057_v39 = vshrl.u32 %v6422_v20, 16  ;;  %v6432_v13 = vsel %vm211_vm0, 0, %v2960_v19  ;;  %v3059_v31 = vshll.u32 %v6422_v20, 16  ;;  %v3063_v9 = vshll.u32 %v6425_v40, 16 }
 0x562   :  { %v3386_v21 = vrot.slane %v6422_v20, 1  ;;  %v3387_v24 = vrot.slane %v6425_v40, 1  ;;  %v3616_v16 = vshrl.u32 %v6425_v40, 16  ;;  %v3804_v14 = vrot.slane %v6422_v20, 2 }
 0x563   :  { %4909 = vmatpush3.bf16.msra.mxu1 %v5259_v25  ;;  %v3613_v27 = vrot.slane %v3057_v39, 1  ;;  %v3619_v45 = vrot.slane %v3063_v9, 2  ;;  %v3805_v32 = vrot.slane %v6425_v40, 2  ;;  %v3061_v6 = vrot.slane %v3059_v31, 1 }
 0x564   :  { %4926 = vmatprep.subr.bf16.mxu1 %v6417_v59  ;;  %v3618_v0 = vrot.slane %v3616_v16, 1  ;;  %v2985_v46 = vsel %vm211_vm0, %v2960_v19, 0  ;;  %v3049_v25 = vshll.u32 %v6432_v13, 16  ;;  %v3065_v26 = vrot.slane %v3063_v9, 1 }
 0x565   :  { %v3047_v50 = vshrl.u32 %v6432_v13, 16  ;;  %v3053_v34 = vshll.u32 %v2985_v46, 16  ;;  %v3607_v36 = vshrl.u32 %v2985_v46, 16  ;;  %v3614_v15 = vrot.slane %v3059_v31, 2 }
 0x566   :  { %v3620_v55 = vor.u32 %v3619_v45, %v3618_v0  ;;  %v3051_v38 = vrot.slane %v3049_v25, 1  ;;  %v3384_v40 = vrot.slane %v2985_v46, 1  ;;  %v3802_v30 = vrot.slane %v2985_v46, 2 }
 0x567   :  { %v3055_v17 = vrot.slane %v3053_v34, 1  ;;  %v3609_v16 = vrot.slane %v3607_v36, 1  ;;  %v3032_v18 = vor.u32 %v3031_v35, %v3027_v10  ;;  %v6685_v19 = vshrl.u32 %v6384_v44, 16 }
 0x568   :  { %v3052_v9 = vor.u32 %v3051_v38, %v3047_v50  ;;  %v3610_v48 = vrot.slane %v3053_v34, 2  ;;  %v3383_v0 = vrot.slane %v6432_v13, 1  ;;  %v6454_v45 = vsel %vm602_vm5, %v3386_v21, %v3387_v24 }
 0x569   :  { %v3042_v52 = vor.u32 %v3041_v61, %v6685_v19  ;;  %v3036_v58 = vsel %vm230_vm3, %v3032_v18, %v3035_v41  ;;  %v3062_v36 = vor.u32 %v3061_v6, %v3057_v39  ;;  %v6686_v35 = vrot.slane %v6387_v11, 1 }
 0x56a   :  { %v3056_v46 = vsel %vm230_vm3, %v3052_v9, %v3055_v17  ;;  %4894 = vmatprep.mubr.msk.bf16.mxu1 %vm1057_vm10, %v3036_v58  ;;  %v6466_v61 = vsel %vm602_vm5, %v3383_v0, %v3384_v40  ;;  %v6687_v34 = vor.u32 %v6341_v47, %v6347_v12  ;;  %v6688_v18 = vor.u32 %v6365_v5, %v6362_v1 }
 0x56b   :  { %v3046_v31 = vsel %vm230_vm3, %v3042_v52, %v3045_v37  ;;  %v6463_v38 = vsel %vm602_vm5, %v3380_v8, %v6686_v35  ;;  %v6689_v17 = vor.u32 %v6333_v3, %v6331_v22  ;;  %v6690_v58 = vor.u32 %v6372_v43, %v6370_v28  ;;  %v5261_v35 = vld [vmem:[#allocation11 + $0x48] sm:$0xff]  }
 0x56c   :  { %v6475_v52 = vsel %vm1517_vm11, %v6688_v18, %v6687_v34  ;;  %4895 = vmatmul.mubr.msk.bf16.gmra.mrb[24].mxu1 %vm1057_vm10, %v3046_v31  ;;  %v3586_v6 = vrot.slane %v3027_v10, 1  ;;  %v3587_v37 = vrot.slane %v3029_v42, 2  ;;  %v3593_v47 = vor.u32 %v3592_v62, %v6434_v29 }
 0x56d   :  { %v6484_v8 = vsel %vm1517_vm11, %v6690_v58, %v6689_v17  ;;  %v6691_v12 = vmov %v6685_v19  ;;  %4898 = vmatprep.mubr.msk.bf16.mxu1 %vm1057_vm10, %v3056_v46  ;;  %v6692_v5 = vshll.u32 %v6384_v44, 16  ;;  %v3602_v3 = vor.u32 %v6413_v51, %v6427_v54 }
 0x56e   :  { %v3595_v1 = vrot.slane %v6691_v12, 1  ;;  %v3604_v28 = vrot.slane %v3047_v50, 1  ;;  %v3605_v43 = vrot.slane %v3049_v25, 2  ;;  %v3588_v39 = vor.u32 %v3587_v37, %v3586_v6 }
 0x56f   :  { %v3596_v22 = vrot.slane %v6692_v5, 2  ;;  %v3611_v41 = vor.u32 %v3610_v48, %v3609_v16  ;;  %v3615_v21 = vor.u32 %v3614_v15, %v3613_v27  ;;  %v6693_v10 = vrot.slane %v6329_v63, 2 }
 0x570   :  { %v6694_v42 = vrot.slane %v6326_v57, 2  ;;  %v3606_v24 = vor.u32 %v3605_v43, %v3604_v28  ;;  %v6695_v40 = vrot.slane %v6315_v49, 2  ;;  %v6696_v19 = vrot.slane %v6312_v2, 2 }
 0x571   :  { %v3597_v62 = vor.u32 %v3596_v22, %v3595_v1  ;;  %v3795_v50 = vrot.slane %v6402_v53, 2  ;;  %v6511_v48 = vsel %vm1517_vm11, %v3588_v39, %v3593_v47  ;;  %v6514_v63 = vsel %vm1517_vm11, %v3615_v21, %v3620_v55 }
 0x572   :  { %v6500_v29 = vsel %vm1751_vm12, %v6694_v42, %v6693_v10  ;;  %v6507_v51 = vsel %vm1751_vm12, %v6696_v19, %v6695_v40  ;;  %v3798_v15 = vrot.slane %v6384_v44, 2  ;;  %v3801_v54 = vrot.slane %v6432_v13, 2 }
 0x573   :  { %v6519_v27 = vsel %vm1517_vm11, %v3597_v62, %v3602_v3  ;;  %v6522_v49 = vsel %vm1517_vm11, %v3606_v24, %v3611_v41  ;;  %v6697_v25 = vrot.slane %v6405_v4, 2  ;;  %v6530_v9 = vsel %vm1751_vm12, %v3804_v14, %v3805_v32  ;;  %v5271_v14 = vld [vmem:[#allocation11 + $0x98] sm:$0xff]   ;;  %v6702_v32 = vld [vmem:[#allocation21_spill] sm:$0xff] }
 0x574   :  { %v6698_v55 = vrot.slane %v6387_v11, 2  ;;  %v6538_v31 = vsel %vm1751_vm12, %v3801_v54, %v3802_v30  ;;  %v3066_v46 = vsel %vm230_vm3, %v3062_v36, %v3065_v26  ;;  %v5262_v11 = vld [vmem:[#allocation11 + $0x50] sm:$0xff]   ;;  %v5263_v30 = vld [vmem:[#allocation11 + $0x58] sm:$0xff]   ;;  %v6703_v26 = vld [vmem:[#allocation17_spill] sm:$0xff] }
 0x575   :  { %v6527_v16 = vsel %vm1751_vm12, %v3795_v50, %v6697_v25  ;;  %4899 = vmatmul.mubr.msk.bf16.gmra.mrb[28].mxu1 %vm1057_vm10, %v3066_v46 }
 0x576   :  { %v6535_v0 = vsel %vm1751_vm12, %v3798_v15, %v6698_v55  ;;  %4910 = vmatprep.mubr.msk.bf16.mxu1 %vm1057_vm10, %v6299_v7  ;;  %v5264_v7 = vld [vmem:[#allocation11 + $0x60] sm:$0xff]  }
 0x57d   :  { %4911 = vmatmul.mubr.msk.bf16.vlgmr.msra.gmra.mrb[16].mxu1 %vm1057_vm10, %v6275_v60  ;;  %v5265_v60 = vld [vmem:[#allocation11 + $0x68] sm:$0xff]  }
 0x57e   :  { %4927 = vmatpush3.bf16.msra.mxu1 %v6417_v59  ;;  %4914 = vmatprep.mubr.msk.bf16.mxu1 %vm1057_vm10, %v6326_v57  ;;  %v3378_v57 = vrot.slane %v6405_v4, 1  ;;  %v5267_v59 = vld [vmem:[#allocation11 + $0x78] sm:$0xff]  }
 0x57f   :  { %4928 = vmatprep.subr.bf16.mxu1 %v5261_v35  ;;  %v6701_v4 = vld [vmem:[#allocation19_spill] sm:$0xff] }
 0x582   :  { %4929 = vmatpush3.bf16.msra.mxu1 %v5261_v35 }
 0x583   :  { %4930 = vmatprep.subr.bf16.mxu1 %v5262_v11 }
 0x585   :  { %4915 = vmatmul.mubr.msk.bf16.gmra.mrb[20].mxu1 %vm1057_vm10, %v6312_v2  ;;  %v5266_v2 = vld [vmem:[#allocation11 + $0x70] sm:$0xff]  }
 0x586   :  { %4918 = vmatprep.mubr.msk.bf16.mxu1 %vm1057_vm10, %v6402_v53  ;;  %4931 = vmatpush3.bf16.msra.mxu1 %v5262_v11 }
 0x587   :  { %4932 = vmatprep.subr.bf16.mxu1 %v5263_v30 }
 0x58a   :  { %4933 = vmatpush3.bf16.msra.mxu1 %v5263_v30 }
 0x58b   :  { %4950 = vmatprep.subr.bf16.mxu1 %v5264_v7 }
 0x58d   :  { %4919 = vmatmul.mubr.msk.bf16.gmra.mrb[24].mxu1 %vm1057_vm10, %v6384_v44  ;;  %v3377_v44 = vrot.slane %v6402_v53, 1  ;;  %v5269_v53 = vld [vmem:[#allocation11 + $0x88] sm:$0xff]  }
 0x58e   :  { %4922 = vmatprep.mubr.msk.bf16.mxu1 %vm1057_vm10, %v6432_v13  ;;  %v5270_v13 = vld [vmem:[#allocation11 + $0x90] sm:$0xff]  }
 0x595   :  { %4923 = vmatmul.mubr.msk.bf16.gmra.mrb[28].mxu1 %vm1057_vm10, %v6422_v20  ;;  %v6699_v20 = vld [vmem:[#allocation18_spill] sm:$0xff] }
 0x596   :  { %4934 = vmatprep.mubr.msk.bf16.mxu1 %vm1057_vm10, %v6345_v56  ;;  %v3379_v56 = vsel %vm602_vm5, %v3377_v44, %v3378_v57 }
 0x59d   :  { %4935 = vmatmul.mubr.msk.bf16.vlgmr.msra.gmra.mrb[16].mxu1 %vm1057_vm10, %v6291_v33  ;;  %v5268_v33 = vld [vmem:[#allocation11 + $0x80] sm:$0xff]  }
 0x59e   :  { %4951 = vmatpush3.bf16.msra.mxu1 %v5264_v7  ;;  %4938 = vmatprep.mubr.msk.bf16.mxu1 %vm1057_vm10, %v6354_v23  ;;  %v6700_v23 = vld [vmem:[#allocation20_spill] sm:$0xff] }
 0x59f   :  { %4952 = vmatprep.subr.bf16.mxu1 %v5265_v60 }
 0x5a2   :  { %4953 = vmatpush3.bf16.msra.mxu1 %v5265_v60 }
 0x5a3   :  { %4954 = vmatprep.subr.bf16.mxu1 %v5266_v2 }
 0x5a5   :  { %4939 = vmatmul.mubr.msk.bf16.gmra.mrb[20].mxu1 %vm1057_vm10, %v6699_v20 }
 0x5a6   :  { %4942 = vmatprep.mubr.msk.bf16.mxu1 %vm1057_vm10, %v3379_v56  ;;  %4955 = vmatpush3.bf16.msra.mxu1 %v5266_v2 }
 0x5a7   :  { %4956 = vmatprep.subr.bf16.mxu1 %v5267_v59 }
 0x5aa   :  { %4957 = vmatpush3.bf16.msra.mxu1 %v5267_v59 }
 0x5ab   :  { %4974 = vmatprep.subr.bf16.mxu1 %v5268_v33 }
 0x5ad   :  { %4943 = vmatmul.mubr.msk.bf16.gmra.mrb[24].mxu1 %vm1057_vm10, %v6463_v38 }
 0x5ae   :  { %4946 = vmatprep.mubr.msk.bf16.mxu1 %vm1057_vm10, %v6466_v61 }
 0x5b5   :  { %4947 = vmatmul.mubr.msk.bf16.gmra.mrb[28].mxu1 %vm1057_vm10, %v6454_v45  ;;  %v6612_v45 = vld [vmem:[%s6675_s8] ss:$0 sm:$0xff]  ;;  %s5423_s8 = smov [#allocation12]  }
 0x5b6   :  { %4958 = vmatprep.mubr.msk.bf16.mxu1 %vm1057_vm10, %v6700_v23  ;;  %s4215_s1 = sshll.u32 %s5423_s8, 4  ;;  %s4216_s1 = int_to_ptr.vmem [resolvable:$true] %s4215_s1 }
 0x5b7   :  { %s5382_s10 = scalar_lea.vmem %s4216_s1, 128  ;;  %p5387_p13 = scmp.lt.s32.totalorder %s4216_s1, %s4216_s1 }
 0x5b8   :  { %p5383_p12 = scmp.ne.s32.totalorder %s4216_s1, %s5382_s10  ;;  %p5388_p0 = scmp.lt.s32.totalorder %s5382_s10, %s5382_s10 }
 0x5ba   :  { %p5389_p1 = por %p5388_p0, %p5387_p13 }
 0x5bc   :  { %p5390_p2 = pnand %p5389_p1, %p5383_p12 }
 0x5bd   :  { %4959 = vmatmul.mubr.msk.bf16.vlgmr.msra.gmra.mrb[16].mxu1 %vm1057_vm10, %v6701_v4 }
 0x5be   :  { %4975 = vmatpush3.bf16.msra.mxu1 %v5268_v33  ;;  %4962 = vmatprep.mubr.msk.bf16.mxu1 %vm1057_vm10, %v6475_v52 }
 0x5bf   :  { %4976 = vmatprep.subr.bf16.mxu1 %v5269_v53 }
 0x5c2   :  { %4977 = vmatpush3.bf16.msra.mxu1 %v5269_v53 }
 0x5c3   :  { %4978 = vmatprep.subr.bf16.mxu1 %v5270_v13 }
 0x5c5   :  { %4963 = vmatmul.mubr.msk.bf16.gmra.mrb[20].mxu1 %vm1057_vm10, %v6484_v8 }
 0x5c6   :  { %4966 = vmatprep.mubr.msk.bf16.mxu1 %vm1057_vm10, %v6511_v48  ;;  %4979 = vmatpush3.bf16.msra.mxu1 %v5270_v13 }
 0x5c7   :  { %4980 = vmatprep.subr.bf16.mxu1 %v5271_v14 }
 0x5ca   :  { %4981 = vmatpush3.bf16.msra.mxu1 %v5271_v14 }
 0x5cd   :  { %4967 = vmatmul.mubr.msk.bf16.gmra.mrb[24].mxu1 %vm1057_vm10, %v6519_v27 }
 0x5ce   :  { %4970 = vmatprep.mubr.msk.bf16.mxu1 %vm1057_vm10, %v6522_v49 }
 0x5d5   :  { %4971 = vmatmul.mubr.msk.bf16.gmra.mrb[28].mxu1 %vm1057_vm10, %v6514_v63 }
 0x5d6   :  { %4982 = vmatprep.mubr.msk.bf16.mxu1 %vm1057_vm10, %v6702_v32 }
 0x5dd   :  { %4983 = vmatmul.mubr.msk.bf16.vlgmr.msra.gmra.mrb[16].mxu1 %vm1057_vm10, %v6703_v26 }
 0x5de   :  { %4986 = vmatprep.mubr.msk.bf16.mxu1 %vm1057_vm10, %v6500_v29 }
 0x5e5   :  { %4987 = vmatmul.mubr.msk.bf16.gmra.mrb[20].mxu1 %vm1057_vm10, %v6507_v51 }
 0x5e6   :  { %4990 = vmatprep.mubr.msk.bf16.mxu1 %vm1057_vm10, %v6527_v16 }
 0x5ed   :  { %4991 = vmatmul.mubr.msk.bf16.gmra.mrb[24].mxu1 %vm1057_vm10, %v6535_v0 }
 0x5ee   :  { %4994 = vmatprep.mubr.msk.bf16.mxu1 %vm1057_vm10, %v6538_v31 }
 0x5f5   :  { %4995 = vmatmul.mubr.msk.bf16.gmra.mrb[28].mxu1 %vm1057_vm10, %v6530_v9 }
 0x6b0   :  { %v4984_v36 = vpop.f32.mrb[16].mxu1 }
 0x6b1   :  { %v3976_v38 = vadd.f32 %v4984_v36, %v6612_v45  ;;  %v3889_v61 = vpop.f32.mrb[17].mxu1 }
 0x6b2   :  { %v3974_v34 = vadd.f32 %v6612_v45, %v3889_v61  ;;  %v4985_v18 = vpop.f32.mrb[18].mxu1 }
 0x6b3   :  { %vm3992_vm0 = vcmp.ge.f32.partialorder %v3976_v38, 0.0  ;;  %v4008_v52 = vmul.f32 0.01, %v3976_v38  ;;  %v3977_v17 = vadd.f32 %v4985_v18, %v6612_v45  ;;  %v3892_v58 = vpop.f32.mrb[19].mxu1 }
 0x6b4   :  { %vm3990_vm3 = vcmp.ge.f32.partialorder %v3974_v34, 0.0  ;;  %v4006_v8 = vmul.f32 0.01, %v3974_v34  ;;  %v3975_v6 = vadd.f32 %v6612_v45, %v3892_v58 }
 0x6b5   :  { %v4024_v37 = vsel %vm3992_vm0, %v3976_v38, %v4008_v52  ;;  %vm3993_vm5 = vcmp.ge.f32.partialorder %v3977_v17, 0.0  ;;  %v4009_v47 = vmul.f32 0.01, %v3977_v17 }
 0x6b6   :  { %v4022_v12 = vsel %vm3990_vm3, %v3974_v34, %v4006_v8  ;;  %vm3991_vm11 = vcmp.ge.f32.partialorder %v3975_v6, 0.0  ;;  %v4007_v1 = vmul.f32 0.01, %v3975_v6  ;;  %v4127_v22 = vsel %vm1057_vm10, %v4024_v37, -inf }
 0x6b7   :  { %v4025_v5 = vsel %vm3993_vm5, %v3977_v17, %v4009_v47  ;;  %v4118_v39 = vsel %vm1057_vm10, %v4022_v12, -inf }
 0x6b8   :  { %v4128_v3 = vsel %vm1057_vm10, %v4025_v5, -inf  ;;  %v4023_v28 = vsel %vm3991_vm11, %v3975_v6, %v4007_v1  ;;  %v4988_v43 = vpop.f32.mrb[20].mxu1 }
 0x6b9   :  { %v4129_v41 = vmax.f32 %v4127_v22, %v4128_v3  ;;  %v4119_v21 = vsel %vm1057_vm10, %v4023_v28, -inf  ;;  %v3980_v10 = vadd.f32 %v4988_v43, %v6612_v45  ;;  %v3905_v42 = vpop.f32.mrb[21].mxu1 }
 0x6ba   :  { %v4120_v29 = vmax.f32 %v4118_v39, %v4119_v21  ;;  %v3978_v62 = vadd.f32 %v6612_v45, %v3905_v42  ;;  %v4989_v24 = vpop.f32.mrb[22].mxu1 }
 0x6bb   :  { %v4130_v40 = vrot.slane %v4129_v41, 4  ;;  %vm3996_vm12 = vcmp.ge.f32.partialorder %v3980_v10, 0.0  ;;  %v4012_v19 = vmul.f32 0.01, %v3980_v10  ;;  %v3981_v51 = vadd.f32 %v4989_v24, %v6612_v45  ;;  %v3908_v50 = vpop.f32.mrb[23].mxu1 }
 0x6bc   :  { %v4121_v48 = vrot.slane %v4120_v29, 4  ;;  %vm3994_vm2 = vcmp.ge.f32.partialorder %v3978_v62, 0.0  ;;  %v4010_v63 = vmul.f32 0.01, %v3978_v62  ;;  %v3979_v15 = vadd.f32 %v6612_v45, %v3908_v50 }
 0x6bd   :  { %v4131_v54 = vmax.f32 %v4129_v41, %v4130_v40  ;;  %v4028_v27 = vsel %vm3996_vm12, %v3980_v10, %v4012_v19  ;;  %vm3997_vm9 = vcmp.ge.f32.partialorder %v3981_v51, 0.0  ;;  %v4013_v49 = vmul.f32 0.01, %v3981_v51 }
 0x6be   :  { %v4122_v25 = vmax.f32 %v4120_v29, %v4121_v48  ;;  %vm3995_vm0 = vcmp.ge.f32.partialorder %v3979_v15, 0.0  ;;  %v4026_v9 = vsel %vm3994_vm2, %v3978_v62, %v4010_v63  ;;  %v4011_v0 = vmul.f32 0.01, %v3979_v15 }
 0x6bf   :  { %v4132_v16 = vrot.slane %v4131_v54, 2  ;;  %v4029_v55 = vsel %vm3997_vm9, %v3981_v51, %v4013_v49  ;;  %v4145_v46 = vsel %vm1057_vm10, %v4028_v27, -inf  ;;  %v4136_v59 = vsel %vm1057_vm10, %v4026_v9, -inf }
 0x6c0   :  { %v4123_v31 = vrot.slane %v4122_v25, 2  ;;  %v4146_v35 = vsel %vm1057_vm10, %v4029_v55, -inf  ;;  %v4992_v11 = vpop.f32.mrb[24].mxu1  ;;  %v4027_v60 = vsel %vm3995_vm0, %v3979_v15, %v4011_v0 }
 0x6c1   :  { %v4133_v30 = vmax.f32 %v4131_v54, %v4132_v16  ;;  %v4147_v7 = vmax.f32 %v4145_v46, %v4146_v35  ;;  %v3984_v2 = vadd.f32 %v4992_v11, %v6612_v45  ;;  %v3921_v57 = vpop.f32.mrb[25].mxu1  ;;  %v4137_v20 = vsel %vm1057_vm10, %v4027_v60, -inf }
 0x6c2   :  { %v4124_v44 = vmax.f32 %v4122_v25, %v4123_v31  ;;  %v3982_v56 = vadd.f32 %v6612_v45, %v3921_v57  ;;  %v4993_v33 = vpop.f32.mrb[26].mxu1  ;;  %v4138_v4 = vmax.f32 %v4136_v59, %v4137_v20 }
 0x6c3   :  { %v4134_v23 = vrot.slane %v4133_v30, 1  ;;  %v4148_v53 = vrot.slane %v4147_v7, 4  ;;  %vm4000_vm3 = vcmp.ge.f32.partialorder %v3984_v2, 0.0  ;;  %v3924_v13 = vpop.f32.mrb[27].mxu1  ;;  %v4016_v32 = vmul.f32 0.01, %v3984_v2 }
 0x6c4   :  { %v4125_v14 = vrot.slane %v4124_v44, 1  ;;  %vm3998_vm5 = vcmp.ge.f32.partialorder %v3982_v56, 0.0  ;;  %v4014_v26 = vmul.f32 0.01, %v3982_v56  ;;  %v4139_v61 = vrot.slane %v4138_v4, 4 }
 0x6c5   :  { %v4135_v36 = vmax.f32 %v4133_v30, %v4134_v23  ;;  %v4149_v38 = vmax.f32 %v4147_v7, %v4148_v53  ;;  %v3985_v34 = vadd.f32 %v4993_v33, %v6612_v45  ;;  %v4032_v52 = vsel %vm4000_vm3, %v3984_v2, %v4016_v32 }
 0x6c6   :  { %v4126_v18 = vmax.f32 %v4124_v44, %v4125_v14  ;;  %v3983_v17 = vadd.f32 %v6612_v45, %v3924_v13  ;;  %v4140_v8 = vmax.f32 %v4138_v4, %v4139_v61  ;;  %v4030_v6 = vsel %vm3998_vm5, %v3982_v56, %v4014_v26 }
 0x6c7   :  { %v4150_v58 = vrot.slane %v4149_v38, 2  ;;  %vm4001_vm11 = vcmp.ge.f32.partialorder %v3985_v34, 0.0  ;;  %v4017_v37 = vmul.f32 0.01, %v3985_v34  ;;  %v4163_v5 = vsel %vm1057_vm10, %v4032_v52, -inf }
 0x6c8   :  { %vm3999_vm12 = vcmp.ge.f32.partialorder %v3983_v17, 0.0  ;;  %v4015_v47 = vmul.f32 0.01, %v3983_v17  ;;  %v4141_v1 = vrot.slane %v4140_v8, 2  ;;  %v4996_v22 = vpop.f32.mrb[28].mxu1  ;;  %v4198_v3 = vsel %vm4102_vm7, %v4135_v36, %v4126_v18 }
 0x6c9   :  { %v4151_v12 = vmax.f32 %v4149_v38, %v4150_v58  ;;  %v4154_v28 = vsel %vm1057_vm10, %v4030_v6, -inf  ;;  %v4033_v43 = vsel %vm4001_vm11, %v3985_v34, %v4017_v37  ;;  %v3988_v41 = vadd.f32 %v4996_v22, %v6612_v45  ;;  %v3937_v21 = vpop.f32.mrb[29].mxu1 }
 0x6ca   :  { %v4031_v39 = vsel %vm3999_vm12, %v3983_v17, %v4015_v47  ;;  %v4142_v42 = vmax.f32 %v4140_v8, %v4141_v1  ;;  %v4164_v29 = vsel %vm1057_vm10, %v4033_v43, -inf  ;;  %v4997_v24 = vpop.f32.mrb[30].mxu1  ;;  %v3986_v63 = vadd.f32 %v6612_v45, %v3937_v21 }
 0x6cb   :  { %v4152_v10 = vrot.slane %v4151_v12, 1  ;;  %v4155_v62 = vsel %vm1057_vm10, %v4031_v39, -inf  ;;  %v4165_v40 = vmax.f32 %v4163_v5, %v4164_v29  ;;  %vm4004_vm2 = vcmp.ge.f32.partialorder %v3988_v41, 0.0  ;;  %v3940_v50 = vpop.f32.mrb[31].mxu1 }
 0x6cc   :  { %v4156_v19 = vmax.f32 %v4154_v28, %v4155_v62  ;;  %v4020_v51 = vmul.f32 0.01, %v3988_v41  ;;  %v4143_v48 = vrot.slane %v4142_v42, 1  ;;  %v3989_v15 = vadd.f32 %v4997_v24, %v6612_v45 }
 0x6cd   :  { %v4153_v54 = vmax.f32 %v4151_v12, %v4152_v10  ;;  %v4166_v27 = vrot.slane %v4165_v40, 4  ;;  %v3987_v25 = vadd.f32 %v6612_v45, %v3940_v50  ;;  %vm4002_vm7 = vcmp.ge.f32.partialorder %v3986_v63, 0.0 }
 0x6ce   :  { %v4157_v49 = vrot.slane %v4156_v19, 4  ;;  %v4144_v16 = vmax.f32 %v4142_v42, %v4143_v48  ;;  %v4036_v9 = vsel %vm4004_vm2, %v3988_v41, %v4020_v51  ;;  %v4018_v55 = vmul.f32 0.01, %v3986_v63 }
 0x6cf   :  { %v4167_v0 = vmax.f32 %v4165_v40, %v4166_v27  ;;  %vm4005_vm9 = vcmp.ge.f32.partialorder %v3989_v15, 0.0  ;;  %v4021_v46 = vmul.f32 0.01, %v3989_v15  ;;  %vm4003_vm0 = vcmp.ge.f32.partialorder %v3987_v25, 0.0 }
 0x6d0   :  { %v4158_v31 = vmax.f32 %v4156_v19, %v4157_v49  ;;  %v4034_v35 = vsel %vm4002_vm7, %v3986_v63, %v4018_v55  ;;  %v4019_v11 = vmul.f32 0.01, %v3987_v25  ;;  %v4199_v30 = vsel %vm4104_vm13, %v4144_v16, %v4198_v3 }
 0x6d1   :  { %v4168_v7 = vrot.slane %v4167_v0, 2  ;;  %v4181_v2 = vsel %vm1057_vm10, %v4036_v9, -inf  ;;  %v4037_v57 = vsel %vm4005_vm9, %v3989_v15, %v4021_v46  ;;  %v4172_v45 = vsel %vm1057_vm10, %v4034_v35, -inf }
 0x6d2   :  { %v4159_v60 = vrot.slane %v4158_v31, 2  ;;  %v4182_v44 = vsel %vm1057_vm10, %v4037_v57, -inf  ;;  %v4035_v59 = vsel %vm4003_vm0, %v3987_v25, %v4019_v11  ;;  %v4200_v20 = vsel %vm4106_vm1, %v4153_v54, %v4199_v30 }
 0x6d3   :  { %v4169_v56 = vmax.f32 %v4167_v0, %v4168_v7  ;;  %v4183_v23 = vmax.f32 %v4181_v2, %v4182_v44  ;;  %v4173_v53 = vsel %vm1057_vm10, %v4035_v59, -inf }
 0x6d4   :  { %v4160_v33 = vmax.f32 %v4158_v31, %v4159_v60  ;;  %v4174_v4 = vmax.f32 %v4172_v45, %v4173_v53 }
 0x6d5   :  { %v4184_v14 = vrot.slane %v4183_v23, 4  ;;  %v4170_v32 = vrot.slane %v4169_v56, 1 }
 0x6d6   :  { %v4161_v13 = vrot.slane %v4160_v33, 1  ;;  %v4175_v26 = vrot.slane %v4174_v4, 4 }
 0x6d7   :  { %v4185_v36 = vmax.f32 %v4183_v23, %v4184_v14  ;;  %v4171_v34 = vmax.f32 %v4169_v56, %v4170_v32 }
 0x6d8   :  { %v4162_v38 = vmax.f32 %v4160_v33, %v4161_v13  ;;  %v4176_v61 = vmax.f32 %v4174_v4, %v4175_v26 }
 0x6d9   :  { %v4186_v18 = vrot.slane %v4185_v36, 2 }
 0x6da   :  { %v4201_v52 = vsel %vm4108_vm14, %v4162_v38, %v4200_v20  ;;  %v4177_v17 = vrot.slane %v4176_v61, 2 }
 0x6db   :  { %v4202_v58 = vsel %vm4110_vm15, %v4171_v34, %v4201_v52  ;;  %v4187_v8 = vmax.f32 %v4185_v36, %v4186_v18 }
 0x6dc   :  { %v4178_v6 = vmax.f32 %v4176_v61, %v4177_v17 }
 0x6dd   :  { %v4188_v37 = vrot.slane %v4187_v8, 1 }
 0x6de   :  { %v4179_v47 = vrot.slane %v4178_v6, 1 }
 0x6df   :  { %v4189_v1 = vmax.f32 %v4187_v8, %v4188_v37 }
 0x6e0   :  { %v4180_v12 = vmax.f32 %v4178_v6, %v4179_v47 }
 0x6e2   :  { %v4203_v5 = vsel %vm4112_vm4, %v4180_v12, %v4202_v58 }
 0x6e3   :  { %v4204_v22 = vsel %vm4114_vm6, %v4189_v1, %v4203_v5 }
 0x6e4   :  { %4205 = vrot.lane.b32.xlu0 %v4204_v22, %s5422_s4 }
 0x756   :  { %v4206_v3 = vpop.permute.xlu0 %4205 }
 0x757   :  { %4208 = vst.msk [vmem:[#allocation12] sm:$0xff] %vm2055_vm8, %v4206_v3 }
 0x758   :  { %5393 = shalt.err (!%p5390_p2)
}
 0x759   :  { %s5394_s16 = scalar_lea.hbm %s6676_s9, 128 }
 0x75a   :  { %p5395_p3 = scmp.ne.s32.totalorder %s6676_s9, %s5394_s16  ;;  %p5398_p4 = scmp.lt.u32.totalorder %s5394_s16, %s6676_s9 }
 0x75c   :  { %p5400_p5 = pnand %p5398_p4, %p5395_p3 }
 0x75e   :  { %5403 = shalt.err (!%p5400_p5)
}
 0x75f   :  { %4218 = dma.vmem_to_hbm [thread:$0]  %s4216_s1, 128, %s6676_s9, [#allocation5]  }
 0x760   :  { %5410 = dma.done.wait [#allocation5], 128  }
 0x761   :  { %5411 = vsyncadd [#allocation5], 4294967168 }
 0x762   :  { %4222 = vsyncpa [#allocation4], 1 }
 0x763   :  { %4223 = vsyncpa [#allocation7], 1 }
 0x764   :  { %4224 = vsyncpa [#allocation10], 1 }
 0x765   :  { %4225 = vsyncpa [#allocation5], 1 }

</bundles_post_ra>
